<compile_context>
chip_gen: v5e
topology: v5e:2x2
jax: 0.10.0
libtpu: 0.0.40
codegen_flags: <defaults>
</compile_context>

<pallas_src>
import jax
import jax.numpy as jnp
from jax import lax
from jax.experimental import pallas as pl
from jax.experimental.pallas import tpu as pltpu

NEG = -1e30  # "impossible" score used for tag / batch padding


def _crf_marginals_kernel(em_ref, mask_ref, start_ref, end_ref,
                          trans_ref, trans_t_ref, out_ref):
    S, Bb, Tp = em_ref.shape

    # ---------------- hoisted prologue (once per batch tile) ----------------
    start = start_ref[...]                       # (1, Tp)
    end = end_ref[...]                           # (1, Tp)
    trans = trans_ref[...]                       # (Tp, Tp)  transitions[from, to]
    trans_t = trans_t_ref[...]                   # (Tp, Tp)  transitions.T
    max_trans = jnp.max(trans)                   # scalar (same max for trans_t)
    exp_trans = jnp.exp(trans - max_trans)       # MXU operands, computed once
    exp_trans_t = jnp.exp(trans_t - max_trans)

    unroll = True if S <= 32 else 8

    # ------------- forward recurrence: alpha stored into out_ref -------------
    alpha0 = em_ref[0] + start                   # (Bb, Tp)
    out_ref[0] = alpha0

    def fwd_body(i, prev):
        # logsumexp_a(prev[b,a] + trans[a,c]) as an exp-space matmul on the MXU.
        m = jnp.max(prev, axis=-1, keepdims=True)                  # (Bb, 1)
        s = jnp.dot(jnp.exp(prev - m), exp_trans,
                    preferred_element_type=jnp.float32,
                    precision=lax.Precision.HIGHEST)               # (Bb, Tp)
        lse = m + max_trans + jnp.log(s) + em_ref[i]
        new = jnp.where(mask_ref[i] > 0.0, lse, prev)
        out_ref[i] = new
        return new

    alpha_last = lax.fori_loop(1, S, fwd_body, alpha0, unroll=unroll)

    # -------- partition function from the live carry (no VMEM re-read) -------
    la = alpha_last + end                                          # (Bb, Tp)
    mz = jnp.max(la, axis=-1, keepdims=True)
    z = mz + jnp.log(jnp.sum(jnp.exp(la - mz), axis=-1, keepdims=True))  # (Bb, 1)

    # --------- backward recurrence, fused with the marginal epilogue ---------
    out_ref[S - 1] = jnp.exp(la - z)             # alpha[S-1] + beta[S-1] == la
    beta_init = jnp.broadcast_to(end, (Bb, Tp))  # hoisted once

    def bwd_body(k, nxt):
        i = S - 1 - k                            # i = S-1 ... 1
        u = nxt + em_ref[i]
        m = jnp.max(u, axis=-1, keepdims=True)
        s = jnp.dot(jnp.exp(u - m), exp_trans_t,
                    preferred_element_type=jnp.float32,
                    precision=lax.Precision.HIGHEST)
        lse = m + max_trans + jnp.log(s)
        new = jnp.where(mask_ref[i] > 0.0, lse, nxt)
        # out_ref[i-1] still holds alpha[i-1]; convert to the marginal in place.
        out_ref[i - 1] = jnp.exp(out_ref[i - 1] + new - z)
        return new

    lax.fori_loop(0, S - 1, bwd_body, beta_init, unroll=unroll)


def crf_marginal_probabilities(emissions, mask, start_transitions,
                               end_transitions, transitions, *, batch_block=8):
    """emissions: (B, S, T), mask: (B, S) uint8/float.
    Returns marginals of shape (S, B, T) float32 (same as PyTorch)."""
    B, S, T = emissions.shape
    Tp = pl.cdiv(T, 128) * 128                   # lane-dense tag dimension
    if B <= batch_block:
        Bb, B_pad = B, B                         # block == full dim is legal
    else:
        Bb = max(8, (batch_block // 8) * 8)      # sublane-aligned batch tile
        B_pad = pl.cdiv(B, Bb) * Bb

    # Time-major, tag/batch padded layouts.
    em = jnp.transpose(emissions.astype(jnp.float32), (1, 0, 2))   # (S, B, T)
    em = jnp.pad(em, ((0, 0), (0, B_pad - B), (0, Tp - T)), constant_values=NEG)
    mk = jnp.transpose(mask.astype(jnp.float32))                   # (S, B)
    mk = jnp.pad(mk, ((0, 0), (0, B_pad - B)))[:, :, None]          # (S, B_pad, 1)

    start = jnp.full((1, Tp), NEG, jnp.float32).at[0, :T].set(
        start_transitions.astype(jnp.float32))
    end = jnp.full((1, Tp), NEG, jnp.float32).at[0, :T].set(
        end_transitions.astype(jnp.float32))
    trans = jnp.full((Tp, Tp), NEG, jnp.float32).at[:T, :T].set(
        transitions.astype(jnp.float32))
    trans_t = trans.T

    # Generous-but-bounded VMEM budget: 2x double-buffered em + out tiles,
    # mask tile, transition params, plus slack.
    tile_bytes = 4 * S * Bb * Tp
    vmem_bytes = 4 * tile_bytes + 4 * S * Bb * 4 + 3 * Tp * Tp * 4 + (2 << 20)
    compiler_params = pltpu.CompilerParams(
        dimension_semantics=("parallel",),
        vmem_limit_bytes=int(min(100 * 2**20, max(vmem_bytes, 16 * 2**20))),
    )

    out = pl.pallas_call(
        _crf_marginals_kernel,
        out_shape=jax.ShapeDtypeStruct((S, B_pad, Tp), jnp.float32),
        grid=(B_pad // Bb,),
        in_specs=[
            pl.BlockSpec((S, Bb, Tp), lambda b: (0, b, 0)),   # emissions
            pl.BlockSpec((S, Bb, 1), lambda b: (0, b, 0)),    # mask
            pl.BlockSpec((1, Tp), lambda b: (0, 0)),          # start_transitions
            pl.BlockSpec((1, Tp), lambda b: (0, 0)),          # end_transitions
            pl.BlockSpec((Tp, Tp), lambda b: (0, 0)),         # transitions
            pl.BlockSpec((Tp, Tp), lambda b: (0, 0)),         # transitions.T
        ],
        out_specs=pl.BlockSpec((S, Bb, Tp), lambda b: (0, b, 0)),
        compiler_params=compiler_params,
    )(em, mk, start, end, trans, trans_t)
    return out[:, :B, :T]


def _reference_marginals(emissions, mask, start, end, trans):
    """Pure-JAX port of BaseCRF.marginal_probabilities for verification."""
    B, S, T = emissions.shape
    em = jnp.transpose(emissions, (1, 0, 2))
    mk = jnp.transpose(mask.astype(jnp.float32))
    alpha = [em[0] + start[None, :]]
    for i in range(1, S):
        inner = alpha[-1][:, :, None] + trans[None] + em[i][:, None, :]
        lse = jax.nn.logsumexp(inner, axis=1)
        alpha.append(lse * mk[i][:, None] + alpha[-1] * (1 - mk[i])[:, None])
    beta = [jnp.broadcast_to(end[None, :], (B, T))]
    for i in range(S - 1, 0, -1):
        inner = beta[-1][:, :, None] + trans.T[None] + em[i][:, :, None]
        lse = jax.nn.logsumexp(inner, axis=1)
        beta.append(lse * mk[i][:, None] + beta[-1] * (1 - mk[i])[:, None])
    beta = beta[::-1]
    alpha = jnp.stack(alpha)
    beta = jnp.stack(beta)
    z = jax.nn.logsumexp(alpha[-1] + end[None, :], axis=1)
    return jnp.exp(alpha + beta - z[None, :, None])


if __name__ == "__main__":
    # TODO(synk): BaseCRF.forward is abstract and viterbi_decode requires
    # host-side Python backtracking; only marginal_probabilities is kernelized.
    B, S, T = 2, 8, 8
    key = jax.random.PRNGKey(0)
    k_em, k_start, k_end, k_trans = jax.random.split(key, 4)

    # Deterministic parameter init matching BaseCRF.__init__ distributions.
    start_transitions = jax.random.uniform(k_start, (T,), jnp.float32, -1.0, 1.0)
    end_transitions = jax.random.uniform(k_end, (T,), jnp.float32, -1.0, 1.0)
    xavier_bound = (6.0 / (T + T)) ** 0.5
    transitions = jax.random.uniform(k_trans, (T, T), jnp.float32,
                                     -xavier_bound, xavier_bound)

    emissions = jax.random.normal(k_em, (B, S, T), jnp.float32)
    lengths = jnp.array([S, 5], dtype=jnp.int32)
    mask = (jnp.arange(S)[None, :] < lengths[:, None]).astype(jnp.uint8)  # (B, S)

    out = crf_marginal_probabilities(emissions, mask, start_transitions,
                                     end_transitions, transitions)
    out = jax.block_until_ready(out)

    ref = _reference_marginals(emissions, mask, start_transitions,
                               end_transitions, transitions)
    assert out.shape == (S, B, T)
    assert jnp.allclose(out, ref, atol=1e-4, rtol=1e-4), "mismatch vs reference"

    print("KERNEL_OK")
</pallas_src>

<mosaic_0001>
module attributes {stable_mosaic.version = 11 : i64} {
  func.func @_crf_marginals_kernel(%arg0: i32, %arg1: memref<8x2x128xf32, #tpu.memory_space<vmem>>, %arg2: memref<8x2x1xf32, #tpu.memory_space<vmem>>, %arg3: memref<1x128xf32, #tpu.memory_space<vmem>>, %arg4: memref<1x128xf32, #tpu.memory_space<vmem>>, %arg5: memref<128x128xf32, #tpu.memory_space<vmem>>, %arg6: memref<128x128xf32, #tpu.memory_space<vmem>>, %arg7: memref<8x2x128xf32, #tpu.memory_space<vmem>>) attributes {dimension_semantics = [#tpu.dimension_semantics<parallel>], iteration_bounds = array<i64: 1>, scalar_prefetch = 0 : i64, scratch_operands = 0 : i64, tpu.core_type = #tpu.core_type<tc>, window_params = [{transform_indices = @transform_0, window_bounds = array<i64: 8, 2, 128>}, {transform_indices = @transform_1, window_bounds = array<i64: 8, 2, 1>}, {pipeline_mode = #tpu.pipeline_mode<synchronous>, transform_indices = @transform_2, window_bounds = array<i64: 1, 128>}, {pipeline_mode = #tpu.pipeline_mode<synchronous>, transform_indices = @transform_3, window_bounds = array<i64: 1, 128>}, {pipeline_mode = #tpu.pipeline_mode<synchronous>, transform_indices = @transform_4, window_bounds = array<i64: 128, 128>}, {pipeline_mode = #tpu.pipeline_mode<synchronous>, transform_indices = @transform_5, window_bounds = array<i64: 128, 128>}, {transform_indices = @transform_6, window_bounds = array<i64: 8, 2, 128>}]} {
    %c0 = arith.constant 0 : index
    %c0_0 = arith.constant 0 : index
    %0 = vector.load %arg3[%c0, %c0_0] : memref<1x128xf32, #tpu.memory_space<vmem>>, vector<1x128xf32>
    %c0_1 = arith.constant 0 : index
    %c0_2 = arith.constant 0 : index
    %1 = vector.load %arg4[%c0_1, %c0_2] : memref<1x128xf32, #tpu.memory_space<vmem>>, vector<1x128xf32>
    %c0_3 = arith.constant 0 : index
    %c0_4 = arith.constant 0 : index
    %2 = vector.load %arg5[%c0_3, %c0_4] : memref<128x128xf32, #tpu.memory_space<vmem>>, vector<128x128xf32>
    %c0_5 = arith.constant 0 : index
    %c0_6 = arith.constant 0 : index
    %3 = vector.load %arg6[%c0_5, %c0_6] : memref<128x128xf32, #tpu.memory_space<vmem>>, vector<128x128xf32>
    %4 = vector.shape_cast %2 : vector<128x128xf32> to vector<1x128x128xf32>
    %cst = arith.constant dense<0xFF800000> : vector<1xf32>
    %5 = vector.multi_reduction <maximumf>, %4, %cst [1, 2] : vector<1x128x128xf32> to vector<1xf32>
    %6 = vector.shape_cast %5 : vector<1xf32> to vector<1x1x1xf32>
    %7 = vector.extract %6[0, 0, 0] : f32 from vector<1x1x1xf32>
    %8 = vector.broadcast %7 : f32 to vector<128x128xf32>
    %9 = arith.subf %2, %8 : vector<128x128xf32>
    %10 = math.exp %9 : vector<128x128xf32>
    %11 = vector.broadcast %7 : f32 to vector<128x128xf32>
    %12 = arith.subf %3, %11 : vector<128x128xf32>
    %13 = math.exp %12 : vector<128x128xf32>
    %c0_7 = arith.constant 0 : index
    %c0_8 = arith.constant 0 : index
    %c0_9 = arith.constant 0 : index
    %14 = vector.load %arg1[%c0_7, %c0_8, %c0_9] : memref<8x2x128xf32, #tpu.memory_space<vmem>>, vector<1x2x128xf32>
    %15 = vector.shape_cast %14 : vector<1x2x128xf32> to vector<2x128xf32>
    %16 = vector.broadcast %0 : vector<1x128xf32> to vector<2x128xf32>
    %17 = arith.addf %15, %16 : vector<2x128xf32>
    %c0_10 = arith.constant 0 : index
    %c0_11 = arith.constant 0 : index
    %c0_12 = arith.constant 0 : index
    %18 = vector.load %arg7[%c0_10, %c0_11, %c0_12] : memref<8x2x128xf32, #tpu.memory_space<vmem>>, vector<1x2x128xf32>
    %19 = vector.shape_cast %18 : vector<1x2x128xf32> to vector<2x128xf32>
    %20 = vector.shape_cast %17 : vector<2x128xf32> to vector<1x2x128xf32>
    tpu.vector_store %arg7[%c0_10, %c0_11, %c0_12], %20 {strides = array<i32>} : memref<8x2x128xf32, #tpu.memory_space<vmem>>, vector<1x2x128xf32>,
    %c1_i32 = arith.constant 1 : i32
    %cst_13 = arith.constant dense<0xFF800000> : vector<2xf32>
    %21 = vector.multi_reduction <maximumf>, %17, %cst_13 [1] : vector<2x128xf32> to vector<2xf32>
    %22 = vector.shape_cast %21 : vector<2xf32> to vector<2x1xf32>
    %23 = vector.broadcast %22 : vector<2x1xf32> to vector<2x128xf32>
    %24 = arith.subf %17, %23 : vector<2x128xf32>
    %25 = math.exp %24 : vector<2x128xf32>
    %cst_14 = arith.constant dense<0.000000e+00> : vector<2x128xf32>
    %26 = tpu.matmul %25, %10, %cst_14 {dimension_numbers = #tpu.dot_dimension_numbers<[1], [0], [0], [1], [0, 0, 1, 1], [], []>, precision = #tpu.contract_precision<fp32>} : vector<2x128xf32>, vector<128x128xf32>, vector<2x128xf32> -> vector<2x128xf32>
    %27 = vector.broadcast %7 : f32 to vector<2x1xf32>
    %28 = arith.addf %22, %27 : vector<2x1xf32>
    %29 = math.log %26 : vector<2x128xf32>
    %30 = vector.broadcast %28 : vector<2x1xf32> to vector<2x128xf32>
    %31 = arith.addf %30, %29 : vector<2x128xf32>
    %32 = arith.index_cast %c1_i32 : i32 to index
    %c0_15 = arith.constant 0 : index
    %c0_16 = arith.constant 0 : index
    %33 = vector.load %arg1[%32, %c0_15, %c0_16] : memref<8x2x128xf32, #tpu.memory_space<vmem>>, vector<1x2x128xf32>
    %34 = vector.shape_cast %33 : vector<1x2x128xf32> to vector<2x128xf32>
    %35 = arith.addf %31, %34 : vector<2x128xf32>
    %36 = arith.index_cast %c1_i32 : i32 to index
    %c0_17 = arith.constant 0 : index
    %c0_18 = arith.constant 0 : index
    %37 = vector.load %arg2[%36, %c0_17, %c0_18] : memref<8x2x1xf32, #tpu.memory_space<vmem>>, vector<1x2x1xf32>
    %38 = vector.shape_cast %37 : vector<1x2x1xf32> to vector<2x1xf32>
    %cst_19 = arith.constant 0.000000e+00 : f32
    %39 = vector.broadcast %cst_19 : f32 to vector<2x1xf32>
    %40 = arith.cmpf ogt, %38, %39 : vector<2x1xf32>
    %41 = vector.shape_cast %40 : vector<2x1xi1> to vector<2x1xi1>
    %42 = vector.broadcast %41 : vector<2x1xi1> to vector<2x128xi1>
    %43 = arith.select %42, %35, %17 : vector<2x128xi1>, vector<2x128xf32>
    %44 = arith.index_cast %c1_i32 : i32 to index
    %c0_20 = arith.constant 0 : index
    %c0_21 = arith.constant 0 : index
    %45 = vector.load %arg7[%44, %c0_20, %c0_21] : memref<8x2x128xf32, #tpu.memory_space<vmem>>, vector<1x2x128xf32>
    %46 = vector.shape_cast %45 : vector<1x2x128xf32> to vector<2x128xf32>
    %47 = vector.shape_cast %43 : vector<2x128xf32> to vector<1x2x128xf32>
    tpu.vector_store %arg7[%44, %c0_20, %c0_21], %47 {strides = array<i32>} : memref<8x2x128xf32, #tpu.memory_space<vmem>>, vector<1x2x128xf32>,
    %c2_i32 = arith.constant 2 : i32
    %cst_22 = arith.constant dense<0xFF800000> : vector<2xf32>
    %48 = vector.multi_reduction <maximumf>, %43, %cst_22 [1] : vector<2x128xf32> to vector<2xf32>
    %49 = vector.shape_cast %48 : vector<2xf32> to vector<2x1xf32>
    %50 = vector.broadcast %49 : vector<2x1xf32> to vector<2x128xf32>
    %51 = arith.subf %43, %50 : vector<2x128xf32>
    %52 = math.exp %51 : vector<2x128xf32>
    %cst_23 = arith.constant dense<0.000000e+00> : vector<2x128xf32>
    %53 = tpu.matmul %52, %10, %cst_23 {dimension_numbers = #tpu.dot_dimension_numbers<[1], [0], [0], [1], [0, 0, 1, 1], [], []>, precision = #tpu.contract_precision<fp32>} : vector<2x128xf32>, vector<128x128xf32>, vector<2x128xf32> -> vector<2x128xf32>
    %54 = vector.broadcast %7 : f32 to vector<2x1xf32>
    %55 = arith.addf %49, %54 : vector<2x1xf32>
    %56 = math.log %53 : vector<2x128xf32>
    %57 = vector.broadcast %55 : vector<2x1xf32> to vector<2x128xf32>
    %58 = arith.addf %57, %56 : vector<2x128xf32>
    %59 = arith.index_cast %c2_i32 : i32 to index
    %c0_24 = arith.constant 0 : index
    %c0_25 = arith.constant 0 : index
    %60 = vector.load %arg1[%59, %c0_24, %c0_25] : memref<8x2x128xf32, #tpu.memory_space<vmem>>, vector<1x2x128xf32>
    %61 = vector.shape_cast %60 : vector<1x2x128xf32> to vector<2x128xf32>
    %62 = arith.addf %58, %61 : vector<2x128xf32>
    %63 = arith.index_cast %c2_i32 : i32 to index
    %c0_26 = arith.constant 0 : index
    %c0_27 = arith.constant 0 : index
    %64 = vector.load %arg2[%63, %c0_26, %c0_27] : memref<8x2x1xf32, #tpu.memory_space<vmem>>, vector<1x2x1xf32>
    %65 = vector.shape_cast %64 : vector<1x2x1xf32> to vector<2x1xf32>
    %cst_28 = arith.constant 0.000000e+00 : f32
    %66 = vector.broadcast %cst_28 : f32 to vector<2x1xf32>
    %67 = arith.cmpf ogt, %65, %66 : vector<2x1xf32>
    %68 = vector.shape_cast %67 : vector<2x1xi1> to vector<2x1xi1>
    %69 = vector.broadcast %68 : vector<2x1xi1> to vector<2x128xi1>
    %70 = arith.select %69, %62, %43 : vector<2x128xi1>, vector<2x128xf32>
    %71 = arith.index_cast %c2_i32 : i32 to index
    %c0_29 = arith.constant 0 : index
    %c0_30 = arith.constant 0 : index
    %72 = vector.load %arg7[%71, %c0_29, %c0_30] : memref<8x2x128xf32, #tpu.memory_space<vmem>>, vector<1x2x128xf32>
    %73 = vector.shape_cast %72 : vector<1x2x128xf32> to vector<2x128xf32>
    %74 = vector.shape_cast %70 : vector<2x128xf32> to vector<1x2x128xf32>
    tpu.vector_store %arg7[%71, %c0_29, %c0_30], %74 {strides = array<i32>} : memref<8x2x128xf32, #tpu.memory_space<vmem>>, vector<1x2x128xf32>,
    %c3_i32 = arith.constant 3 : i32
    %cst_31 = arith.constant dense<0xFF800000> : vector<2xf32>
    %75 = vector.multi_reduction <maximumf>, %70, %cst_31 [1] : vector<2x128xf32> to vector<2xf32>
    %76 = vector.shape_cast %75 : vector<2xf32> to vector<2x1xf32>
    %77 = vector.broadcast %76 : vector<2x1xf32> to vector<2x128xf32>
    %78 = arith.subf %70, %77 : vector<2x128xf32>
    %79 = math.exp %78 : vector<2x128xf32>
    %cst_32 = arith.constant dense<0.000000e+00> : vector<2x128xf32>
    %80 = tpu.matmul %79, %10, %cst_32 {dimension_numbers = #tpu.dot_dimension_numbers<[1], [0], [0], [1], [0, 0, 1, 1], [], []>, precision = #tpu.contract_precision<fp32>} : vector<2x128xf32>, vector<128x128xf32>, vector<2x128xf32> -> vector<2x128xf32>
    %81 = vector.broadcast %7 : f32 to vector<2x1xf32>
    %82 = arith.addf %76, %81 : vector<2x1xf32>
    %83 = math.log %80 : vector<2x128xf32>
    %84 = vector.broadcast %82 : vector<2x1xf32> to vector<2x128xf32>
    %85 = arith.addf %84, %83 : vector<2x128xf32>
    %86 = arith.index_cast %c3_i32 : i32 to index
    %c0_33 = arith.constant 0 : index
    %c0_34 = arith.constant 0 : index
    %87 = vector.load %arg1[%86, %c0_33, %c0_34] : memref<8x2x128xf32, #tpu.memory_space<vmem>>, vector<1x2x128xf32>
    %88 = vector.shape_cast %87 : vector<1x2x128xf32> to vector<2x128xf32>
    %89 = arith.addf %85, %88 : vector<2x128xf32>
    %90 = arith.index_cast %c3_i32 : i32 to index
    %c0_35 = arith.constant 0 : index
    %c0_36 = arith.constant 0 : index
    %91 = vector.load %arg2[%90, %c0_35, %c0_36] : memref<8x2x1xf32, #tpu.memory_space<vmem>>, vector<1x2x1xf32>
    %92 = vector.shape_cast %91 : vector<1x2x1xf32> to vector<2x1xf32>
    %cst_37 = arith.constant 0.000000e+00 : f32
    %93 = vector.broadcast %cst_37 : f32 to vector<2x1xf32>
    %94 = arith.cmpf ogt, %92, %93 : vector<2x1xf32>
    %95 = vector.shape_cast %94 : vector<2x1xi1> to vector<2x1xi1>
    %96 = vector.broadcast %95 : vector<2x1xi1> to vector<2x128xi1>
    %97 = arith.select %96, %89, %70 : vector<2x128xi1>, vector<2x128xf32>
    %98 = arith.index_cast %c3_i32 : i32 to index
    %c0_38 = arith.constant 0 : index
    %c0_39 = arith.constant 0 : index
    %99 = vector.load %arg7[%98, %c0_38, %c0_39] : memref<8x2x128xf32, #tpu.memory_space<vmem>>, vector<1x2x128xf32>
    %100 = vector.shape_cast %99 : vector<1x2x128xf32> to vector<2x128xf32>
    %101 = vector.shape_cast %97 : vector<2x128xf32> to vector<1x2x128xf32>
    tpu.vector_store %arg7[%98, %c0_38, %c0_39], %101 {strides = array<i32>} : memref<8x2x128xf32, #tpu.memory_space<vmem>>, vector<1x2x128xf32>,
    %c4_i32 = arith.constant 4 : i32
    %cst_40 = arith.constant dense<0xFF800000> : vector<2xf32>
    %102 = vector.multi_reduction <maximumf>, %97, %cst_40 [1] : vector<2x128xf32> to vector<2xf32>
    %103 = vector.shape_cast %102 : vector<2xf32> to vector<2x1xf32>
    %104 = vector.broadcast %103 : vector<2x1xf32> to vector<2x128xf32>
    %105 = arith.subf %97, %104 : vector<2x128xf32>
    %106 = math.exp %105 : vector<2x128xf32>
    %cst_41 = arith.constant dense<0.000000e+00> : vector<2x128xf32>
    %107 = tpu.matmul %106, %10, %cst_41 {dimension_numbers = #tpu.dot_dimension_numbers<[1], [0], [0], [1], [0, 0, 1, 1], [], []>, precision = #tpu.contract_precision<fp32>} : vector<2x128xf32>, vector<128x128xf32>, vector<2x128xf32> -> vector<2x128xf32>
    %108 = vector.broadcast %7 : f32 to vector<2x1xf32>
    %109 = arith.addf %103, %108 : vector<2x1xf32>
    %110 = math.log %107 : vector<2x128xf32>
    %111 = vector.broadcast %109 : vector<2x1xf32> to vector<2x128xf32>
    %112 = arith.addf %111, %110 : vector<2x128xf32>
    %113 = arith.index_cast %c4_i32 : i32 to index
    %c0_42 = arith.constant 0 : index
    %c0_43 = arith.constant 0 : index
    %114 = vector.load %arg1[%113, %c0_42, %c0_43] : memref<8x2x128xf32, #tpu.memory_space<vmem>>, vector<1x2x128xf32>
    %115 = vector.shape_cast %114 : vector<1x2x128xf32> to vector<2x128xf32>
    %116 = arith.addf %112, %115 : vector<2x128xf32>
    %117 = arith.index_cast %c4_i32 : i32 to index
    %c0_44 = arith.constant 0 : index
    %c0_45 = arith.constant 0 : index
    %118 = vector.load %arg2[%117, %c0_44, %c0_45] : memref<8x2x1xf32, #tpu.memory_space<vmem>>, vector<1x2x1xf32>
    %119 = vector.shape_cast %118 : vector<1x2x1xf32> to vector<2x1xf32>
    %cst_46 = arith.constant 0.000000e+00 : f32
    %120 = vector.broadcast %cst_46 : f32 to vector<2x1xf32>
    %121 = arith.cmpf ogt, %119, %120 : vector<2x1xf32>
    %122 = vector.shape_cast %121 : vector<2x1xi1> to vector<2x1xi1>
    %123 = vector.broadcast %122 : vector<2x1xi1> to vector<2x128xi1>
    %124 = arith.select %123, %116, %97 : vector<2x128xi1>, vector<2x128xf32>
    %125 = arith.index_cast %c4_i32 : i32 to index
    %c0_47 = arith.constant 0 : index
    %c0_48 = arith.constant 0 : index
    %126 = vector.load %arg7[%125, %c0_47, %c0_48] : memref<8x2x128xf32, #tpu.memory_space<vmem>>, vector<1x2x128xf32>
    %127 = vector.shape_cast %126 : vector<1x2x128xf32> to vector<2x128xf32>
    %128 = vector.shape_cast %124 : vector<2x128xf32> to vector<1x2x128xf32>
    tpu.vector_store %arg7[%125, %c0_47, %c0_48], %128 {strides = array<i32>} : memref<8x2x128xf32, #tpu.memory_space<vmem>>, vector<1x2x128xf32>,
    %c5_i32 = arith.constant 5 : i32
    %cst_49 = arith.constant dense<0xFF800000> : vector<2xf32>
    %129 = vector.multi_reduction <maximumf>, %124, %cst_49 [1] : vector<2x128xf32> to vector<2xf32>
    %130 = vector.shape_cast %129 : vector<2xf32> to vector<2x1xf32>
    %131 = vector.broadcast %130 : vector<2x1xf32> to vector<2x128xf32>
    %132 = arith.subf %124, %131 : vector<2x128xf32>
    %133 = math.exp %132 : vector<2x128xf32>
    %cst_50 = arith.constant dense<0.000000e+00> : vector<2x128xf32>
    %134 = tpu.matmul %133, %10, %cst_50 {dimension_numbers = #tpu.dot_dimension_numbers<[1], [0], [0], [1], [0, 0, 1, 1], [], []>, precision = #tpu.contract_precision<fp32>} : vector<2x128xf32>, vector<128x128xf32>, vector<2x128xf32> -> vector<2x128xf32>
    %135 = vector.broadcast %7 : f32 to vector<2x1xf32>
    %136 = arith.addf %130, %135 : vector<2x1xf32>
    %137 = math.log %134 : vector<2x128xf32>
    %138 = vector.broadcast %136 : vector<2x1xf32> to vector<2x128xf32>
    %139 = arith.addf %138, %137 : vector<2x128xf32>
    %140 = arith.index_cast %c5_i32 : i32 to index
    %c0_51 = arith.constant 0 : index
    %c0_52 = arith.constant 0 : index
    %141 = vector.load %arg1[%140, %c0_51, %c0_52] : memref<8x2x128xf32, #tpu.memory_space<vmem>>, vector<1x2x128xf32>
    %142 = vector.shape_cast %141 : vector<1x2x128xf32> to vector<2x128xf32>
    %143 = arith.addf %139, %142 : vector<2x128xf32>
    %144 = arith.index_cast %c5_i32 : i32 to index
    %c0_53 = arith.constant 0 : index
    %c0_54 = arith.constant 0 : index
    %145 = vector.load %arg2[%144, %c0_53, %c0_54] : memref<8x2x1xf32, #tpu.memory_space<vmem>>, vector<1x2x1xf32>
    %146 = vector.shape_cast %145 : vector<1x2x1xf32> to vector<2x1xf32>
    %cst_55 = arith.constant 0.000000e+00 : f32
    %147 = vector.broadcast %cst_55 : f32 to vector<2x1xf32>
    %148 = arith.cmpf ogt, %146, %147 : vector<2x1xf32>
    %149 = vector.shape_cast %148 : vector<2x1xi1> to vector<2x1xi1>
    %150 = vector.broadcast %149 : vector<2x1xi1> to vector<2x128xi1>
    %151 = arith.select %150, %143, %124 : vector<2x128xi1>, vector<2x128xf32>
    %152 = arith.index_cast %c5_i32 : i32 to index
    %c0_56 = arith.constant 0 : index
    %c0_57 = arith.constant 0 : index
    %153 = vector.load %arg7[%152, %c0_56, %c0_57] : memref<8x2x128xf32, #tpu.memory_space<vmem>>, vector<1x2x128xf32>
    %154 = vector.shape_cast %153 : vector<1x2x128xf32> to vector<2x128xf32>
    %155 = vector.shape_cast %151 : vector<2x128xf32> to vector<1x2x128xf32>
    tpu.vector_store %arg7[%152, %c0_56, %c0_57], %155 {strides = array<i32>} : memref<8x2x128xf32, #tpu.memory_space<vmem>>, vector<1x2x128xf32>,
    %c6_i32 = arith.constant 6 : i32
    %cst_58 = arith.constant dense<0xFF800000> : vector<2xf32>
    %156 = vector.multi_reduction <maximumf>, %151, %cst_58 [1] : vector<2x128xf32> to vector<2xf32>
    %157 = vector.shape_cast %156 : vector<2xf32> to vector<2x1xf32>
    %158 = vector.broadcast %157 : vector<2x1xf32> to vector<2x128xf32>
    %159 = arith.subf %151, %158 : vector<2x128xf32>
    %160 = math.exp %159 : vector<2x128xf32>
    %cst_59 = arith.constant dense<0.000000e+00> : vector<2x128xf32>
    %161 = tpu.matmul %160, %10, %cst_59 {dimension_numbers = #tpu.dot_dimension_numbers<[1], [0], [0], [1], [0, 0, 1, 1], [], []>, precision = #tpu.contract_precision<fp32>} : vector<2x128xf32>, vector<128x128xf32>, vector<2x128xf32> -> vector<2x128xf32>
    %162 = vector.broadcast %7 : f32 to vector<2x1xf32>
    %163 = arith.addf %157, %162 : vector<2x1xf32>
    %164 = math.log %161 : vector<2x128xf32>
    %165 = vector.broadcast %163 : vector<2x1xf32> to vector<2x128xf32>
    %166 = arith.addf %165, %164 : vector<2x128xf32>
    %167 = arith.index_cast %c6_i32 : i32 to index
    %c0_60 = arith.constant 0 : index
    %c0_61 = arith.constant 0 : index
    %168 = vector.load %arg1[%167, %c0_60, %c0_61] : memref<8x2x128xf32, #tpu.memory_space<vmem>>, vector<1x2x128xf32>
    %169 = vector.shape_cast %168 : vector<1x2x128xf32> to vector<2x128xf32>
    %170 = arith.addf %166, %169 : vector<2x128xf32>
    %171 = arith.index_cast %c6_i32 : i32 to index
    %c0_62 = arith.constant 0 : index
    %c0_63 = arith.constant 0 : index
    %172 = vector.load %arg2[%171, %c0_62, %c0_63] : memref<8x2x1xf32, #tpu.memory_space<vmem>>, vector<1x2x1xf32>
    %173 = vector.shape_cast %172 : vector<1x2x1xf32> to vector<2x1xf32>
    %cst_64 = arith.constant 0.000000e+00 : f32
    %174 = vector.broadcast %cst_64 : f32 to vector<2x1xf32>
    %175 = arith.cmpf ogt, %173, %174 : vector<2x1xf32>
    %176 = vector.shape_cast %175 : vector<2x1xi1> to vector<2x1xi1>
    %177 = vector.broadcast %176 : vector<2x1xi1> to vector<2x128xi1>
    %178 = arith.select %177, %170, %151 : vector<2x128xi1>, vector<2x128xf32>
    %179 = arith.index_cast %c6_i32 : i32 to index
    %c0_65 = arith.constant 0 : index
    %c0_66 = arith.constant 0 : index
    %180 = vector.load %arg7[%179, %c0_65, %c0_66] : memref<8x2x128xf32, #tpu.memory_space<vmem>>, vector<1x2x128xf32>
    %181 = vector.shape_cast %180 : vector<1x2x128xf32> to vector<2x128xf32>
    %182 = vector.shape_cast %178 : vector<2x128xf32> to vector<1x2x128xf32>
    tpu.vector_store %arg7[%179, %c0_65, %c0_66], %182 {strides = array<i32>} : memref<8x2x128xf32, #tpu.memory_space<vmem>>, vector<1x2x128xf32>,
    %c7_i32 = arith.constant 7 : i32
    %cst_67 = arith.constant dense<0xFF800000> : vector<2xf32>
    %183 = vector.multi_reduction <maximumf>, %178, %cst_67 [1] : vector<2x128xf32> to vector<2xf32>
    %184 = vector.shape_cast %183 : vector<2xf32> to vector<2x1xf32>
    %185 = vector.broadcast %184 : vector<2x1xf32> to vector<2x128xf32>
    %186 = arith.subf %178, %185 : vector<2x128xf32>
    %187 = math.exp %186 : vector<2x128xf32>
    %cst_68 = arith.constant dense<0.000000e+00> : vector<2x128xf32>
    %188 = tpu.matmul %187, %10, %cst_68 {dimension_numbers = #tpu.dot_dimension_numbers<[1], [0], [0], [1], [0, 0, 1, 1], [], []>, precision = #tpu.contract_precision<fp32>} : vector<2x128xf32>, vector<128x128xf32>, vector<2x128xf32> -> vector<2x128xf32>
    %189 = vector.broadcast %7 : f32 to vector<2x1xf32>
    %190 = arith.addf %184, %189 : vector<2x1xf32>
    %191 = math.log %188 : vector<2x128xf32>
    %192 = vector.broadcast %190 : vector<2x1xf32> to vector<2x128xf32>
    %193 = arith.addf %192, %191 : vector<2x128xf32>
    %194 = arith.index_cast %c7_i32 : i32 to index
    %c0_69 = arith.constant 0 : index
    %c0_70 = arith.constant 0 : index
    %195 = vector.load %arg1[%194, %c0_69, %c0_70] : memref<8x2x128xf32, #tpu.memory_space<vmem>>, vector<1x2x128xf32>
    %196 = vector.shape_cast %195 : vector<1x2x128xf32> to vector<2x128xf32>
    %197 = arith.addf %193, %196 : vector<2x128xf32>
    %198 = arith.index_cast %c7_i32 : i32 to index
    %c0_71 = arith.constant 0 : index
    %c0_72 = arith.constant 0 : index
    %199 = vector.load %arg2[%198, %c0_71, %c0_72] : memref<8x2x1xf32, #tpu.memory_space<vmem>>, vector<1x2x1xf32>
    %200 = vector.shape_cast %199 : vector<1x2x1xf32> to vector<2x1xf32>
    %cst_73 = arith.constant 0.000000e+00 : f32
    %201 = vector.broadcast %cst_73 : f32 to vector<2x1xf32>
    %202 = arith.cmpf ogt, %200, %201 : vector<2x1xf32>
    %203 = vector.shape_cast %202 : vector<2x1xi1> to vector<2x1xi1>
    %204 = vector.broadcast %203 : vector<2x1xi1> to vector<2x128xi1>
    %205 = arith.select %204, %197, %178 : vector<2x128xi1>, vector<2x128xf32>
    %206 = arith.index_cast %c7_i32 : i32 to index
    %c0_74 = arith.constant 0 : index
    %c0_75 = arith.constant 0 : index
    %207 = vector.load %arg7[%206, %c0_74, %c0_75] : memref<8x2x128xf32, #tpu.memory_space<vmem>>, vector<1x2x128xf32>
    %208 = vector.shape_cast %207 : vector<1x2x128xf32> to vector<2x128xf32>
    %209 = vector.shape_cast %205 : vector<2x128xf32> to vector<1x2x128xf32>
    tpu.vector_store %arg7[%206, %c0_74, %c0_75], %209 {strides = array<i32>} : memref<8x2x128xf32, #tpu.memory_space<vmem>>, vector<1x2x128xf32>,
    %c7_i32_76 = arith.constant 7 : i32
    %210 = vector.broadcast %1 : vector<1x128xf32> to vector<2x128xf32>
    %211 = arith.addf %205, %210 : vector<2x128xf32>
    %cst_77 = arith.constant dense<0xFF800000> : vector<2xf32>
    %212 = vector.multi_reduction <maximumf>, %211, %cst_77 [1] : vector<2x128xf32> to vector<2xf32>
    %213 = vector.shape_cast %212 : vector<2xf32> to vector<2x1xf32>
    %214 = vector.broadcast %213 : vector<2x1xf32> to vector<2x128xf32>
    %215 = arith.subf %211, %214 : vector<2x128xf32>
    %216 = math.exp %215 : vector<2x128xf32>
    %cst_78 = arith.constant dense<0.000000e+00> : vector<2xf32>
    %217 = vector.multi_reduction <add>, %216, %cst_78 [1] : vector<2x128xf32> to vector<2xf32>
    %218 = vector.shape_cast %217 : vector<2xf32> to vector<2x1xf32>
    %219 = math.log %218 : vector<2x1xf32>
    %220 = arith.addf %213, %219 : vector<2x1xf32>
    %221 = vector.broadcast %220 : vector<2x1xf32> to vector<2x128xf32>
    %222 = arith.subf %211, %221 : vector<2x128xf32>
    %223 = math.exp %222 : vector<2x128xf32>
    %c7 = arith.constant 7 : index
    %c0_79 = arith.constant 0 : index
    %c0_80 = arith.constant 0 : index
    %224 = vector.load %arg7[%c7, %c0_79, %c0_80] : memref<8x2x128xf32, #tpu.memory_space<vmem>>, vector<1x2x128xf32>
    %225 = vector.shape_cast %224 : vector<1x2x128xf32> to vector<2x128xf32>
    %226 = vector.shape_cast %223 : vector<2x128xf32> to vector<1x2x128xf32>
    tpu.vector_store %arg7[%c7, %c0_79, %c0_80], %226 {strides = array<i32>} : memref<8x2x128xf32, #tpu.memory_space<vmem>>, vector<1x2x128xf32>,
    %227 = vector.shape_cast %1 : vector<1x128xf32> to vector<1x128xf32>
    %228 = vector.broadcast %227 : vector<1x128xf32> to vector<2x128xf32>
    %c0_i32 = arith.constant 0 : i32
    %c7_i32_81 = arith.constant 7 : i32
    %229 = arith.subi %c7_i32_81, %c0_i32 : i32
    %230 = arith.index_cast %229 : i32 to index
    %c0_82 = arith.constant 0 : index
    %c0_83 = arith.constant 0 : index
    %231 = vector.load %arg1[%230, %c0_82, %c0_83] : memref<8x2x128xf32, #tpu.memory_space<vmem>>, vector<1x2x128xf32>
    %232 = vector.shape_cast %231 : vector<1x2x128xf32> to vector<2x128xf32>
    %233 = arith.addf %228, %232 : vector<2x128xf32>
    %cst_84 = arith.constant dense<0xFF800000> : vector<2xf32>
    %234 = vector.multi_reduction <maximumf>, %233, %cst_84 [1] : vector<2x128xf32> to vector<2xf32>
    %235 = vector.shape_cast %234 : vector<2xf32> to vector<2x1xf32>
    %236 = vector.broadcast %235 : vector<2x1xf32> to vector<2x128xf32>
    %237 = arith.subf %233, %236 : vector<2x128xf32>
    %238 = math.exp %237 : vector<2x128xf32>
    %cst_85 = arith.constant dense<0.000000e+00> : vector<2x128xf32>
    %239 = tpu.matmul %238, %13, %cst_85 {dimension_numbers = #tpu.dot_dimension_numbers<[1], [0], [0], [1], [0, 0, 1, 1], [], []>, precision = #tpu.contract_precision<fp32>} : vector<2x128xf32>, vector<128x128xf32>, vector<2x128xf32> -> vector<2x128xf32>
    %240 = vector.broadcast %7 : f32 to vector<2x1xf32>
    %241 = arith.addf %235, %240 : vector<2x1xf32>
    %242 = math.log %239 : vector<2x128xf32>
    %243 = vector.broadcast %241 : vector<2x1xf32> to vector<2x128xf32>
    %244 = arith.addf %243, %242 : vector<2x128xf32>
    %245 = arith.index_cast %229 : i32 to index
    %c0_86 = arith.constant 0 : index
    %c0_87 = arith.constant 0 : index
    %246 = vector.load %arg2[%245, %c0_86, %c0_87] : memref<8x2x1xf32, #tpu.memory_space<vmem>>, vector<1x2x1xf32>
    %247 = vector.shape_cast %246 : vector<1x2x1xf32> to vector<2x1xf32>
    %cst_88 = arith.constant 0.000000e+00 : f32
    %248 = vector.broadcast %cst_88 : f32 to vector<2x1xf32>
    %249 = arith.cmpf ogt, %247, %248 : vector<2x1xf32>
    %250 = vector.shape_cast %249 : vector<2x1xi1> to vector<2x1xi1>
    %251 = vector.broadcast %250 : vector<2x1xi1> to vector<2x128xi1>
    %252 = arith.select %251, %244, %228 : vector<2x128xi1>, vector<2x128xf32>
    %c1_i32_89 = arith.constant 1 : i32
    %253 = arith.subi %229, %c1_i32_89 : i32
    %254 = arith.index_cast %253 : i32 to index
    %c0_90 = arith.constant 0 : index
    %c0_91 = arith.constant 0 : index
    %255 = vector.load %arg7[%254, %c0_90, %c0_91] : memref<8x2x128xf32, #tpu.memory_space<vmem>>, vector<1x2x128xf32>
    %256 = vector.shape_cast %255 : vector<1x2x128xf32> to vector<2x128xf32>
    %257 = arith.addf %256, %252 : vector<2x128xf32>
    %258 = vector.broadcast %220 : vector<2x1xf32> to vector<2x128xf32>
    %259 = arith.subf %257, %258 : vector<2x128xf32>
    %260 = math.exp %259 : vector<2x128xf32>
    %c1_i32_92 = arith.constant 1 : i32
    %261 = arith.subi %229, %c1_i32_92 : i32
    %262 = arith.index_cast %261 : i32 to index
    %c0_93 = arith.constant 0 : index
    %c0_94 = arith.constant 0 : index
    %263 = vector.load %arg7[%262, %c0_93, %c0_94] : memref<8x2x128xf32, #tpu.memory_space<vmem>>, vector<1x2x128xf32>
    %264 = vector.shape_cast %263 : vector<1x2x128xf32> to vector<2x128xf32>
    %265 = vector.shape_cast %260 : vector<2x128xf32> to vector<1x2x128xf32>
    tpu.vector_store %arg7[%262, %c0_93, %c0_94], %265 {strides = array<i32>} : memref<8x2x128xf32, #tpu.memory_space<vmem>>, vector<1x2x128xf32>,
    %c1_i32_95 = arith.constant 1 : i32
    %c7_i32_96 = arith.constant 7 : i32
    %266 = arith.subi %c7_i32_96, %c1_i32_95 : i32
    %267 = arith.index_cast %266 : i32 to index
    %c0_97 = arith.constant 0 : index
    %c0_98 = arith.constant 0 : index
    %268 = vector.load %arg1[%267, %c0_97, %c0_98] : memref<8x2x128xf32, #tpu.memory_space<vmem>>, vector<1x2x128xf32>
    %269 = vector.shape_cast %268 : vector<1x2x128xf32> to vector<2x128xf32>
    %270 = arith.addf %252, %269 : vector<2x128xf32>
    %cst_99 = arith.constant dense<0xFF800000> : vector<2xf32>
    %271 = vector.multi_reduction <maximumf>, %270, %cst_99 [1] : vector<2x128xf32> to vector<2xf32>
    %272 = vector.shape_cast %271 : vector<2xf32> to vector<2x1xf32>
    %273 = vector.broadcast %272 : vector<2x1xf32> to vector<2x128xf32>
    %274 = arith.subf %270, %273 : vector<2x128xf32>
    %275 = math.exp %274 : vector<2x128xf32>
    %cst_100 = arith.constant dense<0.000000e+00> : vector<2x128xf32>
    %276 = tpu.matmul %275, %13, %cst_100 {dimension_numbers = #tpu.dot_dimension_numbers<[1], [0], [0], [1], [0, 0, 1, 1], [], []>, precision = #tpu.contract_precision<fp32>} : vector<2x128xf32>, vector<128x128xf32>, vector<2x128xf32> -> vector<2x128xf32>
    %277 = vector.broadcast %7 : f32 to vector<2x1xf32>
    %278 = arith.addf %272, %277 : vector<2x1xf32>
    %279 = math.log %276 : vector<2x128xf32>
    %280 = vector.broadcast %278 : vector<2x1xf32> to vector<2x128xf32>
    %281 = arith.addf %280, %279 : vector<2x128xf32>
    %282 = arith.index_cast %266 : i32 to index
    %c0_101 = arith.constant 0 : index
    %c0_102 = arith.constant 0 : index
    %283 = vector.load %arg2[%282, %c0_101, %c0_102] : memref<8x2x1xf32, #tpu.memory_space<vmem>>, vector<1x2x1xf32>
    %284 = vector.shape_cast %283 : vector<1x2x1xf32> to vector<2x1xf32>
    %cst_103 = arith.constant 0.000000e+00 : f32
    %285 = vector.broadcast %cst_103 : f32 to vector<2x1xf32>
    %286 = arith.cmpf ogt, %284, %285 : vector<2x1xf32>
    %287 = vector.shape_cast %286 : vector<2x1xi1> to vector<2x1xi1>
    %288 = vector.broadcast %287 : vector<2x1xi1> to vector<2x128xi1>
    %289 = arith.select %288, %281, %252 : vector<2x128xi1>, vector<2x128xf32>
    %c1_i32_104 = arith.constant 1 : i32
    %290 = arith.subi %266, %c1_i32_104 : i32
    %291 = arith.index_cast %290 : i32 to index
    %c0_105 = arith.constant 0 : index
    %c0_106 = arith.constant 0 : index
    %292 = vector.load %arg7[%291, %c0_105, %c0_106] : memref<8x2x128xf32, #tpu.memory_space<vmem>>, vector<1x2x128xf32>
    %293 = vector.shape_cast %292 : vector<1x2x128xf32> to vector<2x128xf32>
    %294 = arith.addf %293, %289 : vector<2x128xf32>
    %295 = vector.broadcast %220 : vector<2x1xf32> to vector<2x128xf32>
    %296 = arith.subf %294, %295 : vector<2x128xf32>
    %297 = math.exp %296 : vector<2x128xf32>
    %c1_i32_107 = arith.constant 1 : i32
    %298 = arith.subi %266, %c1_i32_107 : i32
    %299 = arith.index_cast %298 : i32 to index
    %c0_108 = arith.constant 0 : index
    %c0_109 = arith.constant 0 : index
    %300 = vector.load %arg7[%299, %c0_108, %c0_109] : memref<8x2x128xf32, #tpu.memory_space<vmem>>, vector<1x2x128xf32>
    %301 = vector.shape_cast %300 : vector<1x2x128xf32> to vector<2x128xf32>
    %302 = vector.shape_cast %297 : vector<2x128xf32> to vector<1x2x128xf32>
    tpu.vector_store %arg7[%299, %c0_108, %c0_109], %302 {strides = array<i32>} : memref<8x2x128xf32, #tpu.memory_space<vmem>>, vector<1x2x128xf32>,
    %c2_i32_110 = arith.constant 2 : i32
    %c7_i32_111 = arith.constant 7 : i32
    %303 = arith.subi %c7_i32_111, %c2_i32_110 : i32
    %304 = arith.index_cast %303 : i32 to index
    %c0_112 = arith.constant 0 : index
    %c0_113 = arith.constant 0 : index
    %305 = vector.load %arg1[%304, %c0_112, %c0_113] : memref<8x2x128xf32, #tpu.memory_space<vmem>>, vector<1x2x128xf32>
    %306 = vector.shape_cast %305 : vector<1x2x128xf32> to vector<2x128xf32>
    %307 = arith.addf %289, %306 : vector<2x128xf32>
    %cst_114 = arith.constant dense<0xFF800000> : vector<2xf32>
    %308 = vector.multi_reduction <maximumf>, %307, %cst_114 [1] : vector<2x128xf32> to vector<2xf32>
    %309 = vector.shape_cast %308 : vector<2xf32> to vector<2x1xf32>
    %310 = vector.broadcast %309 : vector<2x1xf32> to vector<2x128xf32>
    %311 = arith.subf %307, %310 : vector<2x128xf32>
    %312 = math.exp %311 : vector<2x128xf32>
    %cst_115 = arith.constant dense<0.000000e+00> : vector<2x128xf32>
    %313 = tpu.matmul %312, %13, %cst_115 {dimension_numbers = #tpu.dot_dimension_numbers<[1], [0], [0], [1], [0, 0, 1, 1], [], []>, precision = #tpu.contract_precision<fp32>} : vector<2x128xf32>, vector<128x128xf32>, vector<2x128xf32> -> vector<2x128xf32>
    %314 = vector.broadcast %7 : f32 to vector<2x1xf32>
    %315 = arith.addf %309, %314 : vector<2x1xf32>
    %316 = math.log %313 : vector<2x128xf32>
    %317 = vector.broadcast %315 : vector<2x1xf32> to vector<2x128xf32>
    %318 = arith.addf %317, %316 : vector<2x128xf32>
    %319 = arith.index_cast %303 : i32 to index
    %c0_116 = arith.constant 0 : index
    %c0_117 = arith.constant 0 : index
    %320 = vector.load %arg2[%319, %c0_116, %c0_117] : memref<8x2x1xf32, #tpu.memory_space<vmem>>, vector<1x2x1xf32>
    %321 = vector.shape_cast %320 : vector<1x2x1xf32> to vector<2x1xf32>
    %cst_118 = arith.constant 0.000000e+00 : f32
    %322 = vector.broadcast %cst_118 : f32 to vector<2x1xf32>
    %323 = arith.cmpf ogt, %321, %322 : vector<2x1xf32>
    %324 = vector.shape_cast %323 : vector<2x1xi1> to vector<2x1xi1>
    %325 = vector.broadcast %324 : vector<2x1xi1> to vector<2x128xi1>
    %326 = arith.select %325, %318, %289 : vector<2x128xi1>, vector<2x128xf32>
    %c1_i32_119 = arith.constant 1 : i32
    %327 = arith.subi %303, %c1_i32_119 : i32
    %328 = arith.index_cast %327 : i32 to index
    %c0_120 = arith.constant 0 : index
    %c0_121 = arith.constant 0 : index
    %329 = vector.load %arg7[%328, %c0_120, %c0_121] : memref<8x2x128xf32, #tpu.memory_space<vmem>>, vector<1x2x128xf32>
    %330 = vector.shape_cast %329 : vector<1x2x128xf32> to vector<2x128xf32>
    %331 = arith.addf %330, %326 : vector<2x128xf32>
    %332 = vector.broadcast %220 : vector<2x1xf32> to vector<2x128xf32>
    %333 = arith.subf %331, %332 : vector<2x128xf32>
    %334 = math.exp %333 : vector<2x128xf32>
    %c1_i32_122 = arith.constant 1 : i32
    %335 = arith.subi %303, %c1_i32_122 : i32
    %336 = arith.index_cast %335 : i32 to index
    %c0_123 = arith.constant 0 : index
    %c0_124 = arith.constant 0 : index
    %337 = vector.load %arg7[%336, %c0_123, %c0_124] : memref<8x2x128xf32, #tpu.memory_space<vmem>>, vector<1x2x128xf32>
    %338 = vector.shape_cast %337 : vector<1x2x128xf32> to vector<2x128xf32>
    %339 = vector.shape_cast %334 : vector<2x128xf32> to vector<1x2x128xf32>
    tpu.vector_store %arg7[%336, %c0_123, %c0_124], %339 {strides = array<i32>} : memref<8x2x128xf32, #tpu.memory_space<vmem>>, vector<1x2x128xf32>,
    %c3_i32_125 = arith.constant 3 : i32
    %c7_i32_126 = arith.constant 7 : i32
    %340 = arith.subi %c7_i32_126, %c3_i32_125 : i32
    %341 = arith.index_cast %340 : i32 to index
    %c0_127 = arith.constant 0 : index
    %c0_128 = arith.constant 0 : index
    %342 = vector.load %arg1[%341, %c0_127, %c0_128] : memref<8x2x128xf32, #tpu.memory_space<vmem>>, vector<1x2x128xf32>
    %343 = vector.shape_cast %342 : vector<1x2x128xf32> to vector<2x128xf32>
    %344 = arith.addf %326, %343 : vector<2x128xf32>
    %cst_129 = arith.constant dense<0xFF800000> : vector<2xf32>
    %345 = vector.multi_reduction <maximumf>, %344, %cst_129 [1] : vector<2x128xf32> to vector<2xf32>
    %346 = vector.shape_cast %345 : vector<2xf32> to vector<2x1xf32>
    %347 = vector.broadcast %346 : vector<2x1xf32> to vector<2x128xf32>
    %348 = arith.subf %344, %347 : vector<2x128xf32>
    %349 = math.exp %348 : vector<2x128xf32>
    %cst_130 = arith.constant dense<0.000000e+00> : vector<2x128xf32>
    %350 = tpu.matmul %349, %13, %cst_130 {dimension_numbers = #tpu.dot_dimension_numbers<[1], [0], [0], [1], [0, 0, 1, 1], [], []>, precision = #tpu.contract_precision<fp32>} : vector<2x128xf32>, vector<128x128xf32>, vector<2x128xf32> -> vector<2x128xf32>
    %351 = vector.broadcast %7 : f32 to vector<2x1xf32>
    %352 = arith.addf %346, %351 : vector<2x1xf32>
    %353 = math.log %350 : vector<2x128xf32>
    %354 = vector.broadcast %352 : vector<2x1xf32> to vector<2x128xf32>
    %355 = arith.addf %354, %353 : vector<2x128xf32>
    %356 = arith.index_cast %340 : i32 to index
    %c0_131 = arith.constant 0 : index
    %c0_132 = arith.constant 0 : index
    %357 = vector.load %arg2[%356, %c0_131, %c0_132] : memref<8x2x1xf32, #tpu.memory_space<vmem>>, vector<1x2x1xf32>
    %358 = vector.shape_cast %357 : vector<1x2x1xf32> to vector<2x1xf32>
    %cst_133 = arith.constant 0.000000e+00 : f32
    %359 = vector.broadcast %cst_133 : f32 to vector<2x1xf32>
    %360 = arith.cmpf ogt, %358, %359 : vector<2x1xf32>
    %361 = vector.shape_cast %360 : vector<2x1xi1> to vector<2x1xi1>
    %362 = vector.broadcast %361 : vector<2x1xi1> to vector<2x128xi1>
    %363 = arith.select %362, %355, %326 : vector<2x128xi1>, vector<2x128xf32>
    %c1_i32_134 = arith.constant 1 : i32
    %364 = arith.subi %340, %c1_i32_134 : i32
    %365 = arith.index_cast %364 : i32 to index
    %c0_135 = arith.constant 0 : index
    %c0_136 = arith.constant 0 : index
    %366 = vector.load %arg7[%365, %c0_135, %c0_136] : memref<8x2x128xf32, #tpu.memory_space<vmem>>, vector<1x2x128xf32>
    %367 = vector.shape_cast %366 : vector<1x2x128xf32> to vector<2x128xf32>
    %368 = arith.addf %367, %363 : vector<2x128xf32>
    %369 = vector.broadcast %220 : vector<2x1xf32> to vector<2x128xf32>
    %370 = arith.subf %368, %369 : vector<2x128xf32>
    %371 = math.exp %370 : vector<2x128xf32>
    %c1_i32_137 = arith.constant 1 : i32
    %372 = arith.subi %340, %c1_i32_137 : i32
    %373 = arith.index_cast %372 : i32 to index
    %c0_138 = arith.constant 0 : index
    %c0_139 = arith.constant 0 : index
    %374 = vector.load %arg7[%373, %c0_138, %c0_139] : memref<8x2x128xf32, #tpu.memory_space<vmem>>, vector<1x2x128xf32>
    %375 = vector.shape_cast %374 : vector<1x2x128xf32> to vector<2x128xf32>
    %376 = vector.shape_cast %371 : vector<2x128xf32> to vector<1x2x128xf32>
    tpu.vector_store %arg7[%373, %c0_138, %c0_139], %376 {strides = array<i32>} : memref<8x2x128xf32, #tpu.memory_space<vmem>>, vector<1x2x128xf32>,
    %c4_i32_140 = arith.constant 4 : i32
    %c7_i32_141 = arith.constant 7 : i32
    %377 = arith.subi %c7_i32_141, %c4_i32_140 : i32
    %378 = arith.index_cast %377 : i32 to index
    %c0_142 = arith.constant 0 : index
    %c0_143 = arith.constant 0 : index
    %379 = vector.load %arg1[%378, %c0_142, %c0_143] : memref<8x2x128xf32, #tpu.memory_space<vmem>>, vector<1x2x128xf32>
    %380 = vector.shape_cast %379 : vector<1x2x128xf32> to vector<2x128xf32>
    %381 = arith.addf %363, %380 : vector<2x128xf32>
    %cst_144 = arith.constant dense<0xFF800000> : vector<2xf32>
    %382 = vector.multi_reduction <maximumf>, %381, %cst_144 [1] : vector<2x128xf32> to vector<2xf32>
    %383 = vector.shape_cast %382 : vector<2xf32> to vector<2x1xf32>
    %384 = vector.broadcast %383 : vector<2x1xf32> to vector<2x128xf32>
    %385 = arith.subf %381, %384 : vector<2x128xf32>
    %386 = math.exp %385 : vector<2x128xf32>
    %cst_145 = arith.constant dense<0.000000e+00> : vector<2x128xf32>
    %387 = tpu.matmul %386, %13, %cst_145 {dimension_numbers = #tpu.dot_dimension_numbers<[1], [0], [0], [1], [0, 0, 1, 1], [], []>, precision = #tpu.contract_precision<fp32>} : vector<2x128xf32>, vector<128x128xf32>, vector<2x128xf32> -> vector<2x128xf32>
    %388 = vector.broadcast %7 : f32 to vector<2x1xf32>
    %389 = arith.addf %383, %388 : vector<2x1xf32>
    %390 = math.log %387 : vector<2x128xf32>
    %391 = vector.broadcast %389 : vector<2x1xf32> to vector<2x128xf32>
    %392 = arith.addf %391, %390 : vector<2x128xf32>
    %393 = arith.index_cast %377 : i32 to index
    %c0_146 = arith.constant 0 : index
    %c0_147 = arith.constant 0 : index
    %394 = vector.load %arg2[%393, %c0_146, %c0_147] : memref<8x2x1xf32, #tpu.memory_space<vmem>>, vector<1x2x1xf32>
    %395 = vector.shape_cast %394 : vector<1x2x1xf32> to vector<2x1xf32>
    %cst_148 = arith.constant 0.000000e+00 : f32
    %396 = vector.broadcast %cst_148 : f32 to vector<2x1xf32>
    %397 = arith.cmpf ogt, %395, %396 : vector<2x1xf32>
    %398 = vector.shape_cast %397 : vector<2x1xi1> to vector<2x1xi1>
    %399 = vector.broadcast %398 : vector<2x1xi1> to vector<2x128xi1>
    %400 = arith.select %399, %392, %363 : vector<2x128xi1>, vector<2x128xf32>
    %c1_i32_149 = arith.constant 1 : i32
    %401 = arith.subi %377, %c1_i32_149 : i32
    %402 = arith.index_cast %401 : i32 to index
    %c0_150 = arith.constant 0 : index
    %c0_151 = arith.constant 0 : index
    %403 = vector.load %arg7[%402, %c0_150, %c0_151] : memref<8x2x128xf32, #tpu.memory_space<vmem>>, vector<1x2x128xf32>
    %404 = vector.shape_cast %403 : vector<1x2x128xf32> to vector<2x128xf32>
    %405 = arith.addf %404, %400 : vector<2x128xf32>
    %406 = vector.broadcast %220 : vector<2x1xf32> to vector<2x128xf32>
    %407 = arith.subf %405, %406 : vector<2x128xf32>
    %408 = math.exp %407 : vector<2x128xf32>
    %c1_i32_152 = arith.constant 1 : i32
    %409 = arith.subi %377, %c1_i32_152 : i32
    %410 = arith.index_cast %409 : i32 to index
    %c0_153 = arith.constant 0 : index
    %c0_154 = arith.constant 0 : index
    %411 = vector.load %arg7[%410, %c0_153, %c0_154] : memref<8x2x128xf32, #tpu.memory_space<vmem>>, vector<1x2x128xf32>
    %412 = vector.shape_cast %411 : vector<1x2x128xf32> to vector<2x128xf32>
    %413 = vector.shape_cast %408 : vector<2x128xf32> to vector<1x2x128xf32>
    tpu.vector_store %arg7[%410, %c0_153, %c0_154], %413 {strides = array<i32>} : memref<8x2x128xf32, #tpu.memory_space<vmem>>, vector<1x2x128xf32>,
    %c5_i32_155 = arith.constant 5 : i32
    %c7_i32_156 = arith.constant 7 : i32
    %414 = arith.subi %c7_i32_156, %c5_i32_155 : i32
    %415 = arith.index_cast %414 : i32 to index
    %c0_157 = arith.constant 0 : index
    %c0_158 = arith.constant 0 : index
    %416 = vector.load %arg1[%415, %c0_157, %c0_158] : memref<8x2x128xf32, #tpu.memory_space<vmem>>, vector<1x2x128xf32>
    %417 = vector.shape_cast %416 : vector<1x2x128xf32> to vector<2x128xf32>
    %418 = arith.addf %400, %417 : vector<2x128xf32>
    %cst_159 = arith.constant dense<0xFF800000> : vector<2xf32>
    %419 = vector.multi_reduction <maximumf>, %418, %cst_159 [1] : vector<2x128xf32> to vector<2xf32>
    %420 = vector.shape_cast %419 : vector<2xf32> to vector<2x1xf32>
    %421 = vector.broadcast %420 : vector<2x1xf32> to vector<2x128xf32>
    %422 = arith.subf %418, %421 : vector<2x128xf32>
    %423 = math.exp %422 : vector<2x128xf32>
    %cst_160 = arith.constant dense<0.000000e+00> : vector<2x128xf32>
    %424 = tpu.matmul %423, %13, %cst_160 {dimension_numbers = #tpu.dot_dimension_numbers<[1], [0], [0], [1], [0, 0, 1, 1], [], []>, precision = #tpu.contract_precision<fp32>} : vector<2x128xf32>, vector<128x128xf32>, vector<2x128xf32> -> vector<2x128xf32>
    %425 = vector.broadcast %7 : f32 to vector<2x1xf32>
    %426 = arith.addf %420, %425 : vector<2x1xf32>
    %427 = math.log %424 : vector<2x128xf32>
    %428 = vector.broadcast %426 : vector<2x1xf32> to vector<2x128xf32>
    %429 = arith.addf %428, %427 : vector<2x128xf32>
    %430 = arith.index_cast %414 : i32 to index
    %c0_161 = arith.constant 0 : index
    %c0_162 = arith.constant 0 : index
    %431 = vector.load %arg2[%430, %c0_161, %c0_162] : memref<8x2x1xf32, #tpu.memory_space<vmem>>, vector<1x2x1xf32>
    %432 = vector.shape_cast %431 : vector<1x2x1xf32> to vector<2x1xf32>
    %cst_163 = arith.constant 0.000000e+00 : f32
    %433 = vector.broadcast %cst_163 : f32 to vector<2x1xf32>
    %434 = arith.cmpf ogt, %432, %433 : vector<2x1xf32>
    %435 = vector.shape_cast %434 : vector<2x1xi1> to vector<2x1xi1>
    %436 = vector.broadcast %435 : vector<2x1xi1> to vector<2x128xi1>
    %437 = arith.select %436, %429, %400 : vector<2x128xi1>, vector<2x128xf32>
    %c1_i32_164 = arith.constant 1 : i32
    %438 = arith.subi %414, %c1_i32_164 : i32
    %439 = arith.index_cast %438 : i32 to index
    %c0_165 = arith.constant 0 : index
    %c0_166 = arith.constant 0 : index
    %440 = vector.load %arg7[%439, %c0_165, %c0_166] : memref<8x2x128xf32, #tpu.memory_space<vmem>>, vector<1x2x128xf32>
    %441 = vector.shape_cast %440 : vector<1x2x128xf32> to vector<2x128xf32>
    %442 = arith.addf %441, %437 : vector<2x128xf32>
    %443 = vector.broadcast %220 : vector<2x1xf32> to vector<2x128xf32>
    %444 = arith.subf %442, %443 : vector<2x128xf32>
    %445 = math.exp %444 : vector<2x128xf32>
    %c1_i32_167 = arith.constant 1 : i32
    %446 = arith.subi %414, %c1_i32_167 : i32
    %447 = arith.index_cast %446 : i32 to index
    %c0_168 = arith.constant 0 : index
    %c0_169 = arith.constant 0 : index
    %448 = vector.load %arg7[%447, %c0_168, %c0_169] : memref<8x2x128xf32, #tpu.memory_space<vmem>>, vector<1x2x128xf32>
    %449 = vector.shape_cast %448 : vector<1x2x128xf32> to vector<2x128xf32>
    %450 = vector.shape_cast %445 : vector<2x128xf32> to vector<1x2x128xf32>
    tpu.vector_store %arg7[%447, %c0_168, %c0_169], %450 {strides = array<i32>} : memref<8x2x128xf32, #tpu.memory_space<vmem>>, vector<1x2x128xf32>,
    %c6_i32_170 = arith.constant 6 : i32
    %c7_i32_171 = arith.constant 7 : i32
    %451 = arith.subi %c7_i32_171, %c6_i32_170 : i32
    %452 = arith.index_cast %451 : i32 to index
    %c0_172 = arith.constant 0 : index
    %c0_173 = arith.constant 0 : index
    %453 = vector.load %arg1[%452, %c0_172, %c0_173] : memref<8x2x128xf32, #tpu.memory_space<vmem>>, vector<1x2x128xf32>
    %454 = vector.shape_cast %453 : vector<1x2x128xf32> to vector<2x128xf32>
    %455 = arith.addf %437, %454 : vector<2x128xf32>
    %cst_174 = arith.constant dense<0xFF800000> : vector<2xf32>
    %456 = vector.multi_reduction <maximumf>, %455, %cst_174 [1] : vector<2x128xf32> to vector<2xf32>
    %457 = vector.shape_cast %456 : vector<2xf32> to vector<2x1xf32>
    %458 = vector.broadcast %457 : vector<2x1xf32> to vector<2x128xf32>
    %459 = arith.subf %455, %458 : vector<2x128xf32>
    %460 = math.exp %459 : vector<2x128xf32>
    %cst_175 = arith.constant dense<0.000000e+00> : vector<2x128xf32>
    %461 = tpu.matmul %460, %13, %cst_175 {dimension_numbers = #tpu.dot_dimension_numbers<[1], [0], [0], [1], [0, 0, 1, 1], [], []>, precision = #tpu.contract_precision<fp32>} : vector<2x128xf32>, vector<128x128xf32>, vector<2x128xf32> -> vector<2x128xf32>
    %462 = vector.broadcast %7 : f32 to vector<2x1xf32>
    %463 = arith.addf %457, %462 : vector<2x1xf32>
    %464 = math.log %461 : vector<2x128xf32>
    %465 = vector.broadcast %463 : vector<2x1xf32> to vector<2x128xf32>
    %466 = arith.addf %465, %464 : vector<2x128xf32>
    %467 = arith.index_cast %451 : i32 to index
    %c0_176 = arith.constant 0 : index
    %c0_177 = arith.constant 0 : index
    %468 = vector.load %arg2[%467, %c0_176, %c0_177] : memref<8x2x1xf32, #tpu.memory_space<vmem>>, vector<1x2x1xf32>
    %469 = vector.shape_cast %468 : vector<1x2x1xf32> to vector<2x1xf32>
    %cst_178 = arith.constant 0.000000e+00 : f32
    %470 = vector.broadcast %cst_178 : f32 to vector<2x1xf32>
    %471 = arith.cmpf ogt, %469, %470 : vector<2x1xf32>
    %472 = vector.shape_cast %471 : vector<2x1xi1> to vector<2x1xi1>
    %473 = vector.broadcast %472 : vector<2x1xi1> to vector<2x128xi1>
    %474 = arith.select %473, %466, %437 : vector<2x128xi1>, vector<2x128xf32>
    %c1_i32_179 = arith.constant 1 : i32
    %475 = arith.subi %451, %c1_i32_179 : i32
    %476 = arith.index_cast %475 : i32 to index
    %c0_180 = arith.constant 0 : index
    %c0_181 = arith.constant 0 : index
    %477 = vector.load %arg7[%476, %c0_180, %c0_181] : memref<8x2x128xf32, #tpu.memory_space<vmem>>, vector<1x2x128xf32>
    %478 = vector.shape_cast %477 : vector<1x2x128xf32> to vector<2x128xf32>
    %479 = arith.addf %478, %474 : vector<2x128xf32>
    %480 = vector.broadcast %220 : vector<2x1xf32> to vector<2x128xf32>
    %481 = arith.subf %479, %480 : vector<2x128xf32>
    %482 = math.exp %481 : vector<2x128xf32>
    %c1_i32_182 = arith.constant 1 : i32
    %483 = arith.subi %451, %c1_i32_182 : i32
    %484 = arith.index_cast %483 : i32 to index
    %c0_183 = arith.constant 0 : index
    %c0_184 = arith.constant 0 : index
    %485 = vector.load %arg7[%484, %c0_183, %c0_184] : memref<8x2x128xf32, #tpu.memory_space<vmem>>, vector<1x2x128xf32>
    %486 = vector.shape_cast %485 : vector<1x2x128xf32> to vector<2x128xf32>
    %487 = vector.shape_cast %482 : vector<2x128xf32> to vector<1x2x128xf32>
    tpu.vector_store %arg7[%484, %c0_183, %c0_184], %487 {strides = array<i32>} : memref<8x2x128xf32, #tpu.memory_space<vmem>>, vector<1x2x128xf32>,
    %c7_i32_185 = arith.constant 7 : i32
    return
  }
  func.func @transform_0(%arg0: i32) -> (i32, i32, i32) {
    %c0_i32 = arith.constant 0 : i32
    %c0_i32_0 = arith.constant 0 : i32
    %c0_i32_1 = arith.constant 0 : i32
    return %c0_i32, %arg0, %c0_i32_0 : i32, i32, i32
  }
  func.func @transform_1(%arg0: i32) -> (i32, i32, i32) {
    %c0_i32 = arith.constant 0 : i32
    %c0_i32_0 = arith.constant 0 : i32
    %c0_i32_1 = arith.constant 0 : i32
    return %c0_i32, %arg0, %c0_i32_0 : i32, i32, i32
  }
  func.func @transform_2(%arg0: i32) -> (i32, i32) {
    %c0_i32 = arith.constant 0 : i32
    %c0_i32_0 = arith.constant 0 : i32
    %c0_i32_1 = arith.constant 0 : i32
    return %c0_i32, %c0_i32_0 : i32, i32
  }
  func.func @transform_3(%arg0: i32) -> (i32, i32) {
    %c0_i32 = arith.constant 0 : i32
    %c0_i32_0 = arith.constant 0 : i32
    %c0_i32_1 = arith.constant 0 : i32
    return %c0_i32, %c0_i32_0 : i32, i32
  }
  func.func @transform_4(%arg0: i32) -> (i32, i32) {
    %c0_i32 = arith.constant 0 : i32
    %c0_i32_0 = arith.constant 0 : i32
    %c0_i32_1 = arith.constant 0 : i32
    return %c0_i32, %c0_i32_0 : i32, i32
  }
  func.func @transform_5(%arg0: i32) -> (i32, i32) {
    %c0_i32 = arith.constant 0 : i32
    %c0_i32_0 = arith.constant 0 : i32
    %c0_i32_1 = arith.constant 0 : i32
    return %c0_i32, %c0_i32_0 : i32, i32
  }
  func.func @transform_6(%arg0: i32) -> (i32, i32, i32) {
    %c0_i32 = arith.constant 0 : i32
    %c0_i32_0 = arith.constant 0 : i32
    %c0_i32_1 = arith.constant 0 : i32
    return %c0_i32, %arg0, %c0_i32_0 : i32, i32, i32
  }
}

</mosaic_0001>

<bundles_post_ra>
// kernel: tpu_custom_call.1
= control target key start
LH: loop header
LB: loop body
LE: loop exit
PB: predicated region body
PF: predicated region fallthrough
CT: control target
= control target key end

     0   :  { %11 = vsyncpa [#allocation3], 0  ;;  %s7796_s0 = inlined_call_operand.vmem [shape: f32[8,2,128], index: 0, kind: input, shape index: {}]   ;;  %s7797_s1 = inlined_call_operand.vmem [shape: f32[8,2,1], index: 1, kind: input, shape index: {}]   ;;  %s7798_s2 = inlined_call_operand.vmem [shape: f32[1,128], index: 2, kind: input, shape index: {}]   ;;  %s7799_s3 = inlined_call_operand.vmem [shape: f32[1,128], index: 3, kind: input, shape index: {}]   ;;  %s7800_s4 = inlined_call_operand.hbm [shape: f32[128,128], index: 4, kind: input, shape index: {}]   ;;  %s7801_s5 = inlined_call_operand.hbm [shape: f32[128,128], index: 5, kind: input, shape index: {}]   ;;  %s7802_s6 = inlined_call_operand.hbm [shape: f32[8,2,128], index: 6, kind: output, shape index: {}]  }
   0x1   :  { %12 = vsyncpa [#allocation6], 0 }
   0x2   :  { %13 = vsyncpa [#allocation4], 0  ;;  %s26_s23 = sshll.u32 %s7800_s4, 4  ;;  %s5645_s24 = smov [#allocation2]   ;;  %s27_s23 = int_to_ptr.hbm [resolvable:$true] %s26_s23 }
   0x3   :  { %s28_s25 = sshll.u32 %s5645_s24, 4  ;;  %s39_s28 = sshll.u32 %s7801_s5, 4  ;;  %s29_s25 = int_to_ptr.vmem [resolvable:$true] %s28_s25  ;;  %s40_s28 = int_to_ptr.hbm [resolvable:$true] %s39_s28 }
   0x4   :  { %s5646_s29 = smov 128   ;;  %s5647_s30 = smov 8  }
   0x5   :  { %34 = dma.hbm_to_vmem [thread:$0]  %s27_s23, 2048, %s29_s25, [#allocation3], %s5646_s29, %s5646_s29, %s5647_s30  }
   0x6   :  { %s5648_s7 = smov [#allocation5]  }
   0x7   :  { %s41_s8 = sshll.u32 %s5648_s7, 4  ;;  %s42_s8 = int_to_ptr.vmem [resolvable:$true] %s41_s8 }
   0x8   :  { %47 = dma.hbm_to_vmem [thread:$0]  %s40_s28, 2048, %s42_s8, [#allocation6], %s5646_s29, %s5646_s29, %s5647_s30  }
   0x9   :  { %5639 = dma.done.wait [#allocation3], 2048  }
   0xa   :  { %5640 = vsyncadd [#allocation3], 4294965248 }
   0xb   :  { %5641 = dma.done.wait [#allocation6], 2048  }
   0xc   :  { %5642 = vsyncadd [#allocation6], 4294965248  ;;  %v5694_v0 = vld [vmem:[#allocation2] sm:$0xff]  ;;  %v5696_v1 = vld [vmem:[#allocation2 + $0x8] sm:$0xff]  ;;  %vm217_vm0 = vcmask 1041408   ;;  %s5368_s20 = sshll.u32 %s7802_s6, 4  ;;  %s5369_s20 = int_to_ptr.hbm [resolvable:$true] %s5368_s20 }
   0xd   :  { %v5698_v2 = vld [vmem:[#allocation2 + $0x10] sm:$0xff]  ;;  %v5700_v3 = vld [vmem:[#allocation2 + $0x18] sm:$0xff]  ;;  %v5702_v4 = vld [vmem:[#allocation2 + $0x20] sm:$0xff]  ;;  %s5651_s21 = smov 32   ;;  %s5652_s22 = smov 2  }
   0xe   :  { %v5704_v5 = vld [vmem:[#allocation2 + $0x28] sm:$0xff]  ;;  %v5706_v6 = vld [vmem:[#allocation2 + $0x30] sm:$0xff]  ;;  %v5708_v7 = vld [vmem:[#allocation2 + $0x38] sm:$0xff]  ;;  %v90_v9 = vmax.f32 %v5694_v0, %v5702_v4 }
   0xf   :  { %v66_v8 = vld [vmem:[#allocation2 + $0x40] sm:$0xff]  ;;  %v91_v10 = vmax.f32 %v5696_v1, %v5704_v5  ;;  %v67_v11 = vld [vmem:[#allocation2 + $0x48] sm:$0xff]  ;;  %v68_v12 = vld [vmem:[#allocation2 + $0x50] sm:$0xff]  ;;  %v92_v14 = vmax.f32 %v5698_v2, %v5706_v6  ;;  %v93_v15 = vmax.f32 %v5700_v3, %v5708_v7 }
  0x10   :  { %v69_v13 = vld [vmem:[#allocation2 + $0x58] sm:$0xff]  ;;  %v70_v16 = vld [vmem:[#allocation2 + $0x60] sm:$0xff]  ;;  %v71_v17 = vld [vmem:[#allocation2 + $0x68] sm:$0xff]  ;;  %v94_v19 = vmax.f32 %v90_v9, %v66_v8 }
  0x11   :  { %v72_v18 = vld [vmem:[#allocation2 + $0x70] sm:$0xff]  ;;  %v95_v20 = vmax.f32 %v91_v10, %v67_v11  ;;  %v73_v21 = vld [vmem:[#allocation2 + $0x78] sm:$0xff]  ;;  %v96_v22 = vmax.f32 %v92_v14, %v68_v12  ;;  %v97_v23 = vmax.f32 %v93_v15, %v69_v13  ;;  %v211_v24 = vld [vmem:[%s7796_s0] sm:$0x3] }
  0x12   :  { %v98_v25 = vmax.f32 %v94_v19, %v70_v16  ;;  %v5423_v27 = vld [vmem:[%s7798_s2] ss:$0 sm:$0xff] }
  0x13   :  { %v99_v26 = vmax.f32 %v95_v20, %v71_v17  ;;  %v100_v28 = vmax.f32 %v96_v22, %v72_v18  ;;  %v101_v29 = vmax.f32 %v97_v23, %v73_v21  ;;  %v5724_v31 = vadd.f32 %v5423_v27, %v211_v24 }
  0x15   :  { %v102_v30 = vmax.f32 %v98_v25, %v99_v26  ;;  %7929 = vst [vmem:[#allocation11_spill] sm:$0xff] %v5724_v31  ;;  %v103_v32 = vmax.f32 %v100_v28, %v101_v29  ;;  %v218_v34 = vsel %vm217_vm0, %v5724_v31, -inf }
  0x16   :  { %216 = vst [vmem:[#allocation7] sm:$0x3] %v5724_v31 }
  0x17   :  { %v104_v33 = vmax.f32 %v102_v30, %v103_v32 }
  0x19   :  { %105 = vmax.xlane.f32.xlu0 %v104_v33 }
  0x21   :  { %219 = vmax.xlane.f32.xlu0 %v218_v34 }
  0x8c   :  { %v106_v35 = vpop.xlane.xlu0 %105 }
  0x8d   :  { %v107_v36 = vrot.slane %v106_v35, 4 }
  0x8f   :  { %v108_v37 = vmax.f32 %v106_v35, %v107_v36 }
  0x91   :  { %v109_v38 = vrot.slane %v108_v37, 2 }
  0x93   :  { %v110_v39 = vmax.f32 %v108_v37, %v109_v38 }
  0x95   :  { %v111_v40 = vrot.slane %v110_v39, 1 }
  0x97   :  { %v112_v41 = vmax.f32 %v110_v39, %v111_v40 }
  0x99   :  { %5410 = vpush %v112_v41 }
  0xca   :  { %s5411_s2 = spop %5410 }
  0xcb   :  { %v5729_v42 = vstv %s5411_s2 }
  0xcc   :  { %7930 = vst [vmem:[#allocation12_spill] sm:$0xff] %v5729_v42  ;;  %v125_v43 = vsub.f32 %v68_v12, %v5729_v42  ;;  %v126_v44 = vsub.f32 %v69_v13, %v5729_v42  ;;  %v127_v45 = vsub.f32 %v70_v16, %v5729_v42  ;;  %v128_v46 = vsub.f32 %v71_v17, %v5729_v42 }
  0xcd   :  { %v129_v47 = vsub.f32 %v72_v18, %v5729_v42  ;;  %v130_v49 = vsub.f32 %v73_v21, %v5729_v42  ;;  %v124_v52 = vsub.f32 %v67_v11, %v5729_v42  ;;  %v123_v54 = vsub.f32 %v66_v8, %v5729_v42 }
  0xce   :  { %v151_v48 = vmul.f32 1.442695, %v125_v43  ;;  %v153_v50 = vmul.f32 1.442695, %v126_v44  ;;  %v155_v51 = vmul.f32 1.442695, %v127_v45  ;;  %v122_v57 = vsub.f32 %v5708_v7, %v5729_v42 }
  0xcf   :  { %v157_v53 = vmul.f32 1.442695, %v128_v46  ;;  %v159_v55 = vmul.f32 1.442695, %v129_v47  ;;  %v161_v56 = vmul.f32 1.442695, %v130_v49  ;;  %v121_v59 = vsub.f32 %v5706_v6, %v5729_v42 }
  0xd0   :  { %5425 = vpow2.f32 %v151_v48  ;;  %v149_v58 = vmul.f32 1.442695, %v124_v52  ;;  %v147_v60 = vmul.f32 1.442695, %v123_v54  ;;  %v120_v62 = vsub.f32 %v5704_v5, %v5729_v42 }
  0xd1   :  { %5427 = vpow2.f32 %v153_v50  ;;  %v145_v63 = vmul.f32 1.442695, %v122_v57  ;;  %v119_v9 = vsub.f32 %v5702_v4, %v5729_v42  ;;  %v143_v10 = vmul.f32 1.442695, %v121_v59 }
  0xd2   :  { %5429 = vpow2.f32 %v155_v51  ;;  %v141_v13 = vmul.f32 1.442695, %v120_v62  ;;  %v118_v5 = vsub.f32 %v5700_v3, %v5729_v42  ;;  %v117_v21 = vsub.f32 %v5698_v2, %v5729_v42 }
  0xd3   :  { %5431 = vpow2.f32 %v157_v53  ;;  %v139_v16 = vmul.f32 1.442695, %v119_v9  ;;  %v116_v2 = vsub.f32 %v5696_v1, %v5729_v42  ;;  %v115_v1 = vsub.f32 %v5694_v0, %v5729_v42 }
  0xd4   :  { %5433 = vpow2.f32 %v159_v55  ;;  %v137_v26 = vmul.f32 1.442695, %v118_v5  ;;  %v135_v34 = vmul.f32 1.442695, %v117_v21 }
  0xd5   :  { %5435 = vpow2.f32 %v161_v56  ;;  %v133_v40 = vmul.f32 1.442695, %v116_v2  ;;  %v131_v49 = vmul.f32 1.442695, %v115_v1 }
  0xd6   :  { %v5426_v61 = vpop.eup %5425  ;;  %5437 = vpow2.f32 %v149_v58 }
  0xd7   :  { %v5428_v8 = vpop.eup %5427  ;;  %5439 = vpow2.f32 %v147_v60  ;;  %v5768_v3 = vand.u32 4294901760, %v5426_v61 }
  0xd8   :  { %v5430_v7 = vpop.eup %5429  ;;  %5441 = vpow2.f32 %v145_v63  ;;  %v5757_v18 = vand.u32 4294901760, %v5428_v8 }
  0xd9   :  { %v5432_v11 = vpop.eup %5431  ;;  %v5749_v14 = vand.u32 4294901760, %v5430_v7  ;;  %5443 = vpow2.f32 %v143_v10  ;;  %v5801_v37 = vsub.f32 %v5426_v61, %v5768_v3 }
  0xda   :  { %v5434_v12 = vpop.eup %5433  ;;  %v5747_v6 = vand.u32 4294901760, %v5432_v11  ;;  %5445 = vpow2.f32 %v141_v13  ;;  %v5788_v32 = vsub.f32 %v5428_v8, %v5757_v18 }
  0xdb   :  { %v5436_v15 = vpop.eup %5435  ;;  %v5753_v17 = vand.u32 4294901760, %v5434_v12  ;;  %v5775_v25 = vsub.f32 %v5430_v7, %v5749_v14  ;;  %5447 = vpow2.f32 %v139_v16  ;;  %v5840_v54 = vand.u32 4294901760, %v5801_v37 }
  0xdc   :  { %v5755_v4 = vand.u32 4294901760, %v5436_v15  ;;  %v5760_v19 = vsub.f32 %v5432_v11, %v5747_v6  ;;  %v5438_v20 = vpop.eup %5437  ;;  %5449 = vpow2.f32 %v137_v26  ;;  %v5825_v47 = vand.u32 4294901760, %v5788_v32  ;;  %v5904_v26 = vpop.xlane.xlu0 %219 }
  0xdd   :  { %v5765_v22 = vsub.f32 %v5434_v12, %v5753_v17  ;;  %v5440_v23 = vpop.eup %5439  ;;  %v5782_v29 = vand.u32 4294901760, %v5438_v20  ;;  %v5804_v38 = vand.u32 4294901760, %v5775_v25  ;;  %5451 = vpow2.f32 %v135_v34  ;;  %7938 = vst [vmem:[#allocation20_spill] sm:$0xff] %v5904_v26 }
  0xde   :  { %225 = vmatpush.msra.mxu0 %v5755_v4  ;;  %v5771_v24 = vsub.f32 %v5436_v15, %v5755_v4  ;;  %421 = vmatpush.msra.mxu3 %v5755_v4  ;;  %v5442_v28 = vpop.eup %5441  ;;  %v5792_v33 = vand.u32 4294901760, %v5760_v19  ;;  %v5797_v35 = vand.u32 4294901760, %v5440_v23  ;;  %5453 = vpow2.f32 %v133_v40 }
  0xdf   :  { %v5780_v27 = vand.u32 4294901760, %v5765_v22  ;;  %v5444_v36 = vpop.eup %5443  ;;  %v5812_v41 = vand.u32 4294901760, %v5442_v28  ;;  %v5816_v44 = vsub.f32 %v5438_v20, %v5782_v29  ;;  %v286_v53 = vsub.f32 %v5775_v25, %v5804_v38 }
  0xe0   :  { %v5785_v30 = vand.u32 4294901760, %v5771_v24  ;;  %227 = vmatpush.msra.mxu0 %v5753_v17  ;;  %368 = vmatpush.msra.mxu2 %v5771_v24  ;;  %v5446_v43 = vpop.eup %5445  ;;  %v280_v46 = vsub.f32 %v5760_v19, %v5792_v33  ;;  %v5827_v50 = vand.u32 4294901760, %v5444_v36  ;;  %v5831_v51 = vsub.f32 %v5440_v23, %v5797_v35 }
  0xe1   :  { %423 = vmatpush.msra.mxu3 %v5753_v17  ;;  %v274_v0 = vsub.f32 %v5765_v22, %v5780_v27  ;;  %v5448_v48 = vpop.eup %5447  ;;  %v5842_v55 = vand.u32 4294901760, %v5446_v43  ;;  %v5847_v56 = vsub.f32 %v5442_v28, %v5812_v41  ;;  %v292_v58 = vsub.f32 %v5788_v32, %v5825_v47 }
  0xe2   :  { %229 = vmatpush.msra.mxu0 %v5747_v6  ;;  %371 = vmatpush.msra.mxu2 %v5765_v22  ;;  %v268_v39 = vsub.f32 %v5771_v24, %v5785_v30  ;;  %v5851_v57 = vand.u32 4294901760, %v280_v46  ;;  %v5856_v59 = vand.u32 4294901760, %v5816_v44  ;;  %v5450_v60 = vpop.eup %5449  ;;  %5455 = vpow2.f32 %v131_v49 }
  0xe3   :  { %425 = vmatpush.msra.mxu3 %v5747_v6  ;;  %v5835_v52 = vand.u32 4294901760, %v274_v0  ;;  %v5858_v61 = vand.u32 4294901760, %v5448_v48  ;;  %v5863_v62 = vsub.f32 %v5444_v36, %v5827_v50  ;;  %v5867_v63 = vand.u32 4294901760, %v286_v53  ;;  %v5452_v7 = vpop.eup %5451 }
  0xe4   :  { %231 = vmatpush.msra.mxu0 %v5749_v14  ;;  %374 = vmatpush.msra.mxu2 %v5760_v19  ;;  %v5820_v45 = vand.u32 4294901760, %v268_v39  ;;  %7933 = vst [vmem:[#allocation15_spill] sm:$0xff] %v5851_v57  ;;  %v298_v8 = vsub.f32 %v5801_v37, %v5840_v54  ;;  %v5872_v9 = vand.u32 4294901760, %v5831_v51  ;;  %v5877_v10 = vsub.f32 %v5446_v43, %v5842_v55  ;;  %v5454_v15 = vpop.eup %5453 }
  0xe5   :  { %427 = vmatpush.msra.mxu3 %v5749_v14  ;;  %7932 = vst [vmem:[#allocation14_spill] sm:$0xff] %v5835_v52  ;;  %v5881_v11 = vand.u32 4294901760, %v292_v58  ;;  %v304_v12 = vsub.f32 %v5816_v44, %v5856_v59  ;;  %v5886_v13 = vand.u32 4294901760, %v5847_v56  ;;  %v5888_v5 = vand.u32 4294901760, %v5450_v60 }
  0xe6   :  { %7931 = vst [vmem:[#allocation13_spill] sm:$0xff] %v5820_v45  ;;  %233 = vmatpush.msra.mxu0 %v5757_v18  ;;  %270 = vmatpush.msra.mxu1 %v5820_v45  ;;  %v5893_v16 = vsub.f32 %v5448_v48, %v5858_v61  ;;  %v5897_v20 = vand.u32 4294901760, %v298_v8  ;;  %v310_v21 = vsub.f32 %v5831_v51, %v5872_v9  ;;  %v5902_v23 = vand.u32 4294901760, %v5863_v62 }
  0xe7   :  { %377 = vmatpush.msra.mxu2 %v5775_v25  ;;  %429 = vmatpush.msra.mxu3 %v5757_v18  ;;  %7934 = vst [vmem:[#allocation16_spill] sm:$0xff] %v5867_v63  ;;  %v5906_v28 = vand.u32 4294901760, %v5452_v7  ;;  %v221_v1 = vsub.f32 %v5724_v31, %v5904_v26  ;;  %v5914_v34 = vand.u32 4294901760, %v304_v12  ;;  %v316_v36 = vsub.f32 %v5847_v56, %v5886_v13 }
  0xe8   :  { %235 = vmatpush.msra.mxu0 %v5768_v3  ;;  %276 = vmatpush.msra.mxu1 %v5835_v52  ;;  %7935 = vst [vmem:[#allocation17_spill] sm:$0xff] %v5881_v11  ;;  %v5456_v2 = vpop.eup %5455  ;;  %v5919_v39 = vand.u32 4294901760, %v5877_v10  ;;  %v5921_v0 = vand.u32 4294901760, %v5454_v15  ;;  %v5924_v40 = vsub.f32 %v5450_v60, %v5888_v5  ;;  %v5930_v43 = vand.u32 4294901760, %v310_v21 }
  0xe9   :  { %380 = vmatpush.msra.mxu2 %v5788_v32  ;;  %431 = vmatpush.msra.mxu3 %v5768_v3  ;;  %7936 = vst [vmem:[#allocation18_spill] sm:$0xff] %v5893_v16  ;;  %v322_v46 = vsub.f32 %v5863_v62, %v5902_v23  ;;  %v5935_v48 = vand.u32 4294901760, %v5893_v16  ;;  %v5937_v49 = vand.u32 4294901760, %v5456_v2  ;;  %v5940_v53 = vsub.f32 %v5452_v7, %v5906_v28 }
  0xea   :  { %237 = vmatpush.msra.mxu0 %v5782_v29  ;;  %282 = vmatpush.msra.mxu1 %v5851_v57  ;;  %7937 = vst [vmem:[#allocation19_spill] sm:$0xff] %v5897_v20  ;;  %v222_v58 = vmul.f32 1.442695, %v221_v1  ;;  %v5946_v60 = vand.u32 4294901760, %v316_v36  ;;  %v328_v8 = vsub.f32 %v5877_v10, %v5919_v39  ;;  %v5951_v12 = vsub.f32 %v5454_v15, %v5921_v0 }
  0xeb   :  { %383 = vmatpush.msra.mxu2 %v5801_v37  ;;  %433 = vmatpush.msra.mxu3 %v5782_v29  ;;  %7939 = vst [vmem:[#allocation21_spill] sm:$0xff] %v5914_v34  ;;  %v5956_v7 = vand.u32 4294901760, %v5924_v40  ;;  %v5960_v21 = vand.u32 4294901760, %v322_v46  ;;  %v334_v1 = vsub.f32 %v5893_v16, %v5935_v48  ;;  %v5965_v36 = vsub.f32 %v5456_v2, %v5937_v49 }
  0xec   :  { %239 = vmatpush.msra.mxu0 %v5797_v35  ;;  %288 = vmatpush.msra.mxu1 %v5867_v63  ;;  %7940 = vst [vmem:[#allocation22_spill] sm:$0xff] %v5924_v40  ;;  %v5970_v15 = vand.u32 4294901760, %v5940_v53  ;;  %5457 = vpow2.f32 %v222_v58  ;;  %v5974_v46 = vand.u32 4294901760, %v328_v8  ;;  %v5981_v31 = vand.u32 4294901760, %v5951_v12 }
  0xed   :  { %386 = vmatpush.msra.mxu2 %v5816_v44  ;;  %435 = vmatpush.msra.mxu3 %v5797_v35  ;;  %7941 = vst [vmem:[#allocation23_spill] sm:$0xff] %v5930_v43  ;;  %v340_v2 = vsub.f32 %v5924_v40, %v5956_v7  ;;  %v5985_v58 = vand.u32 4294901760, %v334_v1  ;;  %v5992_v26 = vand.u32 4294901760, %v5965_v36 }
  0xee   :  { %241 = vmatpush.msra.mxu0 %v5812_v41  ;;  %294 = vmatpush.msra.mxu1 %v5881_v11  ;;  %7942 = vst [vmem:[#allocation24_spill] sm:$0xff] %v5940_v53  ;;  %v346_v8 = vsub.f32 %v5940_v53, %v5970_v15  ;;  %v352_v42 = vsub.f32 %v5951_v12, %v5981_v31 }
  0xef   :  { %389 = vmatpush.msra.mxu2 %v5831_v51  ;;  %437 = vmatpush.msra.mxu3 %v5812_v41  ;;  %7943 = vst [vmem:[#allocation25_spill] sm:$0xff] %v5946_v60  ;;  %v5998_v1 = vand.u32 4294901760, %v340_v2 }
  0xf0   :  { %243 = vmatpush.msra.mxu0 %v5827_v50  ;;  %300 = vmatpush.msra.mxu1 %v5897_v20  ;;  %7944 = vst [vmem:[#allocation26_spill] sm:$0xff] %v5951_v12 }
  0xf1   :  { %392 = vmatpush.msra.mxu2 %v5847_v56  ;;  %439 = vmatpush.msra.mxu3 %v5827_v50  ;;  %7945 = vst [vmem:[#allocation27_spill] sm:$0xff] %v5960_v21 }
  0xf2   :  { %245 = vmatpush.msra.mxu0 %v5842_v55  ;;  %306 = vmatpush.msra.mxu1 %v5914_v34  ;;  %7946 = vst [vmem:[#allocation28_spill] sm:$0xff] %v5965_v36 }
  0xf3   :  { %395 = vmatpush.msra.mxu2 %v5863_v62  ;;  %441 = vmatpush.msra.mxu3 %v5842_v55  ;;  %7947 = vst [vmem:[#allocation29_spill] sm:$0xff] %v5974_v46 }
  0xf4   :  { %247 = vmatpush.msra.mxu0 %v5858_v61  ;;  %312 = vmatpush.msra.mxu1 %v5930_v43  ;;  %7948 = vst [vmem:[#allocation30_spill] sm:$0xff] %v5985_v58 }
  0xf5   :  { %398 = vmatpush.msra.mxu2 %v5877_v10  ;;  %443 = vmatpush.msra.mxu3 %v5858_v61  ;;  %7949 = vst [vmem:[#allocation31_spill] sm:$0xff] %v5992_v26 }
  0xf6   :  { %249 = vmatpush.msra.mxu0 %v5888_v5  ;;  %318 = vmatpush.msra.mxu1 %v5946_v60  ;;  %7950 = vst [vmem:[#allocation32_spill] sm:$0xff] %v5998_v1 }
  0xf7   :  { %401 = vmatpush.msra.mxu2 %v5893_v16  ;;  %445 = vmatpush.msra.mxu3 %v5888_v5  ;;  %v358_v16 = vsub.f32 %v5965_v36, %v5992_v26 }
  0xf8   :  { %251 = vmatpush.msra.mxu0 %v5906_v28  ;;  %324 = vmatpush.msra.mxu1 %v5960_v21 }
  0xf9   :  { %404 = vmatpush.msra.mxu2 %v5924_v40  ;;  %447 = vmatpush.msra.mxu3 %v5906_v28  ;;  %v5458_v40 = vpop.eup %5457 }
  0xfa   :  { %253 = vmatpush.msra.mxu0 %v5921_v0  ;;  %330 = vmatpush.msra.mxu1 %v5974_v46  ;;  %v6012_v2 = vand.u32 4294901760, %v5458_v40 }
  0xfb   :  { %407 = vmatpush.msra.mxu2 %v5940_v53  ;;  %449 = vmatpush.msra.mxu3 %v5921_v0  ;;  %v6006_v53 = vand.u32 4294901760, %v346_v8  ;;  %v6022_v8 = vand.u32 4294901760, %v358_v16 }
  0xfc   :  { %255 = vmatpush.msra.mxu0 %v5937_v49  ;;  %336 = vmatpush.msra.mxu1 %v5985_v58 }
  0xfd   :  { %410 = vmatpush.msra.mxu2 %v5951_v12  ;;  %451 = vmatpush.msra.mxu3 %v5937_v49  ;;  %7951 = vst [vmem:[#allocation33_spill] sm:$0xff] %v6006_v53 }
  0xfe   :  { %462 = vmatpush.msrb.mxu0 %v5785_v30  ;;  %342 = vmatpush.msra.mxu1 %v5998_v1  ;;  %7953 = vst [vmem:[#allocation35_spill] sm:$0xff] %v6022_v8 }
  0xff   :  { %635 = vmatpush.msrb.mxu3 %v5820_v45  ;;  %413 = vmatpush.msra.mxu2 %v5965_v36  ;;  %v6016_v45 = vand.u32 4294901760, %v352_v42  ;;  %v257_v42 = vsub.f32 %v5458_v40, %v6012_v2 }
 0x100   :  { %466 = vmatpush.msrb.mxu0 %v5780_v27  ;;  %348 = vmatpush.msra.mxu1 %v6006_v53 }
 0x101   :  { %590 = vmatpush.msrb.mxu2 %v5755_v4  ;;  %641 = vmatpush.msrb.mxu3 %v5835_v52  ;;  %7952 = vst [vmem:[#allocation34_spill] sm:$0xff] %v6016_v45  ;;  %v258_v16 = vand.u32 4294901760, %v257_v42 }
 0x102   :  { %470 = vmatpush.msrb.mxu0 %v5792_v33  ;;  %354 = vmatpush.msra.mxu1 %v6016_v45 }
 0x103   :  { %592 = vmatpush.msrb.mxu2 %v5753_v17  ;;  %647 = vmatpush.msrb.mxu3 %v5851_v57  ;;  %v259_v40 = vsub.f32 %v257_v42, %v258_v16 }
 0x104   :  { %474 = vmatpush.msrb.mxu0 %v5804_v38  ;;  %360 = vmatpush.msra.mxu1 %v6022_v8 }
 0x105   :  { %594 = vmatpush.msrb.mxu2 %v5747_v6  ;;  %653 = vmatpush.msrb.mxu3 %v5867_v63 }
 0x106   :  { %478 = vmatpush.msrb.mxu0 %v5825_v47  ;;  %529 = vmatpush.msrb.mxu1 %v5755_v4 }
 0x107   :  { %596 = vmatpush.msrb.mxu2 %v5749_v14  ;;  %659 = vmatpush.msrb.mxu3 %v5881_v11 }
 0x108   :  { %482 = vmatpush.msrb.mxu0 %v5840_v54  ;;  %531 = vmatpush.msrb.mxu1 %v5753_v17 }
 0x109   :  { %598 = vmatpush.msrb.mxu2 %v5757_v18  ;;  %665 = vmatpush.msrb.mxu3 %v5897_v20 }
 0x10a   :  { %486 = vmatpush.msrb.mxu0 %v5856_v59  ;;  %533 = vmatpush.msrb.mxu1 %v5747_v6 }
 0x10b   :  { %600 = vmatpush.msrb.mxu2 %v5768_v3  ;;  %671 = vmatpush.msrb.mxu3 %v5914_v34  ;;  %v260_v34 = vand.u32 4294901760, %v259_v40  ;;  %v7817_v40 = vmov 0  }
 0x10c   :  { %490 = vmatpush.msrb.mxu0 %v5872_v9  ;;  %535 = vmatpush.msrb.mxu1 %v5749_v14 }
 0x10d   :  { %602 = vmatpush.msrb.mxu2 %v5782_v29  ;;  %677 = vmatpush.msrb.mxu3 %v5930_v43 }
 0x10e   :  { %494 = vmatpush.msrb.mxu0 %v5886_v13  ;;  %537 = vmatpush.msrb.mxu1 %v5757_v18 }
 0x10f   :  { %604 = vmatpush.msrb.mxu2 %v5797_v35  ;;  %683 = vmatpush.msrb.mxu3 %v5946_v60 }
 0x110   :  { %416 = vmatmul.f32.vlgmr.msra.gmra.mxu2 %v257_v42  ;;  %498 = vmatpush.msrb.mxu0 %v5902_v23  ;;  %v5383_v42 = vld [vmem:[%s7797_s1 + $0x2] sm:$0x3] }
 0x111   :  { %539 = vmatpush.msrb.mxu1 %v5768_v3  ;;  %606 = vmatpush.msrb.mxu2 %v5812_v41  ;;  %vm574_vm1 = vcmp.gt.f32.partialorder %v5383_v42, 0.0  ;;  %v7957_v42 = vld [vmem:[#allocation13_spill] sm:$0xff] }
 0x112   :  { %689 = vmatpush.msrb.mxu3 %v5960_v21  ;;  %502 = vmatpush.msrb.mxu0 %v5919_v39 }
 0x113   :  { %455 = vmatmul.f32.vlgmr.msra.gmra.mxu3 %v258_v16  ;;  %541 = vmatpush.msrb.mxu1 %v5782_v29  ;;  %v7956_v16 = vld [vmem:[#allocation24_spill] sm:$0xff] }
 0x114   :  { %608 = vmatpush.msrb.mxu2 %v5827_v50  ;;  %695 = vmatpush.msrb.mxu3 %v5974_v46 }
 0x115   :  { %261 = vmatmul.f32.vlgmr.msra.gmra.mxu0 %v260_v34  ;;  %362 = vmatmul.f32.vlgmr.msra.gmra.mxu1 %v6012_v2  ;;  %v7954_v34 = vld [vmem:[#allocation18_spill] sm:$0xff] }
 0x116   :  { %506 = vmatpush.msrb.mxu0 %v5935_v48  ;;  %543 = vmatpush.msrb.mxu1 %v5797_v35 }
 0x117   :  { %610 = vmatpush.msrb.mxu2 %v5842_v55  ;;  %701 = vmatpush.msrb.mxu3 %v5985_v58 }
 0x118   :  { %510 = vmatpush.msrb.mxu0 %v5956_v7  ;;  %545 = vmatpush.msrb.mxu1 %v5812_v41 }
 0x119   :  { %612 = vmatpush.msrb.mxu2 %v5858_v61  ;;  %707 = vmatpush.msrb.mxu3 %v5998_v1 }
 0x11a   :  { %514 = vmatpush.msrb.mxu0 %v5970_v15  ;;  %547 = vmatpush.msrb.mxu1 %v5827_v50 }
 0x11b   :  { %614 = vmatpush.msrb.mxu2 %v5888_v5  ;;  %713 = vmatpush.msrb.mxu3 %v6006_v53 }
 0x11c   :  { %518 = vmatpush.msrb.mxu0 %v5981_v31  ;;  %549 = vmatpush.msrb.mxu1 %v5842_v55 }
 0x11d   :  { %616 = vmatpush.msrb.mxu2 %v5906_v28  ;;  %719 = vmatpush.msrb.mxu3 %v6016_v45 }
 0x11e   :  { %522 = vmatpush.msrb.mxu0 %v5992_v26  ;;  %551 = vmatpush.msrb.mxu1 %v5858_v61 }
 0x11f   :  { %618 = vmatpush.msrb.mxu2 %v5921_v0  ;;  %725 = vmatpush.msrb.mxu3 %v6022_v8 }
 0x120   :  { %524 = vmatmul.f32.vlgmr.msrb.gmra.mxu0 %v6012_v2  ;;  %553 = vmatpush.msrb.mxu1 %v5888_v5 }
 0x121   :  { %894 = vmatpush.msra.mxu3 %v5755_v4  ;;  %733 = vmatpush.msra.mxu0 %v5771_v24 }
 0x122   :  { %620 = vmatpush.msrb.mxu2 %v5937_v49  ;;  %555 = vmatpush.msrb.mxu1 %v5906_v28 }
 0x123   :  { %896 = vmatpush.msra.mxu3 %v5753_v17  ;;  %736 = vmatpush.msra.mxu0 %v5765_v22 }
 0x124   :  { %827 = vmatpush.msra.mxu2 %v5785_v30  ;;  %557 = vmatpush.msrb.mxu1 %v5921_v0 }
 0x125   :  { %898 = vmatpush.msra.mxu3 %v5747_v6  ;;  %739 = vmatpush.msra.mxu0 %v5760_v19 }
 0x126   :  { %831 = vmatpush.msra.mxu2 %v5780_v27  ;;  %559 = vmatpush.msrb.mxu1 %v5937_v49 }
 0x127   :  { %900 = vmatpush.msra.mxu3 %v5749_v14  ;;  %742 = vmatpush.msra.mxu0 %v5775_v25 }
 0x128   :  { %835 = vmatpush.msra.mxu2 %v5792_v33  ;;  %561 = vmatmul.f32.vlgmr.msrb.gmra.mxu1 %v6012_v2  ;;  %v7955_v2 = vld [vmem:[#allocation22_spill] sm:$0xff] }
 0x129   :  { %902 = vmatpush.msra.mxu3 %v5757_v18  ;;  %745 = vmatpush.msra.mxu0 %v5788_v32 }
 0x12a   :  { %786 = vmatpush.msra.mxu1 %v5755_v4  ;;  %839 = vmatpush.msra.mxu2 %v5804_v38 }
 0x12b   :  { %748 = vmatpush.msra.mxu0 %v5801_v37  ;;  %904 = vmatpush.msra.mxu3 %v5768_v3 }
 0x12c   :  { %788 = vmatpush.msra.mxu1 %v5753_v17  ;;  %843 = vmatpush.msra.mxu2 %v5825_v47 }
 0x12d   :  { %751 = vmatpush.msra.mxu0 %v5816_v44  ;;  %906 = vmatpush.msra.mxu3 %v5782_v29 }
 0x12e   :  { %790 = vmatpush.msra.mxu1 %v5747_v6  ;;  %847 = vmatpush.msra.mxu2 %v5840_v54 }
 0x12f   :  { %754 = vmatpush.msra.mxu0 %v5831_v51  ;;  %908 = vmatpush.msra.mxu3 %v5797_v35 }
 0x130   :  { %792 = vmatpush.msra.mxu1 %v5749_v14  ;;  %851 = vmatpush.msra.mxu2 %v5856_v59 }
 0x131   :  { %757 = vmatpush.msra.mxu0 %v5847_v56  ;;  %910 = vmatpush.msra.mxu3 %v5812_v41 }
 0x132   :  { %794 = vmatpush.msra.mxu1 %v5757_v18  ;;  %855 = vmatpush.msra.mxu2 %v5872_v9 }
 0x133   :  { %760 = vmatpush.msra.mxu0 %v5863_v62  ;;  %912 = vmatpush.msra.mxu3 %v5827_v50 }
 0x134   :  { %796 = vmatpush.msra.mxu1 %v5768_v3  ;;  %859 = vmatpush.msra.mxu2 %v5886_v13 }
 0x135   :  { %763 = vmatpush.msra.mxu0 %v5877_v10  ;;  %914 = vmatpush.msra.mxu3 %v5842_v55 }
 0x136   :  { %798 = vmatpush.msra.mxu1 %v5782_v29  ;;  %863 = vmatpush.msra.mxu2 %v5902_v23 }
 0x137   :  { %766 = vmatpush.msra.mxu0 %v7954_v34  ;;  %916 = vmatpush.msra.mxu3 %v5858_v61 }
 0x138   :  { %800 = vmatpush.msra.mxu1 %v5797_v35  ;;  %867 = vmatpush.msra.mxu2 %v5919_v39 }
 0x139   :  { %769 = vmatpush.msra.mxu0 %v7955_v2  ;;  %918 = vmatpush.msra.mxu3 %v5888_v5 }
 0x13a   :  { %802 = vmatpush.msra.mxu1 %v5812_v41  ;;  %871 = vmatpush.msra.mxu2 %v5935_v48 }
 0x13b   :  { %772 = vmatpush.msra.mxu0 %v7956_v16  ;;  %920 = vmatpush.msra.mxu3 %v5906_v28  ;;  %v575_v16 = vsel %vm574_vm1, 1, %v7817_v40 }
 0x13c   :  { %804 = vmatpush.msra.mxu1 %v5827_v50  ;;  %875 = vmatpush.msra.mxu2 %v5956_v7 }
 0x13d   :  { %775 = vmatpush.msra.mxu0 %v5951_v12  ;;  %922 = vmatpush.msra.mxu3 %v5921_v0 }
 0x13e   :  { %806 = vmatpush.msra.mxu1 %v5842_v55  ;;  %879 = vmatpush.msra.mxu2 %v5970_v15 }
 0x13f   :  { %778 = vmatpush.msra.mxu0 %v5965_v36  ;;  %924 = vmatpush.msra.mxu3 %v5937_v49 }
 0x140   :  { %808 = vmatpush.msra.mxu1 %v5858_v61  ;;  %883 = vmatpush.msra.mxu2 %v5981_v31 }
 0x141   :  { %955 = vmatpush.msrb.mxu0 %v5755_v4  ;;  %5420 = vset.pattern.permute.xlu1 %v7817_v40 }
 0x142   :  { %810 = vmatpush.msra.mxu1 %v5888_v5  ;;  %887 = vmatpush.msra.mxu2 %v5992_v26 }
 0x143   :  { %577 = vperm.xlu1 %5420, %v575_v16   ;;  %957 = vmatpush.msrb.mxu0 %v5753_v17  ;;  %v7958_v16 = vld [vmem:[#allocation21_spill] sm:$0xff] }
 0x144   :  { %812 = vmatpush.msra.mxu1 %v5906_v28  ;;  %5421 = vset.pattern.permute.xlu2 %v7817_v40 }
 0x145   :  { %959 = vmatpush.msrb.mxu0 %v5747_v6  ;;  %5422 = vset.pattern.permute.xlu0 %v7817_v40 }
 0x146   :  { %814 = vmatpush.msra.mxu1 %v5921_v0 }
 0x147   :  { %961 = vmatpush.msrb.mxu0 %v5749_v14 }
 0x148   :  { %816 = vmatpush.msra.mxu1 %v5937_v49 }
 0x149   :  { %963 = vmatpush.msrb.mxu0 %v5757_v18 }
 0x14a   :  { %1000 = vmatpush.msrb.mxu1 %v7957_v42 }
 0x14b   :  { %965 = vmatpush.msrb.mxu0 %v5768_v3 }
 0x14c   :  { %1006 = vmatpush.msrb.mxu1 %v5835_v52 }
 0x14d   :  { %967 = vmatpush.msrb.mxu0 %v5782_v29 }
 0x14e   :  { %1012 = vmatpush.msrb.mxu1 %v5851_v57  ;;  %v7960_v57 = vld [vmem:[#allocation20_spill] sm:$0xff] }
 0x14f   :  { %969 = vmatpush.msrb.mxu0 %v5797_v35 }
 0x150   :  { %1018 = vmatpush.msrb.mxu1 %v5867_v63 }
 0x151   :  { %971 = vmatpush.msrb.mxu0 %v5812_v41 }
 0x152   :  { %1024 = vmatpush.msrb.mxu1 %v5881_v11 }
 0x153   :  { %973 = vmatpush.msrb.mxu0 %v5827_v50 }
 0x154   :  { %1030 = vmatpush.msrb.mxu1 %v5897_v20 }
 0x155   :  { %975 = vmatpush.msrb.mxu0 %v5842_v55 }
 0x156   :  { %1036 = vmatpush.msrb.mxu1 %v7958_v16 }
 0x157   :  { %977 = vmatpush.msrb.mxu0 %v5858_v61 }
 0x158   :  { %1042 = vmatpush.msrb.mxu1 %v5930_v43 }
 0x159   :  { %979 = vmatpush.msrb.mxu0 %v5888_v5 }
 0x15a   :  { %1048 = vmatpush.msrb.mxu1 %v5946_v60 }
 0x15b   :  { %981 = vmatpush.msrb.mxu0 %v5906_v28 }
 0x15c   :  { %1054 = vmatpush.msrb.mxu1 %v5960_v21 }
 0x15d   :  { %983 = vmatpush.msrb.mxu0 %v5921_v0 }
 0x15e   :  { %1060 = vmatpush.msrb.mxu1 %v5974_v46 }
 0x15f   :  { %985 = vmatpush.msrb.mxu0 %v5937_v49 }
 0x160   :  { %1066 = vmatpush.msrb.mxu1 %v5985_v58 }
 0x162   :  { %1072 = vmatpush.msrb.mxu1 %v5998_v1  ;;  %v7959_v1 = vld [vmem:[#allocation12_spill] sm:$0xff] }
 0x164   :  { %1078 = vmatpush.msrb.mxu1 %v6006_v53  ;;  %v565_v53 = vadd.f32 %v7960_v57, %v7959_v1  ;;  %v5389_v57 = vld [vmem:[%s7797_s1 + $0x8] sm:$0x3] }
 0x165   :  { %vm1669_vm3 = vcmp.gt.f32.partialorder %v5389_v57, 0.0  ;;  %v5385_v57 = vld [vmem:[%s7797_s1 + $0x4] sm:$0x3] }
 0x166   :  { %1084 = vmatpush.msrb.mxu1 %v6016_v45  ;;  %vm939_vm4 = vcmp.gt.f32.partialorder %v5385_v57, 0.0  ;;  %v7975_v57 = vld [vmem:[#allocation29_spill] sm:$0xff] }
 0x168   :  { %1090 = vmatpush.msrb.mxu1 %v6022_v8  ;;  %v5382_v8 = vld [vmem:[%s7796_s0 + $0x2] sm:$0x3] }
 0x192   :  { %v262_v40 = vpop.f32.mrf.mxu0  ;;  %v363_v60 = vpop.f32.mrf.mxu1 }
 0x193   :  { %v364_v43 = vadd.f32 %v363_v60, %v262_v40  ;;  %v417_v21 = vpop.f32.mrf.mxu2 }
 0x195   :  { %v418_v16 = vadd.f32 %v417_v21, %v364_v43  ;;  %v7961_v43 = vld [vmem:[#allocation11_spill] sm:$0xff] }
 0x196   :  { %v456_v20 = vpop.f32.mrf.mxu3 }
 0x197   :  { %v457_v46 = vadd.f32 %v456_v20, %v418_v16 }
 0x19d   :  { %v525_v11 = vpop.f32.mrf.mxu0 }
 0x19e   :  { %v526_v36 = vadd.f32 %v525_v11, %v457_v46  ;;  %v7962_v11 = vmov 0  }
 0x19f   :  { %v1670_v20 = vsel %vm1669_vm3, 1, %v7962_v11 }
 0x1a5   :  { %v562_v63 = vpop.f32.mrf.mxu1 }
 0x1a6   :  { %v563_v12 = vadd.f32 %v562_v63, %v526_v36 }
 0x1a8   :  { %5459 = vlog2.f32 %v563_v12 }
 0x1ae   :  { %v5460_v58 = vpop.eup %5459 }
 0x1af   :  { %v567_v52 = vmul.f32 0.6931472, %v5460_v58 }
 0x1b1   :  { %v568_v45 = vadd.f32 %v567_v52, %v565_v53 }
 0x1b3   :  { %v571_v60 = vadd.f32 %v5382_v8, %v568_v45 }
 0x1b5   :  { %v578_v40 = vpop.permute.xlu1 %577 }
 0x1b6   :  { %vm579_vm2 = vcmp.eq.s32.totalorder %v578_v40, 1  ;;  %v7964_v40 = vld [vmem:[#allocation24_spill] sm:$0xff] }
 0x1b7   :  { %v6194_v21 = vsel %vm579_vm2, %v571_v60, %v7961_v43  ;;  %v7963_v60 = vld [vmem:[#allocation14_spill] sm:$0xff]  ;;  %v7965_v43 = vld [vmem:[#allocation15_spill] sm:$0xff] }
 0x1b8   :  { %582 = vst [vmem:[#allocation7 + $0x2] sm:$0x3] %v6194_v21  ;;  %v583_v63 = vsel %vm217_vm0, %v6194_v21, -inf }
 0x1b9   :  { %584 = vmax.xlane.f32.xlu1 %v583_v63  ;;  %v7966_v63 = vld [vmem:[#allocation26_spill] sm:$0xff] }
 0x1d2   :  { %1672 = vperm.xlu1 %5420, %v1670_v20   ;;  %v7967_v20 = vld [vmem:[#allocation16_spill] sm:$0xff] }
 0x22c   :  { %v6203_v45 = vpop.xlane.xlu1 %584 }
 0x22d   :  { %v586_v52 = vsub.f32 %v6194_v21, %v6203_v45 }
 0x22f   :  { %v587_v53 = vmul.f32 1.442695, %v586_v52  ;;  %v7968_v52 = vld [vmem:[#allocation28_spill] sm:$0xff] }
 0x231   :  { %5461 = vpow2.f32 %v587_v53  ;;  %v940_v53 = vsel %vm939_vm4, 1, %v7962_v11  ;;  %v5384_v11 = vld [vmem:[%s7796_s0 + $0x4] sm:$0x3] }
 0x232   :  { %942 = vperm.xlu2 %5421, %v940_v53   ;;  %v7976_v53 = vld [vmem:[#allocation30_spill] sm:$0xff] }
 0x237   :  { %v5462_v12 = vpop.eup %5461 }
 0x238   :  { %v621_v36 = vand.u32 4294901760, %v5462_v12 }
 0x23a   :  { %727 = vmatmul.f32.vlgmr.msrb.gmra.mxu3 %v621_v36  ;;  %v622_v46 = vsub.f32 %v5462_v12, %v621_v36  ;;  %v7969_v12 = vld [vmem:[#allocation17_spill] sm:$0xff] }
 0x23b   :  { %1151 = vmatpush.msrb.mxu3 %v5755_v4 }
 0x23c   :  { %781 = vmatmul.f32.vlgmr.msra.gmra.mxu0 %v622_v46  ;;  %v623_v58 = vand.u32 4294901760, %v622_v46 }
 0x23d   :  { %1153 = vmatpush.msrb.mxu3 %v5753_v17  ;;  %1192 = vmatpush.msra.mxu0 %v5785_v30 }
 0x23e   :  { %820 = vmatmul.f32.vlgmr.msra.gmra.mxu1 %v623_v58  ;;  %v624_v8 = vsub.f32 %v622_v46, %v623_v58  ;;  %v7971_v46 = vld [vmem:[#allocation21_spill] sm:$0xff]  ;;  %v7972_v58 = vld [vmem:[#allocation23_spill] sm:$0xff] }
 0x23f   :  { %1155 = vmatpush.msrb.mxu3 %v5747_v6  ;;  %1196 = vmatpush.msra.mxu0 %v5780_v27 }
 0x240   :  { %1259 = vmatpush.msra.mxu1 %v5755_v4  ;;  %v625_v16 = vand.u32 4294901760, %v624_v8  ;;  %v7973_v8 = vld [vmem:[#allocation25_spill] sm:$0xff] }
 0x241   :  { %1157 = vmatpush.msrb.mxu3 %v5749_v14  ;;  %1200 = vmatpush.msra.mxu0 %v5792_v33 }
 0x242   :  { %1261 = vmatpush.msra.mxu1 %v5753_v17  ;;  %626 = vmatmul.f32.vlgmr.msrb.gmra.mxu2 %v625_v16  ;;  %v7974_v16 = vld [vmem:[#allocation27_spill] sm:$0xff] }
 0x243   :  { %926 = vmatmul.f32.vlgmr.msra.gmra.mxu3 %v621_v36  ;;  %1098 = vmatpush.msrb.mxu2 %v5771_v24 }
 0x244   :  { %1159 = vmatpush.msrb.mxu3 %v5757_v18  ;;  %1204 = vmatpush.msra.mxu0 %v5804_v38 }
 0x245   :  { %1263 = vmatpush.msra.mxu1 %v5747_v6  ;;  %1101 = vmatpush.msrb.mxu2 %v5765_v22 }
 0x246   :  { %1161 = vmatpush.msrb.mxu3 %v5768_v3  ;;  %1208 = vmatpush.msra.mxu0 %v5825_v47 }
 0x247   :  { %1265 = vmatpush.msra.mxu1 %v5749_v14  ;;  %1104 = vmatpush.msrb.mxu2 %v5760_v19 }
 0x248   :  { %1163 = vmatpush.msrb.mxu3 %v5782_v29  ;;  %1212 = vmatpush.msra.mxu0 %v5840_v54 }
 0x249   :  { %1267 = vmatpush.msra.mxu1 %v5757_v18  ;;  %1107 = vmatpush.msrb.mxu2 %v5775_v25 }
 0x24a   :  { %1165 = vmatpush.msrb.mxu3 %v5797_v35  ;;  %1216 = vmatpush.msra.mxu0 %v5856_v59 }
 0x24b   :  { %1269 = vmatpush.msra.mxu1 %v5768_v3  ;;  %889 = vmatmul.f32.vlgmr.msra.gmra.mxu2 %v621_v36  ;;  %v7970_v36 = vld [vmem:[#allocation19_spill] sm:$0xff] }
 0x24c   :  { %1110 = vmatpush.msrb.mxu2 %v5788_v32  ;;  %1167 = vmatpush.msrb.mxu3 %v5812_v41 }
 0x24d   :  { %1220 = vmatpush.msra.mxu0 %v5872_v9  ;;  %1271 = vmatpush.msra.mxu1 %v5782_v29 }
 0x24e   :  { %1113 = vmatpush.msrb.mxu2 %v5801_v37  ;;  %1169 = vmatpush.msrb.mxu3 %v5827_v50 }
 0x24f   :  { %1224 = vmatpush.msra.mxu0 %v5886_v13  ;;  %1273 = vmatpush.msra.mxu1 %v5797_v35 }
 0x250   :  { %1116 = vmatpush.msrb.mxu2 %v5816_v44  ;;  %1171 = vmatpush.msrb.mxu3 %v5842_v55 }
 0x251   :  { %1228 = vmatpush.msra.mxu0 %v5902_v23  ;;  %1275 = vmatpush.msra.mxu1 %v5812_v41 }
 0x252   :  { %1119 = vmatpush.msrb.mxu2 %v5831_v51  ;;  %1173 = vmatpush.msrb.mxu3 %v5858_v61 }
 0x253   :  { %1232 = vmatpush.msra.mxu0 %v5919_v39  ;;  %1277 = vmatpush.msra.mxu1 %v5827_v50 }
 0x254   :  { %1122 = vmatpush.msrb.mxu2 %v5847_v56  ;;  %1175 = vmatpush.msrb.mxu3 %v5888_v5 }
 0x255   :  { %1236 = vmatpush.msra.mxu0 %v5935_v48  ;;  %1279 = vmatpush.msra.mxu1 %v5842_v55 }
 0x256   :  { %1125 = vmatpush.msrb.mxu2 %v5863_v62  ;;  %1177 = vmatpush.msrb.mxu3 %v5906_v28 }
 0x257   :  { %1240 = vmatpush.msra.mxu0 %v5956_v7  ;;  %1281 = vmatpush.msra.mxu1 %v5858_v61 }
 0x258   :  { %1128 = vmatpush.msrb.mxu2 %v5877_v10  ;;  %1179 = vmatpush.msrb.mxu3 %v5921_v0 }
 0x259   :  { %1244 = vmatpush.msra.mxu0 %v5970_v15  ;;  %1283 = vmatpush.msra.mxu1 %v5888_v5 }
 0x25a   :  { %1131 = vmatpush.msrb.mxu2 %v7954_v34  ;;  %1181 = vmatpush.msrb.mxu3 %v5937_v49 }
 0x25b   :  { %1248 = vmatpush.msra.mxu0 %v5981_v31  ;;  %1285 = vmatpush.msra.mxu1 %v5906_v28 }
 0x25c   :  { %1365 = vmatpush.msra.mxu3 %v7957_v42  ;;  %1134 = vmatpush.msrb.mxu2 %v7955_v2 }
 0x25d   :  { %1252 = vmatpush.msra.mxu0 %v5992_v26  ;;  %1287 = vmatpush.msra.mxu1 %v5921_v0 }
 0x25e   :  { %1371 = vmatpush.msra.mxu3 %v7963_v60  ;;  %1137 = vmatpush.msrb.mxu2 %v7964_v40  ;;  %v930_v40 = vadd.f32 %v6203_v45, %v7959_v1 }
 0x25f   :  { %1289 = vmatpush.msra.mxu1 %v5937_v49 }
 0x260   :  { %1377 = vmatpush.msra.mxu3 %v7965_v43  ;;  %1140 = vmatpush.msrb.mxu2 %v7966_v63 }
 0x262   :  { %1383 = vmatpush.msra.mxu3 %v7967_v20  ;;  %1143 = vmatpush.msrb.mxu2 %v7968_v52 }
 0x264   :  { %1320 = vmatpush.msra.mxu2 %v5755_v4  ;;  %1389 = vmatpush.msra.mxu3 %v7969_v12 }
 0x266   :  { %1322 = vmatpush.msra.mxu2 %v5753_v17  ;;  %1395 = vmatpush.msra.mxu3 %v7970_v36 }
 0x268   :  { %1324 = vmatpush.msra.mxu2 %v5747_v6  ;;  %1401 = vmatpush.msra.mxu3 %v7971_v46  ;;  %v7977_v46 = vld [vmem:[#allocation32_spill] sm:$0xff] }
 0x26a   :  { %1326 = vmatpush.msra.mxu2 %v5749_v14  ;;  %1407 = vmatpush.msra.mxu3 %v7972_v58  ;;  %v7978_v58 = vld [vmem:[#allocation33_spill] sm:$0xff] }
 0x26c   :  { %1328 = vmatpush.msra.mxu2 %v5757_v18  ;;  %1413 = vmatpush.msra.mxu3 %v7973_v8  ;;  %v7979_v8 = vld [vmem:[#allocation34_spill] sm:$0xff] }
 0x26e   :  { %1330 = vmatpush.msra.mxu2 %v5768_v3  ;;  %1419 = vmatpush.msra.mxu3 %v7974_v16  ;;  %v7980_v16 = vld [vmem:[#allocation35_spill] sm:$0xff] }
 0x270   :  { %1332 = vmatpush.msra.mxu2 %v5782_v29  ;;  %1425 = vmatpush.msra.mxu3 %v7975_v57 }
 0x272   :  { %1334 = vmatpush.msra.mxu2 %v5797_v35  ;;  %1431 = vmatpush.msra.mxu3 %v7976_v53 }
 0x274   :  { %1336 = vmatpush.msra.mxu2 %v5812_v41  ;;  %1437 = vmatpush.msra.mxu3 %v7977_v46 }
 0x276   :  { %1338 = vmatpush.msra.mxu2 %v5827_v50  ;;  %1443 = vmatpush.msra.mxu3 %v7978_v58 }
 0x278   :  { %1340 = vmatpush.msra.mxu2 %v5842_v55  ;;  %1449 = vmatpush.msra.mxu3 %v7979_v8 }
 0x27a   :  { %1342 = vmatpush.msra.mxu2 %v5858_v61  ;;  %1455 = vmatpush.msra.mxu3 %v7980_v16 }
 0x27c   :  { %1344 = vmatpush.msra.mxu2 %v5888_v5 }
 0x27e   :  { %1346 = vmatpush.msra.mxu2 %v5906_v28 }
 0x280   :  { %1348 = vmatpush.msra.mxu2 %v5921_v0 }
 0x282   :  { %1350 = vmatpush.msra.mxu2 %v5937_v49 }
 0x28c   :  { %v943_v26 = vpop.permute.xlu2 %942 }
 0x28d   :  { %vm944_vm5 = vcmp.eq.s32.totalorder %v943_v26, 1 }
 0x2b9   :  { %v782_v58 = vpop.f32.mrf.mxu0 }
 0x2bb   :  { %v821_v12 = vpop.f32.mrf.mxu1 }
 0x2bd   :  { %v728_v46 = vpop.f32.mrf.mxu3 }
 0x2c5   :  { %v627_v53 = vpop.f32.mrf.mxu2 }
 0x2c6   :  { %v729_v57 = vadd.f32 %v728_v46, %v627_v53  ;;  %v927_v63 = vpop.f32.mrf.mxu3  ;;  %v7983_v53 = vld [vmem:[#allocation14_spill] sm:$0xff] }
 0x2c8   :  { %v783_v36 = vadd.f32 %v782_v58, %v729_v57  ;;  %v7982_v57 = vld [vmem:[#allocation31_spill] sm:$0xff] }
 0x2ca   :  { %v822_v52 = vadd.f32 %v821_v12, %v783_v36  ;;  %v5387_v36 = vld [vmem:[%s7797_s1 + $0x6] sm:$0x3] }
 0x2cb   :  { %vm1304_vm6 = vcmp.gt.f32.partialorder %v5387_v36, 0.0  ;;  %v7995_v36 = vld [vmem:[#allocation29_spill] sm:$0xff] }
 0x2ce   :  { %v890_v8 = vpop.f32.mrf.mxu2 }
 0x2cf   :  { %v891_v20 = vadd.f32 %v890_v8, %v822_v52  ;;  %v7981_v8 = vmov 0  }
 0x2d1   :  { %v928_v43 = vadd.f32 %v927_v63, %v891_v20 }
 0x2d3   :  { %5463 = vlog2.f32 %v928_v43 }
 0x2d9   :  { %v5464_v16 = vpop.eup %5463 }
 0x2da   :  { %v932_v60 = vmul.f32 0.6931472, %v5464_v16  ;;  %v1305_v16 = vsel %vm1304_vm6, 1, %v7981_v8 }
 0x2db   :  { %1307 = vperm.xlu0 %5422, %v1305_v16   ;;  %v7996_v16 = vld [vmem:[#allocation30_spill] sm:$0xff] }
 0x2dc   :  { %v933_v46 = vadd.f32 %v932_v60, %v930_v40 }
 0x2de   :  { %v936_v58 = vadd.f32 %v5384_v11, %v933_v46  ;;  %v7984_v46 = vld [vmem:[#allocation24_spill] sm:$0xff] }
 0x2e0   :  { %v6313_v12 = vsel %vm944_vm5, %v936_v58, %v6194_v21  ;;  %v7985_v58 = vld [vmem:[#allocation15_spill] sm:$0xff] }
 0x2e1   :  { %947 = vst [vmem:[#allocation7 + $0x4] sm:$0x3] %v6313_v12  ;;  %v948_v43 = vsel %vm217_vm0, %v6313_v12, -inf }
 0x2e2   :  { %949 = vmax.xlane.f32.xlu2 %v948_v43  ;;  %v7986_v43 = vld [vmem:[#allocation26_spill] sm:$0xff] }
 0x355   :  { %v6318_v63 = vpop.xlane.xlu2 %949 }
 0x356   :  { %v951_v45 = vsub.f32 %v6313_v12, %v6318_v63 }
 0x358   :  { %v952_v20 = vmul.f32 1.442695, %v951_v45  ;;  %v7987_v45 = vld [vmem:[#allocation16_spill] sm:$0xff] }
 0x35a   :  { %5465 = vpow2.f32 %v952_v20  ;;  %v7988_v20 = vld [vmem:[#allocation28_spill] sm:$0xff] }
 0x360   :  { %v5466_v52 = vpop.eup %5465 }
 0x361   :  { %v986_v60 = vand.u32 4294901760, %v5466_v52 }
 0x363   :  { %1092 = vmatmul.f32.vlgmr.msrb.gmra.mxu1 %v986_v60  ;;  %v987_v26 = vsub.f32 %v5466_v52, %v986_v60  ;;  %v7989_v52 = vld [vmem:[#allocation17_spill] sm:$0xff] }
 0x364   :  { %1516 = vmatpush.msrb.mxu1 %v5755_v4 }
 0x365   :  { %1146 = vmatmul.f32.vlgmr.msrb.gmra.mxu2 %v987_v26  ;;  %v988_v21 = vand.u32 4294901760, %v987_v26 }
 0x366   :  { %1518 = vmatpush.msrb.mxu1 %v5753_v17  ;;  %1557 = vmatpush.msrb.mxu2 %v5785_v30 }
 0x367   :  { %1185 = vmatmul.f32.vlgmr.msrb.gmra.mxu3 %v988_v21  ;;  %v989_v11 = vsub.f32 %v987_v26, %v988_v21  ;;  %v7991_v26 = vld [vmem:[#allocation21_spill] sm:$0xff]  ;;  %v7992_v21 = vld [vmem:[#allocation23_spill] sm:$0xff] }
 0x368   :  { %1520 = vmatpush.msrb.mxu1 %v5747_v6  ;;  %1561 = vmatpush.msrb.mxu2 %v5780_v27 }
 0x369   :  { %1624 = vmatpush.msrb.mxu3 %v5755_v4  ;;  %v990_v40 = vand.u32 4294901760, %v989_v11  ;;  %v7993_v11 = vld [vmem:[#allocation25_spill] sm:$0xff] }
 0x36a   :  { %1522 = vmatpush.msrb.mxu1 %v5749_v14  ;;  %1565 = vmatpush.msrb.mxu2 %v5792_v33 }
 0x36b   :  { %1626 = vmatpush.msrb.mxu3 %v5753_v17  ;;  %991 = vmatmul.f32.vlgmr.msrb.gmra.mxu0 %v990_v40  ;;  %v7994_v40 = vld [vmem:[#allocation27_spill] sm:$0xff] }
 0x36c   :  { %1291 = vmatmul.f32.vlgmr.msra.gmra.mxu1 %v986_v60  ;;  %1463 = vmatpush.msrb.mxu0 %v5771_v24 }
 0x36d   :  { %1524 = vmatpush.msrb.mxu1 %v5757_v18  ;;  %1569 = vmatpush.msrb.mxu2 %v5804_v38 }
 0x36e   :  { %1628 = vmatpush.msrb.mxu3 %v5747_v6  ;;  %1466 = vmatpush.msrb.mxu0 %v5765_v22 }
 0x36f   :  { %1526 = vmatpush.msrb.mxu1 %v5768_v3  ;;  %1573 = vmatpush.msrb.mxu2 %v5825_v47 }
 0x370   :  { %1630 = vmatpush.msrb.mxu3 %v5749_v14  ;;  %1469 = vmatpush.msrb.mxu0 %v5760_v19 }
 0x371   :  { %1528 = vmatpush.msrb.mxu1 %v5782_v29  ;;  %1577 = vmatpush.msrb.mxu2 %v5840_v54 }
 0x372   :  { %1632 = vmatpush.msrb.mxu3 %v5757_v18  ;;  %1472 = vmatpush.msrb.mxu0 %v5775_v25 }
 0x373   :  { %1530 = vmatpush.msrb.mxu1 %v5797_v35  ;;  %1581 = vmatpush.msrb.mxu2 %v5856_v59 }
 0x374   :  { %1634 = vmatpush.msrb.mxu3 %v5768_v3  ;;  %1254 = vmatmul.f32.vlgmr.msra.gmra.mxu0 %v986_v60  ;;  %v7990_v60 = vld [vmem:[#allocation19_spill] sm:$0xff] }
 0x375   :  { %1475 = vmatpush.msrb.mxu0 %v5788_v32  ;;  %1532 = vmatpush.msrb.mxu1 %v5812_v41 }
 0x376   :  { %1585 = vmatpush.msrb.mxu2 %v5872_v9  ;;  %1636 = vmatpush.msrb.mxu3 %v5782_v29 }
 0x377   :  { %1478 = vmatpush.msrb.mxu0 %v5801_v37  ;;  %1534 = vmatpush.msrb.mxu1 %v5827_v50 }
 0x378   :  { %1589 = vmatpush.msrb.mxu2 %v5886_v13  ;;  %1638 = vmatpush.msrb.mxu3 %v5797_v35 }
 0x379   :  { %1481 = vmatpush.msrb.mxu0 %v5816_v44  ;;  %1536 = vmatpush.msrb.mxu1 %v5842_v55 }
 0x37a   :  { %1593 = vmatpush.msrb.mxu2 %v5902_v23  ;;  %1640 = vmatpush.msrb.mxu3 %v5812_v41 }
 0x37b   :  { %1484 = vmatpush.msrb.mxu0 %v5831_v51  ;;  %1538 = vmatpush.msrb.mxu1 %v5858_v61 }
 0x37c   :  { %1597 = vmatpush.msrb.mxu2 %v5919_v39  ;;  %1642 = vmatpush.msrb.mxu3 %v5827_v50 }
 0x37d   :  { %1487 = vmatpush.msrb.mxu0 %v5847_v56  ;;  %1540 = vmatpush.msrb.mxu1 %v5888_v5 }
 0x37e   :  { %1601 = vmatpush.msrb.mxu2 %v5935_v48  ;;  %1644 = vmatpush.msrb.mxu3 %v5842_v55 }
 0x37f   :  { %1490 = vmatpush.msrb.mxu0 %v5863_v62  ;;  %1542 = vmatpush.msrb.mxu1 %v5906_v28 }
 0x380   :  { %1605 = vmatpush.msrb.mxu2 %v5956_v7  ;;  %1646 = vmatpush.msrb.mxu3 %v5858_v61 }
 0x381   :  { %1493 = vmatpush.msrb.mxu0 %v5877_v10  ;;  %1544 = vmatpush.msrb.mxu1 %v5921_v0 }
 0x382   :  { %1609 = vmatpush.msrb.mxu2 %v5970_v15  ;;  %1648 = vmatpush.msrb.mxu3 %v5888_v5 }
 0x383   :  { %1496 = vmatpush.msrb.mxu0 %v7954_v34  ;;  %1546 = vmatpush.msrb.mxu1 %v5937_v49 }
 0x384   :  { %1613 = vmatpush.msrb.mxu2 %v5981_v31  ;;  %1650 = vmatpush.msrb.mxu3 %v5906_v28 }
 0x385   :  { %1730 = vmatpush.msra.mxu1 %v7957_v42  ;;  %1499 = vmatpush.msrb.mxu0 %v7955_v2  ;;  %v5386_v2 = vld [vmem:[%s7796_s0 + $0x6] sm:$0x3] }
 0x386   :  { %1617 = vmatpush.msrb.mxu2 %v7982_v57  ;;  %1652 = vmatpush.msrb.mxu3 %v5921_v0  ;;  %v1308_v57 = vpop.permute.xlu0 %1307 }
 0x387   :  { %1736 = vmatpush.msra.mxu1 %v7983_v53  ;;  %1502 = vmatpush.msrb.mxu0 %v7984_v46  ;;  %v1295_v46 = vadd.f32 %v6318_v63, %v7959_v1  ;;  %vm1309_vm7 = vcmp.eq.s32.totalorder %v1308_v57, 1  ;;  %v5391_v63 = vld [vmem:[%s7797_s1 + $0xa] sm:$0x3] }
 0x388   :  { %1654 = vmatpush.msrb.mxu3 %v5937_v49  ;;  %vm2034_vm8 = vcmp.gt.f32.partialorder %v5391_v63, 0.0  ;;  %v8005_v63 = vld [vmem:[#allocation15_spill] sm:$0xff] }
 0x389   :  { %1742 = vmatpush.msra.mxu1 %v7985_v58  ;;  %1505 = vmatpush.msrb.mxu0 %v7986_v43 }
 0x38b   :  { %1748 = vmatpush.msra.mxu1 %v7987_v45  ;;  %1508 = vmatpush.msrb.mxu0 %v7988_v20 }
 0x38d   :  { %1685 = vmatpush.msra.mxu0 %v5755_v4  ;;  %1754 = vmatpush.msra.mxu1 %v7989_v52 }
 0x38f   :  { %1687 = vmatpush.msra.mxu0 %v5753_v17  ;;  %1760 = vmatpush.msra.mxu1 %v7990_v60 }
 0x391   :  { %1689 = vmatpush.msra.mxu0 %v5747_v6  ;;  %1766 = vmatpush.msra.mxu1 %v7991_v26  ;;  %v7997_v26 = vld [vmem:[#allocation32_spill] sm:$0xff] }
 0x393   :  { %1691 = vmatpush.msra.mxu0 %v5749_v14  ;;  %1772 = vmatpush.msra.mxu1 %v7992_v21  ;;  %v7998_v21 = vld [vmem:[#allocation33_spill] sm:$0xff] }
 0x395   :  { %1693 = vmatpush.msra.mxu0 %v5757_v18  ;;  %1778 = vmatpush.msra.mxu1 %v7993_v11  ;;  %v7999_v11 = vld [vmem:[#allocation34_spill] sm:$0xff] }
 0x397   :  { %1695 = vmatpush.msra.mxu0 %v5768_v3  ;;  %1784 = vmatpush.msra.mxu1 %v7994_v40  ;;  %v8000_v40 = vld [vmem:[#allocation35_spill] sm:$0xff] }
 0x399   :  { %1697 = vmatpush.msra.mxu0 %v5782_v29  ;;  %1790 = vmatpush.msra.mxu1 %v7995_v36 }
 0x39b   :  { %1699 = vmatpush.msra.mxu0 %v5797_v35  ;;  %1796 = vmatpush.msra.mxu1 %v7996_v16 }
 0x39d   :  { %1701 = vmatpush.msra.mxu0 %v5812_v41  ;;  %1802 = vmatpush.msra.mxu1 %v7997_v26 }
 0x39f   :  { %1703 = vmatpush.msra.mxu0 %v5827_v50  ;;  %1808 = vmatpush.msra.mxu1 %v7998_v21 }
 0x3a1   :  { %1705 = vmatpush.msra.mxu0 %v5842_v55  ;;  %1814 = vmatpush.msra.mxu1 %v7999_v11 }
 0x3a3   :  { %1707 = vmatpush.msra.mxu0 %v5858_v61  ;;  %1820 = vmatpush.msra.mxu1 %v8000_v40 }
 0x3a5   :  { %1709 = vmatpush.msra.mxu0 %v5888_v5 }
 0x3a7   :  { %1711 = vmatpush.msra.mxu0 %v5906_v28 }
 0x3a9   :  { %1713 = vmatpush.msra.mxu0 %v5921_v0 }
 0x3ab   :  { %1715 = vmatpush.msra.mxu0 %v5937_v49 }
 0x3e0   :  { %v1093_v26 = vpop.f32.mrf.mxu1 }
 0x3e8   :  { %v992_v16 = vpop.f32.mrf.mxu0  ;;  %v1147_v21 = vpop.f32.mrf.mxu2 }
 0x3e9   :  { %v1094_v36 = vadd.f32 %v1093_v26, %v992_v16  ;;  %v1292_v43 = vpop.f32.mrf.mxu1  ;;  %v8001_v16 = vld [vmem:[#allocation22_spill] sm:$0xff] }
 0x3ea   :  { %v1186_v52 = vpop.f32.mrf.mxu3 }
 0x3eb   :  { %v1148_v60 = vadd.f32 %v1147_v21, %v1094_v36 }
 0x3ed   :  { %v1187_v20 = vadd.f32 %v1186_v52, %v1148_v60 }
 0x3f1   :  { %v1255_v11 = vpop.f32.mrf.mxu0 }
 0x3f2   :  { %v1256_v45 = vadd.f32 %v1255_v11, %v1187_v20 }
 0x3f4   :  { %v1293_v58 = vadd.f32 %v1292_v43, %v1256_v45  ;;  %v2035_v43 = vsel %vm2034_vm8, 1, %v7981_v8 }
 0x3f6   :  { %5467 = vlog2.f32 %v1293_v58 }
 0x3fc   :  { %v5468_v40 = vpop.eup %5467 }
 0x3fd   :  { %v1297_v53 = vmul.f32 0.6931472, %v5468_v40 }
 0x3ff   :  { %v1298_v26 = vadd.f32 %v1297_v53, %v1295_v46 }
 0x401   :  { %v1301_v21 = vadd.f32 %v5386_v2, %v1298_v26  ;;  %v5393_v2 = vld [vmem:[%s7797_s1 + $0xc] sm:$0x3]  ;;  %v8002_v26 = vld [vmem:[#allocation31_spill] sm:$0xff] }
 0x402   :  { %vm2399_vm9 = vcmp.gt.f32.partialorder %v5393_v2, 0.0  ;;  %v8007_v2 = vld [vmem:[#allocation16_spill] sm:$0xff] }
 0x403   :  { %v6428_v52 = vsel %vm1309_vm7, %v1301_v21, %v6313_v12  ;;  %v2400_v12 = vsel %vm2399_vm9, 1, %v7981_v8  ;;  %v8003_v21 = vld [vmem:[#allocation14_spill] sm:$0xff] }
 0x404   :  { %1312 = vst [vmem:[#allocation7 + $0x6] sm:$0x3] %v6428_v52  ;;  %v1313_v58 = vsel %vm217_vm0, %v6428_v52, -inf }
 0x405   :  { %1314 = vmax.xlane.f32.xlu2 %v1313_v58  ;;  %v8004_v58 = vld [vmem:[#allocation24_spill] sm:$0xff] }
 0x41d   :  { %2037 = vperm.xlu2 %5421, %v2035_v43   ;;  %v8006_v43 = vld [vmem:[#allocation26_spill] sm:$0xff] }
 0x425   :  { %2402 = vperm.xlu2 %5421, %v2400_v12   ;;  %v8008_v12 = vld [vmem:[#allocation28_spill] sm:$0xff] }
 0x478   :  { %v6441_v57 = vpop.xlane.xlu2 %1314 }
 0x479   :  { %v1316_v53 = vsub.f32 %v6428_v52, %v6441_v57 }
 0x47b   :  { %v1317_v46 = vmul.f32 1.442695, %v1316_v53  ;;  %v8009_v53 = vld [vmem:[#allocation17_spill] sm:$0xff] }
 0x47d   :  { %5469 = vpow2.f32 %v1317_v46  ;;  %v8010_v46 = vld [vmem:[#allocation19_spill] sm:$0xff] }
 0x483   :  { %v5470_v45 = vpop.eup %5469 }
 0x484   :  { %v1351_v20 = vand.u32 4294901760, %v5470_v45 }
 0x486   :  { %1457 = vmatmul.f32.vlgmr.msra.gmra.mxu3 %v1351_v20  ;;  %v1352_v60 = vsub.f32 %v5470_v45, %v1351_v20  ;;  %v8011_v45 = vld [vmem:[#allocation21_spill] sm:$0xff] }
 0x487   :  { %1881 = vmatpush.msra.mxu3 %v5755_v4 }
 0x488   :  { %1511 = vmatmul.f32.vlgmr.msrb.gmra.mxu0 %v1352_v60  ;;  %v1353_v11 = vand.u32 4294901760, %v1352_v60 }
 0x489   :  { %1883 = vmatpush.msra.mxu3 %v5753_v17  ;;  %1922 = vmatpush.msrb.mxu0 %v5785_v30 }
 0x48a   :  { %1550 = vmatmul.f32.vlgmr.msrb.gmra.mxu1 %v1353_v11  ;;  %v1354_v40 = vsub.f32 %v1352_v60, %v1353_v11  ;;  %v8013_v60 = vld [vmem:[#allocation25_spill] sm:$0xff]  ;;  %v8014_v11 = vld [vmem:[#allocation27_spill] sm:$0xff] }
 0x48b   :  { %1885 = vmatpush.msra.mxu3 %v5747_v6  ;;  %1926 = vmatpush.msrb.mxu0 %v5780_v27 }
 0x48c   :  { %1989 = vmatpush.msrb.mxu1 %v5755_v4  ;;  %v1355_v36 = vand.u32 4294901760, %v1354_v40  ;;  %v8015_v40 = vld [vmem:[#allocation29_spill] sm:$0xff] }
 0x48d   :  { %1887 = vmatpush.msra.mxu3 %v5749_v14  ;;  %1930 = vmatpush.msrb.mxu0 %v5792_v33 }
 0x48e   :  { %1991 = vmatpush.msrb.mxu1 %v5753_v17  ;;  %1356 = vmatmul.f32.vlgmr.msra.gmra.mxu2 %v1355_v36  ;;  %v8016_v36 = vld [vmem:[#allocation30_spill] sm:$0xff] }
 0x48f   :  { %1656 = vmatmul.f32.vlgmr.msrb.gmra.mxu3 %v1351_v20  ;;  %1828 = vmatpush.msra.mxu2 %v5771_v24 }
 0x490   :  { %1889 = vmatpush.msra.mxu3 %v5757_v18  ;;  %1934 = vmatpush.msrb.mxu0 %v5804_v38 }
 0x491   :  { %1993 = vmatpush.msrb.mxu1 %v5747_v6  ;;  %1831 = vmatpush.msra.mxu2 %v5765_v22 }
 0x492   :  { %1891 = vmatpush.msra.mxu3 %v5768_v3  ;;  %1938 = vmatpush.msrb.mxu0 %v5825_v47 }
 0x493   :  { %1995 = vmatpush.msrb.mxu1 %v5749_v14  ;;  %1834 = vmatpush.msra.mxu2 %v5760_v19 }
 0x494   :  { %1893 = vmatpush.msra.mxu3 %v5782_v29  ;;  %1942 = vmatpush.msrb.mxu0 %v5840_v54 }
 0x495   :  { %1997 = vmatpush.msrb.mxu1 %v5757_v18  ;;  %1837 = vmatpush.msra.mxu2 %v5775_v25 }
 0x496   :  { %1895 = vmatpush.msra.mxu3 %v5797_v35  ;;  %1946 = vmatpush.msrb.mxu0 %v5856_v59 }
 0x497   :  { %1999 = vmatpush.msrb.mxu1 %v5768_v3  ;;  %1619 = vmatmul.f32.vlgmr.msrb.gmra.mxu2 %v1351_v20  ;;  %v8012_v20 = vld [vmem:[#allocation23_spill] sm:$0xff] }
 0x498   :  { %1840 = vmatpush.msra.mxu2 %v5788_v32  ;;  %1897 = vmatpush.msra.mxu3 %v5812_v41 }
 0x499   :  { %1950 = vmatpush.msrb.mxu0 %v5872_v9  ;;  %2001 = vmatpush.msrb.mxu1 %v5782_v29 }
 0x49a   :  { %1843 = vmatpush.msra.mxu2 %v5801_v37  ;;  %1899 = vmatpush.msra.mxu3 %v5827_v50 }
 0x49b   :  { %1954 = vmatpush.msrb.mxu0 %v5886_v13  ;;  %2003 = vmatpush.msrb.mxu1 %v5797_v35 }
 0x49c   :  { %1846 = vmatpush.msra.mxu2 %v5816_v44  ;;  %1901 = vmatpush.msra.mxu3 %v5842_v55 }
 0x49d   :  { %1958 = vmatpush.msrb.mxu0 %v5902_v23  ;;  %2005 = vmatpush.msrb.mxu1 %v5812_v41 }
 0x49e   :  { %1849 = vmatpush.msra.mxu2 %v5831_v51  ;;  %1903 = vmatpush.msra.mxu3 %v5858_v61 }
 0x49f   :  { %1962 = vmatpush.msrb.mxu0 %v5919_v39  ;;  %2007 = vmatpush.msrb.mxu1 %v5827_v50 }
 0x4a0   :  { %1852 = vmatpush.msra.mxu2 %v5847_v56  ;;  %1905 = vmatpush.msra.mxu3 %v5888_v5 }
 0x4a1   :  { %1966 = vmatpush.msrb.mxu0 %v5935_v48  ;;  %2009 = vmatpush.msrb.mxu1 %v5842_v55 }
 0x4a2   :  { %1855 = vmatpush.msra.mxu2 %v5863_v62  ;;  %1907 = vmatpush.msra.mxu3 %v5906_v28 }
 0x4a3   :  { %1970 = vmatpush.msrb.mxu0 %v5956_v7  ;;  %2011 = vmatpush.msrb.mxu1 %v5858_v61 }
 0x4a4   :  { %1858 = vmatpush.msra.mxu2 %v5877_v10  ;;  %1909 = vmatpush.msra.mxu3 %v5921_v0 }
 0x4a5   :  { %1974 = vmatpush.msrb.mxu0 %v5970_v15  ;;  %2013 = vmatpush.msrb.mxu1 %v5888_v5 }
 0x4a6   :  { %1861 = vmatpush.msra.mxu2 %v7954_v34  ;;  %1911 = vmatpush.msra.mxu3 %v5937_v49 }
 0x4a7   :  { %1978 = vmatpush.msrb.mxu0 %v5981_v31  ;;  %2015 = vmatpush.msrb.mxu1 %v5906_v28 }
 0x4a8   :  { %2095 = vmatpush.msrb.mxu3 %v7957_v42  ;;  %1864 = vmatpush.msra.mxu2 %v8001_v16  ;;  %v1673_v16 = vpop.permute.xlu1 %1672 }
 0x4a9   :  { %1982 = vmatpush.msrb.mxu0 %v8002_v26  ;;  %2017 = vmatpush.msrb.mxu1 %v5921_v0  ;;  %v5388_v26 = vld [vmem:[%s7796_s0 + $0x8] sm:$0x3]  ;;  %vm1674_vm10 = vcmp.eq.s32.totalorder %v1673_v16, 1 }
 0x4aa   :  { %2101 = vmatpush.msrb.mxu3 %v8003_v21  ;;  %1867 = vmatpush.msra.mxu2 %v8004_v58  ;;  %v1660_v58 = vadd.f32 %v6441_v57, %v7959_v1  ;;  %v5396_v57 = vld [vmem:[%s7796_s0 + $0xe] sm:$0x3] }
 0x4ab   :  { %2019 = vmatpush.msrb.mxu1 %v5937_v49 }
 0x4ac   :  { %2107 = vmatpush.msrb.mxu3 %v8005_v63  ;;  %1870 = vmatpush.msra.mxu2 %v8006_v43 }
 0x4ae   :  { %2113 = vmatpush.msrb.mxu3 %v8007_v2  ;;  %1873 = vmatpush.msra.mxu2 %v8008_v12 }
 0x4b0   :  { %2050 = vmatpush.msrb.mxu2 %v5755_v4  ;;  %2119 = vmatpush.msrb.mxu3 %v8009_v53 }
 0x4b2   :  { %2052 = vmatpush.msrb.mxu2 %v5753_v17  ;;  %2125 = vmatpush.msrb.mxu3 %v8010_v46 }
 0x4b4   :  { %2054 = vmatpush.msrb.mxu2 %v5747_v6  ;;  %2131 = vmatpush.msrb.mxu3 %v8011_v45  ;;  %v8017_v45 = vld [vmem:[#allocation32_spill] sm:$0xff] }
 0x4b6   :  { %2056 = vmatpush.msrb.mxu2 %v5749_v14  ;;  %2137 = vmatpush.msrb.mxu3 %v8012_v20  ;;  %v8018_v20 = vld [vmem:[#allocation33_spill] sm:$0xff] }
 0x4b8   :  { %2058 = vmatpush.msrb.mxu2 %v5757_v18  ;;  %2143 = vmatpush.msrb.mxu3 %v8013_v60  ;;  %v8019_v60 = vld [vmem:[#allocation34_spill] sm:$0xff] }
 0x4ba   :  { %2060 = vmatpush.msrb.mxu2 %v5768_v3  ;;  %2149 = vmatpush.msrb.mxu3 %v8014_v11  ;;  %v8020_v11 = vld [vmem:[#allocation35_spill] sm:$0xff] }
 0x4bc   :  { %2062 = vmatpush.msrb.mxu2 %v5782_v29  ;;  %2155 = vmatpush.msrb.mxu3 %v8015_v40 }
 0x4be   :  { %2064 = vmatpush.msrb.mxu2 %v5797_v35  ;;  %2161 = vmatpush.msrb.mxu3 %v8016_v36 }
 0x4c0   :  { %2066 = vmatpush.msrb.mxu2 %v5812_v41  ;;  %2167 = vmatpush.msrb.mxu3 %v8017_v45 }
 0x4c2   :  { %2068 = vmatpush.msrb.mxu2 %v5827_v50  ;;  %2173 = vmatpush.msrb.mxu3 %v8018_v20 }
 0x4c4   :  { %2070 = vmatpush.msrb.mxu2 %v5842_v55  ;;  %2179 = vmatpush.msrb.mxu3 %v8019_v60 }
 0x4c6   :  { %2072 = vmatpush.msrb.mxu2 %v5858_v61  ;;  %2185 = vmatpush.msrb.mxu3 %v8020_v11 }
 0x4c8   :  { %2074 = vmatpush.msrb.mxu2 %v5888_v5 }
 0x4ca   :  { %2076 = vmatpush.msrb.mxu2 %v5906_v28 }
 0x4cc   :  { %2078 = vmatpush.msrb.mxu2 %v5921_v0 }
 0x4ce   :  { %2080 = vmatpush.msrb.mxu2 %v5937_v49 }
 0x505   :  { %v1512_v20 = vpop.f32.mrf.mxu0 }
 0x507   :  { %v1551_v53 = vpop.f32.mrf.mxu1 }
 0x509   :  { %v1458_v45 = vpop.f32.mrf.mxu3 }
 0x511   :  { %v1357_v36 = vpop.f32.mrf.mxu2 }
 0x512   :  { %v1459_v40 = vadd.f32 %v1458_v45, %v1357_v36  ;;  %v1657_v43 = vpop.f32.mrf.mxu3 }
 0x514   :  { %v1513_v46 = vadd.f32 %v1512_v20, %v1459_v40 }
 0x516   :  { %v1552_v12 = vadd.f32 %v1551_v53, %v1513_v46 }
 0x51a   :  { %v1620_v60 = vpop.f32.mrf.mxu2 }
 0x51b   :  { %v1621_v2 = vadd.f32 %v1620_v60, %v1552_v12  ;;  %v5424_v12 = vld [vmem:[%s7799_s3] ss:$0 sm:$0xff] }
 0x51d   :  { %v1658_v63 = vadd.f32 %v1657_v43, %v1621_v2 }
 0x51f   :  { %5471 = vlog2.f32 %v1658_v63 }
 0x525   :  { %v5472_v11 = vpop.eup %5471 }
 0x526   :  { %v1662_v21 = vmul.f32 0.6931472, %v5472_v11 }
 0x528   :  { %v1663_v45 = vadd.f32 %v1662_v21, %v1660_v58  ;;  %v6558_v21 = vadd.f32 %v5424_v12, %v5396_v57  ;;  %v8023_v12 = vld [vmem:[#allocation31_spill] sm:$0xff]  ;;  %v8024_v57 = vld [vmem:[#allocation14_spill] sm:$0xff] }
 0x52a   :  { %v1666_v36 = vadd.f32 %v5388_v26, %v1663_v45  ;;  %8021 = vst [vmem:[#allocation18_spill] sm:$0xff] %v6558_v21  ;;  %v2795_v16 = vsel %vm217_vm0, %v6558_v21, -inf }
 0x52c   :  { %v6550_v43 = vsel %vm1674_vm10, %v1666_v36, %v6428_v52  ;;  %v5397_v52 = vld [vmem:[%s7797_s1 + $0xe] sm:$0x3] }
 0x52d   :  { %v1678_v63 = vsel %vm217_vm0, %v6550_v43, -inf  ;;  %1677 = vst [vmem:[#allocation7 + $0x8] sm:$0x3] %v6550_v43  ;;  %vm3147_vm11 = vcmp.gt.f32.partialorder %v5397_v52, 0.0  ;;  %v8022_v36 = vld [vmem:[#allocation22_spill] sm:$0xff] }
 0x52e   :  { %1679 = vmax.xlane.f32.xlu0 %v1678_v63  ;;  %v3148_v26 = vsel %vm3147_vm11, 1, %v7981_v8  ;;  %v8025_v63 = vld [vmem:[#allocation24_spill] sm:$0xff]  ;;  %v8027_v52 = vld [vmem:[#allocation26_spill] sm:$0xff] }
 0x536   :  { %2796 = vmax.xlane.f32.xlu0 %v2795_v16  ;;  %v8026_v16 = vld [vmem:[#allocation15_spill] sm:$0xff] }
 0x54a   :  { %3150 = vperm.xlu0 %5422, %v3148_v26   ;;  %v8028_v26 = vld [vmem:[#allocation16_spill] sm:$0xff] }
 0x5a1   :  { %v6566_v58 = vpop.xlane.xlu0 %1679 }
 0x5a2   :  { %v1681_v2 = vsub.f32 %v6550_v43, %v6566_v58  ;;  %v2025_v8 = vadd.f32 %v6566_v58, %v7959_v1 }
 0x5a4   :  { %v1682_v53 = vmul.f32 1.442695, %v1681_v2  ;;  %v8029_v2 = vld [vmem:[#allocation28_spill] sm:$0xff] }
 0x5a6   :  { %5473 = vpow2.f32 %v1682_v53  ;;  %v8031_v53 = vld [vmem:[#allocation19_spill] sm:$0xff] }
 0x5ac   :  { %v5474_v46 = vpop.eup %5473 }
 0x5ad   :  { %v1716_v20 = vand.u32 4294901760, %v5474_v46 }
 0x5af   :  { %1822 = vmatmul.f32.vlgmr.msra.gmra.mxu1 %v1716_v20  ;;  %v1717_v60 = vsub.f32 %v5474_v46, %v1716_v20  ;;  %v8032_v46 = vld [vmem:[#allocation21_spill] sm:$0xff] }
 0x5b0   :  { %2246 = vmatpush.msra.mxu1 %v5755_v4 }
 0x5b1   :  { %1876 = vmatmul.f32.vlgmr.msra.gmra.mxu2 %v1717_v60  ;;  %v1718_v11 = vand.u32 4294901760, %v1717_v60 }
 0x5b2   :  { %2248 = vmatpush.msra.mxu1 %v5753_v17  ;;  %2287 = vmatpush.msra.mxu2 %v5785_v30 }
 0x5b3   :  { %1915 = vmatmul.f32.vlgmr.msra.gmra.mxu3 %v1718_v11  ;;  %v1719_v40 = vsub.f32 %v1717_v60, %v1718_v11  ;;  %v8034_v60 = vld [vmem:[#allocation25_spill] sm:$0xff]  ;;  %v8035_v11 = vld [vmem:[#allocation27_spill] sm:$0xff] }
 0x5b4   :  { %2250 = vmatpush.msra.mxu1 %v5747_v6  ;;  %2291 = vmatpush.msra.mxu2 %v5780_v27 }
 0x5b5   :  { %2354 = vmatpush.msra.mxu3 %v5755_v4  ;;  %v1720_v45 = vand.u32 4294901760, %v1719_v40  ;;  %v8036_v40 = vld [vmem:[#allocation29_spill] sm:$0xff] }
 0x5b6   :  { %2252 = vmatpush.msra.mxu1 %v5749_v14  ;;  %2295 = vmatpush.msra.mxu2 %v5792_v33 }
 0x5b7   :  { %2356 = vmatpush.msra.mxu3 %v5753_v17  ;;  %1721 = vmatmul.f32.vlgmr.msra.gmra.mxu0 %v1720_v45  ;;  %v8037_v45 = vld [vmem:[#allocation30_spill] sm:$0xff] }
 0x5b8   :  { %2021 = vmatmul.f32.vlgmr.msrb.gmra.mxu1 %v1716_v20  ;;  %2193 = vmatpush.msra.mxu0 %v5771_v24 }
 0x5b9   :  { %2254 = vmatpush.msra.mxu1 %v5757_v18  ;;  %2299 = vmatpush.msra.mxu2 %v5804_v38 }
 0x5ba   :  { %2358 = vmatpush.msra.mxu3 %v5747_v6  ;;  %2196 = vmatpush.msra.mxu0 %v5765_v22 }
 0x5bb   :  { %2256 = vmatpush.msra.mxu1 %v5768_v3  ;;  %2303 = vmatpush.msra.mxu2 %v5825_v47 }
 0x5bc   :  { %2360 = vmatpush.msra.mxu3 %v5749_v14  ;;  %2199 = vmatpush.msra.mxu0 %v5760_v19 }
 0x5bd   :  { %2258 = vmatpush.msra.mxu1 %v5782_v29  ;;  %2307 = vmatpush.msra.mxu2 %v5840_v54 }
 0x5be   :  { %2362 = vmatpush.msra.mxu3 %v5757_v18  ;;  %2202 = vmatpush.msra.mxu0 %v5775_v25 }
 0x5bf   :  { %2260 = vmatpush.msra.mxu1 %v5797_v35  ;;  %2311 = vmatpush.msra.mxu2 %v5856_v59 }
 0x5c0   :  { %2364 = vmatpush.msra.mxu3 %v5768_v3  ;;  %1984 = vmatmul.f32.vlgmr.msrb.gmra.mxu0 %v1716_v20  ;;  %v8033_v20 = vld [vmem:[#allocation23_spill] sm:$0xff] }
 0x5c1   :  { %2205 = vmatpush.msra.mxu0 %v5788_v32  ;;  %2262 = vmatpush.msra.mxu1 %v5812_v41 }
 0x5c2   :  { %2315 = vmatpush.msra.mxu2 %v5872_v9  ;;  %2366 = vmatpush.msra.mxu3 %v5782_v29 }
 0x5c3   :  { %2208 = vmatpush.msra.mxu0 %v5801_v37  ;;  %2264 = vmatpush.msra.mxu1 %v5827_v50 }
 0x5c4   :  { %2319 = vmatpush.msra.mxu2 %v5886_v13  ;;  %2368 = vmatpush.msra.mxu3 %v5797_v35 }
 0x5c5   :  { %2211 = vmatpush.msra.mxu0 %v5816_v44  ;;  %2266 = vmatpush.msra.mxu1 %v5842_v55 }
 0x5c6   :  { %2323 = vmatpush.msra.mxu2 %v5902_v23  ;;  %2370 = vmatpush.msra.mxu3 %v5812_v41 }
 0x5c7   :  { %2214 = vmatpush.msra.mxu0 %v5831_v51  ;;  %2268 = vmatpush.msra.mxu1 %v5858_v61 }
 0x5c8   :  { %2327 = vmatpush.msra.mxu2 %v5919_v39  ;;  %2372 = vmatpush.msra.mxu3 %v5827_v50 }
 0x5c9   :  { %2217 = vmatpush.msra.mxu0 %v5847_v56  ;;  %2270 = vmatpush.msra.mxu1 %v5888_v5 }
 0x5ca   :  { %2331 = vmatpush.msra.mxu2 %v5935_v48  ;;  %2374 = vmatpush.msra.mxu3 %v5842_v55 }
 0x5cb   :  { %2220 = vmatpush.msra.mxu0 %v5863_v62  ;;  %2272 = vmatpush.msra.mxu1 %v5906_v28 }
 0x5cc   :  { %2335 = vmatpush.msra.mxu2 %v5956_v7  ;;  %2376 = vmatpush.msra.mxu3 %v5858_v61 }
 0x5cd   :  { %2223 = vmatpush.msra.mxu0 %v5877_v10  ;;  %2274 = vmatpush.msra.mxu1 %v5921_v0 }
 0x5ce   :  { %2339 = vmatpush.msra.mxu2 %v5970_v15  ;;  %2378 = vmatpush.msra.mxu3 %v5888_v5 }
 0x5cf   :  { %2226 = vmatpush.msra.mxu0 %v7954_v34  ;;  %2276 = vmatpush.msra.mxu1 %v5937_v49 }
 0x5d0   :  { %2343 = vmatpush.msra.mxu2 %v5981_v31  ;;  %2380 = vmatpush.msra.mxu3 %v5906_v28 }
 0x5d1   :  { %2460 = vmatpush.msrb.mxu1 %v7957_v42  ;;  %2229 = vmatpush.msra.mxu0 %v8022_v36  ;;  %v8030_v42 = vld [vmem:[#allocation17_spill] sm:$0xff] }
 0x5d2   :  { %2347 = vmatpush.msra.mxu2 %v8023_v12  ;;  %2382 = vmatpush.msra.mxu3 %v5921_v0 }
 0x5d3   :  { %2466 = vmatpush.msrb.mxu1 %v8024_v57  ;;  %2232 = vmatpush.msra.mxu0 %v8025_v63  ;;  %v8038_v57 = vld [vmem:[#allocation32_spill] sm:$0xff]  ;;  %v2038_v63 = vpop.permute.xlu2 %2037 }
 0x5d4   :  { %2384 = vmatpush.msra.mxu3 %v5937_v49  ;;  %vm2039_vm12 = vcmp.eq.s32.totalorder %v2038_v63, 1  ;;  %v88_v63 = vld [vmem:[#allocation5 + $0x70] sm:$0xff] }
 0x5d5   :  { %2472 = vmatpush.msrb.mxu1 %v8026_v16  ;;  %2235 = vmatpush.msra.mxu0 %v8027_v52  ;;  %v8039_v16 = vld [vmem:[#allocation33_spill] sm:$0xff]  ;;  %v5390_v52 = vld [vmem:[%s7796_s0 + $0xa] sm:$0x3] }
 0x5d7   :  { %2478 = vmatpush.msrb.mxu1 %v8028_v26  ;;  %2238 = vmatpush.msra.mxu0 %v8029_v2  ;;  %v8040_v26 = vld [vmem:[#allocation34_spill] sm:$0xff] }
 0x5d9   :  { %2415 = vmatpush.msrb.mxu0 %v5755_v4  ;;  %2484 = vmatpush.msrb.mxu1 %v8030_v42  ;;  %v8041_v42 = vld [vmem:[#allocation35_spill] sm:$0xff] }
 0x5db   :  { %2417 = vmatpush.msrb.mxu0 %v5753_v17  ;;  %2490 = vmatpush.msrb.mxu1 %v8031_v53 }
 0x5dd   :  { %2419 = vmatpush.msrb.mxu0 %v5747_v6  ;;  %2496 = vmatpush.msrb.mxu1 %v8032_v46 }
 0x5df   :  { %2421 = vmatpush.msrb.mxu0 %v5749_v14  ;;  %2502 = vmatpush.msrb.mxu1 %v8033_v20 }
 0x5e1   :  { %2423 = vmatpush.msrb.mxu0 %v5757_v18  ;;  %2508 = vmatpush.msrb.mxu1 %v8034_v60 }
 0x5e3   :  { %2425 = vmatpush.msrb.mxu0 %v5768_v3  ;;  %2514 = vmatpush.msrb.mxu1 %v8035_v11 }
 0x5e5   :  { %2427 = vmatpush.msrb.mxu0 %v5782_v29  ;;  %2520 = vmatpush.msrb.mxu1 %v8036_v40 }
 0x5e7   :  { %2429 = vmatpush.msrb.mxu0 %v5797_v35  ;;  %2526 = vmatpush.msrb.mxu1 %v8037_v45 }
 0x5e9   :  { %2431 = vmatpush.msrb.mxu0 %v5812_v41  ;;  %2532 = vmatpush.msrb.mxu1 %v8038_v57 }
 0x5eb   :  { %2433 = vmatpush.msrb.mxu0 %v5827_v50  ;;  %2538 = vmatpush.msrb.mxu1 %v8039_v16 }
 0x5ed   :  { %2435 = vmatpush.msrb.mxu0 %v5842_v55  ;;  %2544 = vmatpush.msrb.mxu1 %v8040_v26 }
 0x5ef   :  { %2437 = vmatpush.msrb.mxu0 %v5858_v61  ;;  %2550 = vmatpush.msrb.mxu1 %v8041_v42 }
 0x5f1   :  { %2439 = vmatpush.msrb.mxu0 %v5888_v5 }
 0x5f3   :  { %2441 = vmatpush.msrb.mxu0 %v5906_v28 }
 0x5f5   :  { %2443 = vmatpush.msrb.mxu0 %v5921_v0 }
 0x5f7   :  { %2445 = vmatpush.msrb.mxu0 %v5937_v49 }
 0x62c   :  { %v1823_v53 = vpop.f32.mrf.mxu1 }
 0x634   :  { %v1722_v46 = vpop.f32.mrf.mxu0  ;;  %v1877_v60 = vpop.f32.mrf.mxu2 }
 0x635   :  { %v1824_v20 = vadd.f32 %v1823_v53, %v1722_v46  ;;  %v2022_v26 = vpop.f32.mrf.mxu1 }
 0x636   :  { %v1916_v40 = vpop.f32.mrf.mxu3 }
 0x637   :  { %v1878_v11 = vadd.f32 %v1877_v60, %v1824_v20 }
 0x639   :  { %v1917_v45 = vadd.f32 %v1916_v40, %v1878_v11  ;;  %v89_v40 = vld [vmem:[#allocation5 + $0x78] sm:$0xff] }
 0x63d   :  { %v1985_v57 = vpop.f32.mrf.mxu0 }
 0x63e   :  { %v1986_v16 = vadd.f32 %v1985_v57, %v1917_v45  ;;  %v87_v45 = vld [vmem:[#allocation5 + $0x68] sm:$0xff]  ;;  %v177_v57 = vsub.f32 %v88_v63, %v7959_v1 }
 0x640   :  { %v2023_v21 = vadd.f32 %v2022_v26, %v1986_v16  ;;  %v86_v26 = vld [vmem:[#allocation5 + $0x60] sm:$0xff] }
 0x642   :  { %5475 = vlog2.f32 %v2023_v21 }
 0x648   :  { %v5476_v42 = vpop.eup %5475 }
 0x649   :  { %v2027_v2 = vmul.f32 0.6931472, %v5476_v42 }
 0x64b   :  { %v2028_v53 = vadd.f32 %v2027_v2, %v2025_v8 }
 0x64d   :  { %v2031_v46 = vadd.f32 %v5390_v52, %v2028_v53  ;;  %v176_v53 = vsub.f32 %v87_v45, %v7959_v1 }
 0x64f   :  { %v6672_v20 = vsel %vm2039_vm12, %v2031_v46, %v6550_v43  ;;  %v178_v43 = vsub.f32 %v89_v40, %v7959_v1 }
 0x650   :  { %v2043_v60 = vsel %vm217_vm0, %v6672_v20, -inf  ;;  %2042 = vst [vmem:[#allocation7 + $0xa] sm:$0x3] %v6672_v20 }
 0x651   :  { %2044 = vmax.xlane.f32.xlu1 %v2043_v60  ;;  %v209_v42 = vmul.f32 1.442695, %v178_v43  ;;  %v85_v60 = vld [vmem:[#allocation5 + $0x58] sm:$0xff]  ;;  %v83_v43 = vld [vmem:[#allocation5 + $0x48] sm:$0xff] }
 0x652   :  { %v174_v63 = vsub.f32 %v85_v60, %v7959_v1  ;;  %v77_v60 = vld [vmem:[#allocation5 + $0x18] sm:$0xff] }
 0x6c4   :  { %v6677_v21 = vpop.xlane.xlu1 %2044 }
 0x6c5   :  { %v2046_v58 = vsub.f32 %v6672_v20, %v6677_v21 }
 0x6c7   :  { %v2047_v11 = vmul.f32 1.442695, %v2046_v58  ;;  %v207_v58 = vmul.f32 1.442695, %v177_v57 }
 0x6c9   :  { %5477 = vpow2.f32 %v2047_v11  ;;  %v175_v11 = vsub.f32 %v86_v26, %v7959_v1  ;;  %v79_v26 = vld [vmem:[#allocation5 + $0x28] sm:$0xff] }
 0x6ca   :  { %5479 = vpow2.f32 %v209_v42 }
 0x6cb   :  { %5481 = vpow2.f32 %v207_v58 }
 0x6cf   :  { %v5478_v8 = vpop.eup %5477 }
 0x6d0   :  { %v6681_v52 = vand.u32 4294901760, %v5478_v8  ;;  %v5480_v45 = vpop.eup %5479 }
 0x6d2   :  { %2187 = vmatmul.f32.vlgmr.msrb.gmra.mxu3 %v6681_v52  ;;  %v2082_v2 = vsub.f32 %v5478_v8, %v6681_v52  ;;  %v84_v8 = vld [vmem:[#allocation5 + $0x50] sm:$0xff] }
 0x6d3   :  { %2611 = vmatpush.msrb.mxu3 %v5755_v4 }
 0x6d4   :  { %2241 = vmatmul.f32.vlgmr.msra.gmra.mxu0 %v2082_v2  ;;  %v2083_v16 = vand.u32 4294901760, %v2082_v2 }
 0x6d5   :  { %2613 = vmatpush.msrb.mxu3 %v5753_v17  ;;  %2652 = vmatpush.msra.mxu0 %v5785_v30  ;;  %v205_v30 = vmul.f32 1.442695, %v176_v53 }
 0x6d6   :  { %2280 = vmatmul.f32.vlgmr.msra.gmra.mxu1 %v2083_v16  ;;  %v2084_v46 = vsub.f32 %v2082_v2, %v2083_v16  ;;  %v82_v2 = vld [vmem:[#allocation5 + $0x40] sm:$0xff]  ;;  %v80_v16 = vld [vmem:[#allocation5 + $0x30] sm:$0xff] }
 0x6d7   :  { %2615 = vmatpush.msrb.mxu3 %v5747_v6  ;;  %2656 = vmatpush.msra.mxu0 %v5780_v27  ;;  %v173_v27 = vsub.f32 %v84_v8, %v7959_v1  ;;  %5483 = vpow2.f32 %v205_v30  ;;  %v171_v57 = vsub.f32 %v82_v2, %v7959_v1 }
 0x6d8   :  { %2719 = vmatpush.msra.mxu1 %v5755_v4  ;;  %v2085_v40 = vand.u32 4294901760, %v2084_v46  ;;  %v203_v4 = vmul.f32 1.442695, %v175_v11  ;;  %v76_v11 = vld [vmem:[#allocation5 + $0x10] sm:$0xff] }
 0x6d9   :  { %2617 = vmatpush.msrb.mxu3 %v5749_v14  ;;  %2660 = vmatpush.msra.mxu0 %v5792_v33  ;;  %v172_v33 = vsub.f32 %v83_v43, %v7959_v1  ;;  %v165_v43 = vsub.f32 %v76_v11, %v7959_v1 }
 0x6da   :  { %2721 = vmatpush.msra.mxu1 %v5753_v17  ;;  %2086 = vmatmul.f32.vlgmr.msrb.gmra.mxu2 %v2085_v40  ;;  %v201_v17 = vmul.f32 1.442695, %v174_v63  ;;  %5485 = vpow2.f32 %v203_v4 }
 0x6db   :  { %2386 = vmatmul.f32.vlgmr.msra.gmra.mxu3 %v6681_v52  ;;  %2558 = vmatpush.msrb.mxu2 %v5771_v24  ;;  %v81_v24 = vld [vmem:[#allocation5 + $0x38] sm:$0xff] }
 0x6dc   :  { %2619 = vmatpush.msrb.mxu3 %v5757_v18  ;;  %2664 = vmatpush.msra.mxu0 %v5804_v38  ;;  %v199_v38 = vmul.f32 1.442695, %v173_v27  ;;  %5487 = vpow2.f32 %v201_v17 }
 0x6dd   :  { %2723 = vmatpush.msra.mxu1 %v5747_v6  ;;  %2561 = vmatpush.msrb.mxu2 %v5765_v22  ;;  %v197_v6 = vmul.f32 1.442695, %v172_v33  ;;  %v5482_v22 = vpop.eup %5481  ;;  %v74_v33 = vld [vmem:[#allocation5] sm:$0xff] }
 0x6de   :  { %2621 = vmatpush.msrb.mxu3 %v5768_v3  ;;  %2668 = vmatpush.msra.mxu0 %v5825_v47  ;;  %v169_v47 = vsub.f32 %v80_v16, %v7959_v1  ;;  %v5484_v42 = vpop.eup %5483  ;;  %5489 = vpow2.f32 %v199_v38 }
 0x6df   :  { %2725 = vmatpush.msra.mxu1 %v5749_v14  ;;  %2564 = vmatpush.msrb.mxu2 %v5760_v19  ;;  %v170_v14 = vsub.f32 %v81_v24, %v7959_v1  ;;  %v6719_v19 = vand.u32 4294901760, %v5480_v45  ;;  %5491 = vpow2.f32 %v197_v6 }
 0x6e0   :  { %2623 = vmatpush.msrb.mxu3 %v5782_v29  ;;  %2672 = vmatpush.msra.mxu0 %v5840_v54  ;;  %v78_v54 = vld [vmem:[#allocation5 + $0x20] sm:$0xff]  ;;  %v191_v46 = vmul.f32 1.442695, %v169_v47 }
 0x6e1   :  { %2727 = vmatpush.msra.mxu1 %v5757_v18  ;;  %2567 = vmatpush.msrb.mxu2 %v5775_v25  ;;  %v195_v18 = vmul.f32 1.442695, %v171_v57  ;;  %v6726_v25 = vand.u32 4294901760, %v5482_v22  ;;  %v193_v53 = vmul.f32 1.442695, %v170_v14 }
 0x6e2   :  { %2625 = vmatpush.msrb.mxu3 %v5797_v35  ;;  %2676 = vmatpush.msra.mxu0 %v5856_v59  ;;  %v5486_v59 = vpop.eup %5485 }
 0x6e3   :  { %2729 = vmatpush.msra.mxu1 %v5768_v3  ;;  %2349 = vmatmul.f32.vlgmr.msra.gmra.mxu2 %v6681_v52  ;;  %v168_v3 = vsub.f32 %v79_v26, %v7959_v1  ;;  %v6736_v52 = vand.u32 4294901760, %v5484_v42  ;;  %v5488_v58 = vpop.eup %5487  ;;  %5493 = vpow2.f32 %v195_v18 }
 0x6e4   :  { %2570 = vmatpush.msrb.mxu2 %v5788_v32  ;;  %2627 = vmatpush.msrb.mxu3 %v5812_v41  ;;  %v6734_v32 = vsub.f32 %v5480_v45, %v6719_v19  ;;  %v5490_v40 = vpop.eup %5489  ;;  %5495 = vpow2.f32 %v193_v53  ;;  %v6759_v63 = vand.u32 4294901760, %v5488_v58  ;;  %v183_v45 = vmul.f32 1.442695, %v165_v43 }
 0x6e5   :  { %2680 = vmatpush.msra.mxu0 %v5872_v9  ;;  %2731 = vmatpush.msra.mxu1 %v5782_v29  ;;  %v167_v29 = vsub.f32 %v78_v54, %v7959_v1  ;;  %v6746_v9 = vand.u32 4294901760, %v5486_v59  ;;  %v5492_v8 = vpop.eup %5491  ;;  %v6757_v30 = vsub.f32 %v5484_v42, %v6736_v52  ;;  %5497 = vpow2.f32 %v191_v46 }
 0x6e6   :  { %2573 = vmatpush.msrb.mxu2 %v5801_v37  ;;  %2629 = vmatpush.msrb.mxu3 %v5827_v50  ;;  %v6744_v37 = vsub.f32 %v5482_v22, %v6726_v25  ;;  %v6772_v27 = vand.u32 4294901760, %v5490_v40 }
 0x6e7   :  { %2684 = vmatpush.msra.mxu0 %v5886_v13  ;;  %2733 = vmatpush.msra.mxu1 %v5797_v35  ;;  %v189_v35 = vmul.f32 1.442695, %v168_v3  ;;  %v166_v13 = vsub.f32 %v77_v60, %v7959_v1  ;;  %v6770_v4 = vsub.f32 %v5486_v59, %v6746_v9  ;;  %v6784_v24 = vand.u32 4294901760, %v6757_v30 }
 0x6e8   :  { %2576 = vmatpush.msrb.mxu2 %v5816_v44  ;;  %2631 = vmatpush.msrb.mxu3 %v5842_v55  ;;  %v6754_v44 = vand.u32 4294901760, %v6734_v32  ;;  %v6800_v6 = vsub.f32 %v5490_v40, %v6772_v27 }
 0x6e9   :  { %2688 = vmatpush.msra.mxu0 %v5902_v23  ;;  %2735 = vmatpush.msra.mxu1 %v5812_v41  ;;  %v75_v23 = vld [vmem:[#allocation5 + $0x8] sm:$0xff]  ;;  %v187_v41 = vmul.f32 1.442695, %v167_v29  ;;  %v5494_v2 = vpop.eup %5493  ;;  %5499 = vpow2.f32 %v189_v35  ;;  %v6797_v16 = vand.u32 4294901760, %v6770_v4  ;;  %v2857_v14 = vsub.f32 %v6757_v30, %v6784_v24 }
 0x6ea   :  { %2579 = vmatpush.msrb.mxu2 %v5831_v51  ;;  %2633 = vmatpush.msrb.mxu3 %v5858_v61  ;;  %v6767_v51 = vand.u32 4294901760, %v6744_v37  ;;  %v2845_v17 = vsub.f32 %v6734_v32, %v6754_v44  ;;  %v6831_v54 = vand.u32 4294901760, %v6800_v6 }
 0x6eb   :  { %2692 = vmatpush.msra.mxu0 %v5919_v39  ;;  %2737 = vmatpush.msra.mxu1 %v5827_v50  ;;  %v6776_v50 = vand.u32 4294901760, %v5492_v8  ;;  %v164_v39 = vsub.f32 %v75_v23, %v7959_v1  ;;  %5501 = vpow2.f32 %v187_v41  ;;  %v2863_v18 = vsub.f32 %v6770_v4, %v6797_v16 }
 0x6ec   :  { %2582 = vmatpush.msrb.mxu2 %v5847_v56  ;;  %2635 = vmatpush.msrb.mxu3 %v5888_v5  ;;  %v185_v56 = vmul.f32 1.442695, %v166_v13  ;;  %v2851_v57 = vsub.f32 %v6744_v37, %v6767_v51  ;;  %v6811_v22 = vand.u32 4294901760, %v2845_v17  ;;  %v6843_v53 = vand.u32 4294901760, %v2857_v14 }
 0x6ed   :  { %2696 = vmatpush.msra.mxu0 %v5935_v48  ;;  %2739 = vmatpush.msra.mxu1 %v5842_v55  ;;  %v6787_v48 = vsub.f32 %v5488_v58, %v6759_v63  ;;  %v5496_v55 = vpop.eup %5495  ;;  %v8047_v58 = vld [vmem:[#allocation26_spill] sm:$0xff]  ;;  %v6858_v29 = vand.u32 4294901760, %v2863_v18  ;;  %v2875_v11 = vsub.f32 %v6800_v6, %v6831_v54 }
 0x6ee   :  { %2585 = vmatpush.msrb.mxu2 %v5863_v62  ;;  %2637 = vmatpush.msrb.mxu3 %v5906_v28  ;;  %v163_v62 = vsub.f32 %v74_v33, %v7959_v1  ;;  %v5498_v38 = vpop.eup %5497  ;;  %5503 = vpow2.f32 %v185_v56  ;;  %v6826_v42 = vand.u32 4294901760, %v2851_v57  ;;  %8044 = vst [vmem:[#allocation12_spill] sm:$0xff] %v6843_v53 }
 0x6ef   :  { %2700 = vmatpush.msra.mxu0 %v5956_v7  ;;  %2741 = vmatpush.msra.mxu1 %v5858_v61  ;;  %v6802_v7 = vand.u32 4294901760, %v5494_v2  ;;  %v6807_v61 = vsub.f32 %v5492_v8, %v6776_v50  ;;  %v6816_v47 = vand.u32 4294901760, %v6787_v48  ;;  %v6822_v26 = vand.u32 4294901760, %v5498_v38  ;;  %8048 = vst [vmem:[#allocation22_spill] sm:$0xff] %v6858_v29  ;;  %v8049_v8 = vld [vmem:[#allocation28_spill] sm:$0xff] }
 0x6f0   :  { %2588 = vmatpush.msrb.mxu2 %v5877_v10  ;;  %2639 = vmatpush.msrb.mxu3 %v5921_v0  ;;  %v181_v10 = vmul.f32 1.442695, %v164_v39  ;;  %5505 = vpow2.f32 %v183_v45  ;;  %8042 = vst [vmem:[#allocation13_spill] sm:$0xff] %v6826_v42  ;;  %v6886_v39 = vand.u32 4294901760, %v2875_v11 }
 0x6f1   :  { %2704 = vmatpush.msra.mxu0 %v5970_v15  ;;  %2743 = vmatpush.msra.mxu1 %v5888_v5  ;;  %v6818_v15 = vand.u32 4294901760, %v5496_v55  ;;  %v5500_v5 = vpop.eup %5499  ;;  %v6839_v59 = vand.u32 4294901760, %v6807_v61  ;;  %v2869_v3 = vsub.f32 %v6787_v48, %v6816_v47 }
 0x6f2   :  { %2591 = vmatpush.msrb.mxu2 %v7954_v34  ;;  %2641 = vmatpush.msrb.mxu3 %v5937_v49  ;;  %v179_v34 = vmul.f32 1.442695, %v163_v62  ;;  %5507 = vpow2.f32 %v181_v10  ;;  %v6850_v60 = vand.u32 4294901760, %v5500_v5  ;;  %8052 = vst [vmem:[#allocation15_spill] sm:$0xff] %v6886_v39 }
 0x6f3   :  { %2708 = vmatpush.msra.mxu0 %v5981_v31  ;;  %2745 = vmatpush.msra.mxu1 %v5906_v28  ;;  %v6834_v31 = vsub.f32 %v5494_v2, %v6802_v7  ;;  %v5502_v28 = vpop.eup %5501  ;;  %v6848_v46 = vsub.f32 %v5496_v55, %v6818_v15  ;;  %v6871_v23 = vand.u32 4294901760, %v2869_v3 }
 0x6f4   :  { %2847 = vmatpush.msra.mxu3 %v6811_v22  ;;  %2594 = vmatpush.msrb.mxu2 %v8022_v36  ;;  %v8043_v36 = vld [vmem:[#allocation24_spill] sm:$0xff]  ;;  %5509 = vpow2.f32 %v179_v34  ;;  %v6865_v35 = vand.u32 4294901760, %v5502_v28  ;;  %v6877_v43 = vsub.f32 %v5500_v5, %v6850_v60 }
 0x6f5   :  { %2712 = vmatpush.msra.mxu0 %v8023_v12  ;;  %2747 = vmatpush.msra.mxu1 %v5921_v0  ;;  %8045 = vst [vmem:[#allocation20_spill] sm:$0xff] %v6848_v46  ;;  %v5504_v12 = vpop.eup %5503  ;;  %v6854_v0 = vsub.f32 %v5498_v38, %v6822_v26  ;;  %v6863_v40 = vand.u32 4294901760, %v6834_v31  ;;  %v6874_v41 = vand.u32 4294901760, %v6848_v46 }
 0x6f6   :  { %2853 = vmatpush.msra.mxu3 %v6826_v42  ;;  %2597 = vmatpush.msrb.mxu2 %v8043_v36  ;;  %v5506_v13 = vpop.eup %5505  ;;  %8050 = vst [vmem:[#allocation31_spill] sm:$0xff] %v6871_v23  ;;  %v6879_v33 = vand.u32 4294901760, %v5504_v12  ;;  %v6891_v55 = vsub.f32 %v5502_v28, %v6865_v35  ;;  %v6902_v10 = vand.u32 4294901760, %v6877_v43  ;;  %v5392_v42 = vld [vmem:[%s7796_s0 + $0xc] sm:$0x3] }
 0x6f7   :  { %2749 = vmatpush.msra.mxu1 %v5937_v49  ;;  %8046 = vst [vmem:[#allocation11_spill] sm:$0xff] %v6854_v0  ;;  %v2881_v49 = vsub.f32 %v6807_v61, %v6839_v59  ;;  %v6883_v56 = vand.u32 4294901760, %v6854_v0  ;;  %v2887_v17 = vsub.f32 %v6834_v31, %v6863_v40  ;;  %v6893_v45 = vand.u32 4294901760, %v5506_v13 }
 0x6f8   :  { %2859 = vmatpush.msra.mxu3 %v6843_v53  ;;  %2600 = vmatpush.msrb.mxu2 %v8047_v58  ;;  %8051 = vst [vmem:[#allocation14_spill] sm:$0xff] %v6877_v43  ;;  %v5508_v2 = vpop.eup %5507  ;;  %v2893_v57 = vsub.f32 %v6848_v46, %v6874_v41  ;;  %v6905_v14 = vsub.f32 %v5504_v12, %v6879_v33  ;;  %v6916_v28 = vand.u32 4294901760, %v6891_v55 }
 0x6f9   :  { %8053 = vst [vmem:[#allocation16_spill] sm:$0xff] %v6891_v55  ;;  %v6896_v38 = vand.u32 4294901760, %v2881_v49  ;;  %v6907_v5 = vand.u32 4294901760, %v5508_v2  ;;  %v2899_v34 = vsub.f32 %v6854_v0, %v6883_v56  ;;  %v6913_v18 = vand.u32 4294901760, %v2887_v17 }
 0x6fa   :  { %2865 = vmatpush.msra.mxu3 %v6858_v29  ;;  %2603 = vmatpush.msrb.mxu2 %v8049_v8  ;;  %v5510_v62 = vpop.eup %5509  ;;  %8055 = vst [vmem:[#allocation19_spill] sm:$0xff] %v6905_v14  ;;  %v6919_v36 = vsub.f32 %v5506_v13, %v6893_v45  ;;  %v6925_v12 = vand.u32 4294901760, %v2893_v57  ;;  %v2905_v58 = vsub.f32 %v6877_v43, %v6902_v10  ;;  %v6930_v11 = vand.u32 4294901760, %v6905_v14 }
 0x6fb   :  { %8054 = vst [vmem:[#allocation17_spill] sm:$0xff] %v6896_v38  ;;  %v6921_v3 = vand.u32 4294901760, %v5510_v62  ;;  %v6933_v49 = vsub.f32 %v5508_v2, %v6907_v5  ;;  %v6937_v13 = vand.u32 4294901760, %v2899_v34  ;;  %v2911_v8 = vsub.f32 %v6891_v55, %v6916_v28 }
 0x6fc   :  { %2802 = vmatpush.msra.mxu2 %v6719_v19  ;;  %2871 = vmatpush.msra.mxu3 %v6871_v23  ;;  %8056 = vst [vmem:[#allocation21_spill] sm:$0xff] %v6913_v18  ;;  %v6942_v17 = vand.u32 4294901760, %v6919_v36  ;;  %v6949_v2 = vand.u32 4294901760, %v2905_v58  ;;  %v2390_v53 = vadd.f32 %v6677_v21, %v7959_v1  ;;  %v5401_v21 = vld [vmem:[%s7797_s1 + $0xa] sm:$0x3] }
 0x6fd   :  { %8057 = vst [vmem:[#allocation23_spill] sm:$0xff] %v6919_v36  ;;  %v6945_v57 = vsub.f32 %v5510_v62, %v6921_v3  ;;  %v6954_v34 = vand.u32 4294901760, %v6933_v49  ;;  %vm3881_vm14 = vcmp.gt.f32.partialorder %v5401_v21, 0.0 }
 0x6fe   :  { %2804 = vmatpush.msra.mxu2 %v6726_v25  ;;  %2877 = vmatpush.msra.mxu3 %v6886_v39  ;;  %8058 = vst [vmem:[#allocation25_spill] sm:$0xff] %v6925_v12  ;;  %v2923_v62 = vsub.f32 %v6919_v36, %v6942_v17 }
 0x6ff   :  { %8059 = vst [vmem:[#allocation27_spill] sm:$0xff] %v6933_v49 }
 0x700   :  { %2806 = vmatpush.msra.mxu2 %v6736_v52  ;;  %2883 = vmatpush.msra.mxu3 %v6896_v38  ;;  %8060 = vst [vmem:[#allocation29_spill] sm:$0xff] %v6937_v13  ;;  %v6963_v38 = vand.u32 4294901760, %v6945_v57 }
 0x701   :  { %8061 = vst [vmem:[#allocation30_spill] sm:$0xff] %v6945_v57 }
 0x702   :  { %2808 = vmatpush.msra.mxu2 %v6746_v9  ;;  %2889 = vmatpush.msra.mxu3 %v6913_v18  ;;  %8062 = vst [vmem:[#allocation32_spill] sm:$0xff] %v6949_v2  ;;  %v6958_v18 = vand.u32 4294901760, %v2911_v8  ;;  %v6973_v8 = vand.u32 4294901760, %v2923_v62 }
 0x703   :  { %8064 = vst [vmem:[#allocation34_spill] sm:$0xff] %v6963_v38 }
 0x704   :  { %2810 = vmatpush.msra.mxu2 %v6759_v63  ;;  %2895 = vmatpush.msra.mxu3 %v6925_v12  ;;  %v2917_v12 = vsub.f32 %v6905_v14, %v6930_v11  ;;  %8063 = vst [vmem:[#allocation33_spill] sm:$0xff] %v6958_v18 }
 0x705   :  { %8066 = vst [vmem:[#allocation24_spill] sm:$0xff] %v6973_v8 }
 0x706   :  { %2812 = vmatpush.msra.mxu2 %v6772_v27  ;;  %2901 = vmatpush.msra.mxu3 %v6937_v13  ;;  %v6967_v58 = vand.u32 4294901760, %v2917_v12  ;;  %v2929_v13 = vsub.f32 %v6933_v49, %v6954_v34 }
 0x708   :  { %2814 = vmatpush.msra.mxu2 %v6776_v50  ;;  %2907 = vmatpush.msra.mxu3 %v6949_v2  ;;  %8065 = vst [vmem:[#allocation35_spill] sm:$0xff] %v6967_v58  ;;  %v2935_v2 = vsub.f32 %v6945_v57, %v6963_v38  ;;  %v6979_v39 = vand.u32 4294901760, %v2929_v13  ;;  %v2403_v38 = vpop.permute.xlu2 %2402 }
 0x709   :  { %vm2404_vm13 = vcmp.eq.s32.totalorder %v2403_v38, 1 }
 0x70a   :  { %2816 = vmatpush.msra.mxu2 %v6802_v7  ;;  %2913 = vmatpush.msra.mxu3 %v6958_v18  ;;  %8067 = vst [vmem:[#allocation26_spill] sm:$0xff] %v6979_v39  ;;  %v6983_v12 = vand.u32 4294901760, %v2935_v2 }
 0x70c   :  { %2818 = vmatpush.msra.mxu2 %v6818_v15  ;;  %2919 = vmatpush.msra.mxu3 %v6967_v58  ;;  %8068 = vst [vmem:[#allocation28_spill] sm:$0xff] %v6983_v12 }
 0x70e   :  { %2820 = vmatpush.msra.mxu2 %v6822_v26  ;;  %2925 = vmatpush.msra.mxu3 %v6973_v8 }
 0x710   :  { %2822 = vmatpush.msra.mxu2 %v6850_v60  ;;  %2931 = vmatpush.msra.mxu3 %v6979_v39 }
 0x712   :  { %2824 = vmatpush.msra.mxu2 %v6865_v35  ;;  %2937 = vmatpush.msra.mxu3 %v6983_v12 }
 0x714   :  { %2826 = vmatpush.msra.mxu2 %v6879_v33 }
 0x716   :  { %2828 = vmatpush.msra.mxu2 %v6893_v45 }
 0x718   :  { %2830 = vmatpush.msra.mxu2 %v6907_v5 }
 0x71a   :  { %2832 = vmatpush.msra.mxu2 %v6921_v3 }
 0x751   :  { %v2242_v58 = vpop.f32.mrf.mxu0 }
 0x753   :  { %v2281_v39 = vpop.f32.mrf.mxu1 }
 0x755   :  { %v2188_v13 = vpop.f32.mrf.mxu3 }
 0x75d   :  { %v2087_v62 = vpop.f32.mrf.mxu2 }
 0x75e   :  { %v2189_v8 = vadd.f32 %v2188_v13, %v2087_v62  ;;  %v2387_v29 = vpop.f32.mrf.mxu3 }
 0x760   :  { %v2243_v18 = vadd.f32 %v2242_v58, %v2189_v8 }
 0x762   :  { %v2282_v2 = vadd.f32 %v2281_v39, %v2243_v18 }
 0x766   :  { %v2350_v23 = vpop.f32.mrf.mxu2 }
 0x767   :  { %v2351_v57 = vadd.f32 %v2350_v23, %v2282_v2  ;;  %v8070_v23 = vmov 0  }
 0x768   :  { %v3882_v18 = vsel %vm3881_vm14, 1, %v8070_v23 }
 0x769   :  { %v2388_v49 = vadd.f32 %v2387_v29, %v2351_v57 }
 0x76b   :  { %5511 = vlog2.f32 %v2388_v49 }
 0x771   :  { %v5512_v12 = vpop.eup %5511 }
 0x772   :  { %v2392_v36 = vmul.f32 0.6931472, %v5512_v12 }
 0x774   :  { %v2393_v13 = vadd.f32 %v2392_v36, %v2390_v53  ;;  %v7010_v53 = vpop.xlane.xlu0 %2796  ;;  %v8071_v36 = vld [vmem:[#allocation18_spill] sm:$0xff] }
 0x775   :  { %v2798_v49 = vsub.f32 %v8071_v36, %v7010_v53 }
 0x776   :  { %v2396_v62 = vadd.f32 %v5392_v42, %v2393_v13  ;;  %v5403_v42 = vld [vmem:[%s7797_s1 + $0x8] sm:$0x3] }
 0x777   :  { %vm4248_vm15 = vcmp.gt.f32.partialorder %v5403_v42, 0.0  ;;  %v2799_v8 = vmul.f32 1.442695, %v2798_v49 }
 0x778   :  { %v6997_v39 = vsel %vm2404_vm13, %v2396_v62, %v6672_v20  ;;  %v4249_v20 = vsel %vm4248_vm15, 1, %v8070_v23 }
 0x779   :  { %8069 = vst [vmem:[#allocation36_spill] sm:$0xff] %v6997_v39  ;;  %v2408_v29 = vsel %vm217_vm0, %v6997_v39, -inf }
 0x77a   :  { %2407 = vst [vmem:[#allocation7 + $0xc] sm:$0x3] %v6997_v39  ;;  %2409 = vmax.xlane.f32.xlu2 %v2408_v29 }
 0x792   :  { %3884 = vperm.xlu2 %5421, %v3882_v18  }
 0x79a   :  { %4251 = vperm.xlu2 %5421, %v4249_v20  }
 0x7ed   :  { %v7012_v38 = vpop.xlane.xlu2 %2409 }
 0x7ee   :  { %v2411_v57 = vsub.f32 %v6997_v39, %v7012_v38  ;;  %v8086_v39 = vld [vmem:[#allocation33_spill] sm:$0xff] }
 0x7f0   :  { %v2412_v58 = vmul.f32 1.442695, %v2411_v57 }
 0x7f2   :  { %5513 = vpow2.f32 %v2412_v58  ;;  %v8072_v58 = vld [vmem:[#allocation34_spill] sm:$0xff] }
 0x7f3   :  { %5515 = vpow2.f32 %v2799_v8  ;;  %v8073_v8 = vld [vmem:[#allocation13_spill] sm:$0xff] }
 0x7f8   :  { %v5514_v12 = vpop.eup %5513 }
 0x7f9   :  { %v2446_v2 = vand.u32 4294901760, %v5514_v12  ;;  %v5516_v62 = vpop.eup %5515 }
 0x7fa   :  { %v7021_v21 = vand.u32 4294901760, %v5516_v62 }
 0x7fb   :  { %2552 = vmatmul.f32.vlgmr.msrb.gmra.mxu1 %v2446_v2  ;;  %v2447_v13 = vsub.f32 %v5514_v12, %v2446_v2  ;;  %v8074_v12 = vld [vmem:[#allocation23_spill] sm:$0xff] }
 0x7fc   :  { %2998 = vmatpush.msrb.mxu1 %v6719_v19  ;;  %v7029_v20 = vsub.f32 %v5516_v62, %v7021_v21  ;;  %v8077_v62 = vld [vmem:[#allocation22_spill] sm:$0xff] }
 0x7fd   :  { %2606 = vmatmul.f32.vlgmr.msrb.gmra.mxu2 %v2447_v13  ;;  %v2448_v29 = vand.u32 4294901760, %v2447_v13 }
 0x7fe   :  { %3000 = vmatpush.msrb.mxu1 %v6726_v25  ;;  %3039 = vmatpush.msrb.mxu2 %v6754_v44  ;;  %v2835_v36 = vand.u32 4294901760, %v7029_v20 }
 0x7ff   :  { %2645 = vmatmul.f32.vlgmr.msrb.gmra.mxu3 %v2448_v29  ;;  %v2449_v18 = vsub.f32 %v2447_v13, %v2448_v29  ;;  %v8076_v13 = vld [vmem:[#allocation27_spill] sm:$0xff]  ;;  %v8078_v29 = vld [vmem:[#allocation30_spill] sm:$0xff] }
 0x800   :  { %3002 = vmatpush.msrb.mxu1 %v6736_v52  ;;  %3043 = vmatpush.msrb.mxu2 %v6767_v51  ;;  %v2836_v49 = vsub.f32 %v7029_v20, %v2835_v36 }
 0x801   :  { %3106 = vmatpush.msrb.mxu3 %v6719_v19  ;;  %v2450_v42 = vand.u32 4294901760, %v2449_v18  ;;  %v8079_v18 = vld [vmem:[#allocation31_spill] sm:$0xff] }
 0x802   :  { %3004 = vmatpush.msrb.mxu1 %v6746_v9  ;;  %3047 = vmatpush.msrb.mxu2 %v6784_v24  ;;  %v2837_v57 = vand.u32 4294901760, %v2836_v49  ;;  %v8084_v49 = vld [vmem:[#allocation29_spill] sm:$0xff] }
 0x803   :  { %3108 = vmatpush.msrb.mxu3 %v6726_v25  ;;  %2451 = vmatmul.f32.vlgmr.msrb.gmra.mxu0 %v2450_v42  ;;  %v8081_v42 = vld [vmem:[#allocation17_spill] sm:$0xff] }
 0x804   :  { %2751 = vmatmul.f32.vlgmr.msra.gmra.mxu1 %v2446_v2  ;;  %2945 = vmatpush.msrb.mxu0 %v6734_v32 }
 0x805   :  { %3006 = vmatpush.msrb.mxu1 %v6759_v63  ;;  %3051 = vmatpush.msrb.mxu2 %v6797_v16 }
 0x806   :  { %3110 = vmatpush.msrb.mxu3 %v6736_v52  ;;  %2948 = vmatpush.msrb.mxu0 %v6744_v37 }
 0x807   :  { %3008 = vmatpush.msrb.mxu1 %v6772_v27  ;;  %3055 = vmatpush.msrb.mxu2 %v6816_v47 }
 0x808   :  { %3112 = vmatpush.msrb.mxu3 %v6746_v9  ;;  %2951 = vmatpush.msrb.mxu0 %v6757_v30 }
 0x809   :  { %3010 = vmatpush.msrb.mxu1 %v6776_v50  ;;  %3059 = vmatpush.msrb.mxu2 %v6831_v54 }
 0x80a   :  { %3114 = vmatpush.msrb.mxu3 %v6759_v63  ;;  %2954 = vmatpush.msrb.mxu0 %v6770_v4 }
 0x80b   :  { %3012 = vmatpush.msrb.mxu1 %v6802_v7  ;;  %3063 = vmatpush.msrb.mxu2 %v6839_v59 }
 0x80c   :  { %3116 = vmatpush.msrb.mxu3 %v6772_v27  ;;  %2714 = vmatmul.f32.vlgmr.msra.gmra.mxu0 %v2446_v2  ;;  %v8075_v2 = vld [vmem:[#allocation12_spill] sm:$0xff] }
 0x80d   :  { %2957 = vmatpush.msrb.mxu0 %v6787_v48  ;;  %3014 = vmatpush.msrb.mxu1 %v6818_v15 }
 0x80e   :  { %3067 = vmatpush.msrb.mxu2 %v6863_v40  ;;  %3118 = vmatpush.msrb.mxu3 %v6776_v50 }
 0x80f   :  { %2960 = vmatpush.msrb.mxu0 %v6800_v6  ;;  %3016 = vmatpush.msrb.mxu1 %v6822_v26 }
 0x810   :  { %3071 = vmatpush.msrb.mxu2 %v6874_v41  ;;  %3120 = vmatpush.msrb.mxu3 %v6802_v7 }
 0x811   :  { %2963 = vmatpush.msrb.mxu0 %v6807_v61  ;;  %3018 = vmatpush.msrb.mxu1 %v6850_v60 }
 0x812   :  { %3075 = vmatpush.msrb.mxu2 %v6883_v56  ;;  %3122 = vmatpush.msrb.mxu3 %v6818_v15 }
 0x813   :  { %2838 = vmatmul.f32.vlgmr.msra.gmra.mxu2 %v2837_v57  ;;  %2939 = vmatmul.f32.vlgmr.msra.gmra.mxu3 %v7021_v21  ;;  %v8085_v57 = vld [vmem:[#allocation32_spill] sm:$0xff] }
 0x814   :  { %2966 = vmatpush.msrb.mxu0 %v6834_v31  ;;  %3020 = vmatpush.msrb.mxu1 %v6865_v35 }
 0x815   :  { %3079 = vmatpush.msrb.mxu2 %v6902_v10  ;;  %3124 = vmatpush.msrb.mxu3 %v6822_v26 }
 0x816   :  { %2969 = vmatpush.msrb.mxu0 %v6848_v46  ;;  %3022 = vmatpush.msrb.mxu1 %v6879_v33 }
 0x817   :  { %3083 = vmatpush.msrb.mxu2 %v6916_v28  ;;  %3126 = vmatpush.msrb.mxu3 %v6850_v60 }
 0x818   :  { %2972 = vmatpush.msrb.mxu0 %v6854_v0  ;;  %3024 = vmatpush.msrb.mxu1 %v6893_v45 }
 0x819   :  { %3087 = vmatpush.msrb.mxu2 %v6930_v11  ;;  %3128 = vmatpush.msrb.mxu3 %v6865_v35 }
 0x81a   :  { %2975 = vmatpush.msrb.mxu0 %v6877_v43  ;;  %3026 = vmatpush.msrb.mxu1 %v6907_v5 }
 0x81b   :  { %3091 = vmatpush.msrb.mxu2 %v6942_v17  ;;  %3130 = vmatpush.msrb.mxu3 %v6879_v33 }
 0x81c   :  { %2978 = vmatpush.msrb.mxu0 %v6891_v55  ;;  %3028 = vmatpush.msrb.mxu1 %v6921_v3 }
 0x81d   :  { %3095 = vmatpush.msrb.mxu2 %v6954_v34  ;;  %3132 = vmatpush.msrb.mxu3 %v6893_v45 }
 0x81e   :  { %3032 = vmatmul.f32.vlgmr.msrb.gmra.mxu1 %v2835_v36  ;;  %2981 = vmatpush.msrb.mxu0 %v6905_v14  ;;  %v8083_v36 = vld [vmem:[#allocation25_spill] sm:$0xff] }
 0x81f   :  { %3214 = vmatpush.msra.mxu1 %v6811_v22  ;;  %3099 = vmatpush.msrb.mxu2 %v8072_v58 }
 0x820   :  { %3134 = vmatpush.msrb.mxu3 %v6907_v5  ;;  %3101 = vmatmul.f32.vlgmr.msrb.gmra.mxu2 %v7021_v21 }
 0x821   :  { %3220 = vmatpush.msra.mxu1 %v8073_v8  ;;  %3312 = vmatpush.msra.mxu2 %v6734_v32 }
 0x822   :  { %2984 = vmatpush.msrb.mxu0 %v8074_v12  ;;  %3136 = vmatpush.msrb.mxu3 %v6921_v3 }
 0x823   :  { %3138 = vmatmul.f32.vlgmr.msrb.gmra.mxu3 %v7021_v21  ;;  %3226 = vmatpush.msra.mxu1 %v8075_v2  ;;  %v8080_v21 = vld [vmem:[#allocation15_spill] sm:$0xff] }
 0x824   :  { %3315 = vmatpush.msra.mxu2 %v6744_v37  ;;  %3365 = vmatpush.msra.mxu3 %v6719_v19 }
 0x825   :  { %2987 = vmatpush.msrb.mxu0 %v8076_v13  ;;  %3232 = vmatpush.msra.mxu1 %v8077_v62 }
 0x826   :  { %3318 = vmatpush.msra.mxu2 %v6757_v30  ;;  %3367 = vmatpush.msra.mxu3 %v6726_v25 }
 0x827   :  { %2990 = vmatpush.msrb.mxu0 %v8078_v29  ;;  %3238 = vmatpush.msra.mxu1 %v8079_v18 }
 0x828   :  { %2993 = vmatmul.f32.vlgmr.msrb.gmra.mxu0 %v7029_v20  ;;  %3321 = vmatpush.msra.mxu2 %v6770_v4  ;;  %v8082_v20 = vld [vmem:[#allocation21_spill] sm:$0xff] }
 0x829   :  { %3169 = vmatpush.msra.mxu0 %v6719_v19  ;;  %3369 = vmatpush.msra.mxu3 %v6736_v52 }
 0x82a   :  { %3244 = vmatpush.msra.mxu1 %v8080_v21  ;;  %3324 = vmatpush.msra.mxu2 %v6787_v48 }
 0x82b   :  { %3171 = vmatpush.msra.mxu0 %v6726_v25  ;;  %3371 = vmatpush.msra.mxu3 %v6746_v9 }
 0x82c   :  { %3250 = vmatpush.msra.mxu1 %v8081_v42  ;;  %3327 = vmatpush.msra.mxu2 %v6800_v6 }
 0x82d   :  { %3173 = vmatpush.msra.mxu0 %v6736_v52  ;;  %3373 = vmatpush.msra.mxu3 %v6759_v63 }
 0x82e   :  { %3256 = vmatpush.msra.mxu1 %v8082_v20  ;;  %3330 = vmatpush.msra.mxu2 %v6807_v61 }
 0x82f   :  { %3175 = vmatpush.msra.mxu0 %v6746_v9  ;;  %3375 = vmatpush.msra.mxu3 %v6772_v27 }
 0x830   :  { %3262 = vmatpush.msra.mxu1 %v8083_v36  ;;  %3333 = vmatpush.msra.mxu2 %v6834_v31 }
 0x831   :  { %3177 = vmatpush.msra.mxu0 %v6759_v63  ;;  %3377 = vmatpush.msra.mxu3 %v6776_v50 }
 0x832   :  { %3268 = vmatpush.msra.mxu1 %v8084_v49  ;;  %3336 = vmatpush.msra.mxu2 %v6848_v46  ;;  %v8087_v46 = vld [vmem:[#allocation35_spill] sm:$0xff] }
 0x833   :  { %3179 = vmatpush.msra.mxu0 %v6772_v27  ;;  %3379 = vmatpush.msra.mxu3 %v6802_v7 }
 0x834   :  { %3274 = vmatpush.msra.mxu1 %v8085_v57  ;;  %3339 = vmatpush.msra.mxu2 %v6854_v0  ;;  %v8088_v0 = vld [vmem:[#allocation24_spill] sm:$0xff] }
 0x835   :  { %3181 = vmatpush.msra.mxu0 %v6776_v50  ;;  %3381 = vmatpush.msra.mxu3 %v6818_v15 }
 0x836   :  { %3280 = vmatpush.msra.mxu1 %v8086_v39  ;;  %3342 = vmatpush.msra.mxu2 %v6877_v43  ;;  %v8089_v43 = vld [vmem:[#allocation26_spill] sm:$0xff] }
 0x837   :  { %3183 = vmatpush.msra.mxu0 %v6802_v7  ;;  %3383 = vmatpush.msra.mxu3 %v6822_v26 }
 0x838   :  { %3286 = vmatpush.msra.mxu1 %v8087_v46  ;;  %3345 = vmatpush.msra.mxu2 %v6891_v55  ;;  %v8090_v55 = vld [vmem:[#allocation28_spill] sm:$0xff] }
 0x839   :  { %3185 = vmatpush.msra.mxu0 %v6818_v15  ;;  %3385 = vmatpush.msra.mxu3 %v6850_v60 }
 0x83a   :  { %3292 = vmatpush.msra.mxu1 %v8088_v0  ;;  %3348 = vmatpush.msra.mxu2 %v6905_v14 }
 0x83b   :  { %3187 = vmatpush.msra.mxu0 %v6822_v26  ;;  %3387 = vmatpush.msra.mxu3 %v6865_v35 }
 0x83c   :  { %3298 = vmatpush.msra.mxu1 %v8089_v43  ;;  %3351 = vmatpush.msra.mxu2 %v8074_v12 }
 0x83d   :  { %3189 = vmatpush.msra.mxu0 %v6850_v60  ;;  %3389 = vmatpush.msra.mxu3 %v6879_v33 }
 0x83e   :  { %3304 = vmatpush.msra.mxu1 %v8090_v55  ;;  %3354 = vmatpush.msra.mxu2 %v8076_v13 }
 0x83f   :  { %3191 = vmatpush.msra.mxu0 %v6865_v35  ;;  %3391 = vmatpush.msra.mxu3 %v6893_v45 }
 0x840   :  { %3473 = vmatpush.msrb.mxu1 %v6719_v19  ;;  %3357 = vmatpush.msra.mxu2 %v8078_v29 }
 0x841   :  { %3193 = vmatpush.msra.mxu0 %v6879_v33  ;;  %3393 = vmatpush.msra.mxu3 %v6907_v5 }
 0x842   :  { %3475 = vmatpush.msrb.mxu1 %v6726_v25  ;;  %3536 = vmatpush.msrb.mxu2 %v6719_v19 }
 0x843   :  { %3195 = vmatpush.msra.mxu0 %v6893_v45  ;;  %3395 = vmatpush.msra.mxu3 %v6921_v3 }
 0x844   :  { %3477 = vmatpush.msrb.mxu1 %v6736_v52  ;;  %3538 = vmatpush.msrb.mxu2 %v6726_v25 }
 0x845   :  { %3581 = vmatpush.msrb.mxu3 %v6811_v22  ;;  %3197 = vmatpush.msra.mxu0 %v6907_v5 }
 0x846   :  { %3479 = vmatpush.msrb.mxu1 %v6746_v9  ;;  %3540 = vmatpush.msrb.mxu2 %v6736_v52 }
 0x847   :  { %3587 = vmatpush.msrb.mxu3 %v8073_v8  ;;  %3199 = vmatpush.msra.mxu0 %v6921_v3 }
 0x848   :  { %3481 = vmatpush.msrb.mxu1 %v6759_v63  ;;  %3542 = vmatpush.msrb.mxu2 %v6746_v9 }
 0x849   :  { %3406 = vmatpush.msrb.mxu0 %v6754_v44  ;;  %3593 = vmatpush.msrb.mxu3 %v8075_v2 }
 0x84a   :  { %3483 = vmatpush.msrb.mxu1 %v6772_v27  ;;  %3544 = vmatpush.msrb.mxu2 %v6759_v63 }
 0x84b   :  { %3410 = vmatpush.msrb.mxu0 %v6767_v51  ;;  %3599 = vmatpush.msrb.mxu3 %v8077_v62 }
 0x84c   :  { %3485 = vmatpush.msrb.mxu1 %v6776_v50  ;;  %3546 = vmatpush.msrb.mxu2 %v6772_v27 }
 0x84d   :  { %3414 = vmatpush.msrb.mxu0 %v6784_v24  ;;  %3605 = vmatpush.msrb.mxu3 %v8079_v18 }
 0x84e   :  { %3487 = vmatpush.msrb.mxu1 %v6802_v7  ;;  %3548 = vmatpush.msrb.mxu2 %v6776_v50 }
 0x84f   :  { %3418 = vmatpush.msrb.mxu0 %v6797_v16  ;;  %3611 = vmatpush.msrb.mxu3 %v8080_v21 }
 0x850   :  { %3489 = vmatpush.msrb.mxu1 %v6818_v15  ;;  %3550 = vmatpush.msrb.mxu2 %v6802_v7 }
 0x851   :  { %3422 = vmatpush.msrb.mxu0 %v6816_v47  ;;  %3617 = vmatpush.msrb.mxu3 %v8081_v42 }
 0x852   :  { %3491 = vmatpush.msrb.mxu1 %v6822_v26  ;;  %3552 = vmatpush.msrb.mxu2 %v6818_v15 }
 0x853   :  { %3426 = vmatpush.msrb.mxu0 %v6831_v54  ;;  %3623 = vmatpush.msrb.mxu3 %v8082_v20 }
 0x854   :  { %3493 = vmatpush.msrb.mxu1 %v6850_v60  ;;  %3554 = vmatpush.msrb.mxu2 %v6822_v26 }
 0x855   :  { %3430 = vmatpush.msrb.mxu0 %v6839_v59  ;;  %3629 = vmatpush.msrb.mxu3 %v8083_v36 }
 0x856   :  { %3495 = vmatpush.msrb.mxu1 %v6865_v35  ;;  %3556 = vmatpush.msrb.mxu2 %v6850_v60 }
 0x857   :  { %3434 = vmatpush.msrb.mxu0 %v6863_v40  ;;  %3635 = vmatpush.msrb.mxu3 %v8084_v49 }
 0x858   :  { %3497 = vmatpush.msrb.mxu1 %v6879_v33  ;;  %3558 = vmatpush.msrb.mxu2 %v6865_v35 }
 0x859   :  { %3438 = vmatpush.msrb.mxu0 %v6874_v41  ;;  %3641 = vmatpush.msrb.mxu3 %v8085_v57 }
 0x85a   :  { %3499 = vmatpush.msrb.mxu1 %v6893_v45  ;;  %3560 = vmatpush.msrb.mxu2 %v6879_v33 }
 0x85b   :  { %3442 = vmatpush.msrb.mxu0 %v6883_v56  ;;  %3647 = vmatpush.msrb.mxu3 %v8086_v39 }
 0x85c   :  { %3501 = vmatpush.msrb.mxu1 %v6907_v5  ;;  %3562 = vmatpush.msrb.mxu2 %v6893_v45 }
 0x85d   :  { %3446 = vmatpush.msrb.mxu0 %v6902_v10  ;;  %3653 = vmatpush.msrb.mxu3 %v8087_v46 }
 0x85e   :  { %3503 = vmatpush.msrb.mxu1 %v6921_v3  ;;  %3564 = vmatpush.msrb.mxu2 %v6907_v5 }
 0x85f   :  { %3450 = vmatpush.msrb.mxu0 %v6916_v28  ;;  %3659 = vmatpush.msrb.mxu3 %v8088_v0 }
 0x860   :  { %3566 = vmatpush.msrb.mxu2 %v6921_v3 }
 0x861   :  { %3454 = vmatpush.msrb.mxu0 %v6930_v11  ;;  %3665 = vmatpush.msrb.mxu3 %v8089_v43 }
 0x863   :  { %3458 = vmatpush.msrb.mxu0 %v6942_v17  ;;  %3671 = vmatpush.msrb.mxu3 %v8090_v55  ;;  %v2755_v55 = vadd.f32 %v7012_v38, %v7959_v1  ;;  %v3151_v38 = vpop.permute.xlu0 %3150 }
 0x864   :  { %vm3152_vm1 = vcmp.eq.s32.totalorder %v3151_v38, 1  ;;  %v8093_v38 = vld [vmem:[#allocation20_spill] sm:$0xff] }
 0x865   :  { %3462 = vmatpush.msrb.mxu0 %v6954_v34 }
 0x867   :  { %3466 = vmatpush.msrb.mxu0 %v8072_v58 }
 0x878   :  { %v2553_v46 = vpop.f32.mrf.mxu1 }
 0x880   :  { %v2452_v39 = vpop.f32.mrf.mxu0  ;;  %v2607_v49 = vpop.f32.mrf.mxu2 }
 0x881   :  { %v2554_v57 = vadd.f32 %v2553_v46, %v2452_v39  ;;  %v2752_v18 = vpop.f32.mrf.mxu1 }
 0x882   :  { %v2646_v0 = vpop.f32.mrf.mxu3 }
 0x883   :  { %v2608_v36 = vadd.f32 %v2607_v49, %v2554_v57 }
 0x885   :  { %v2647_v20 = vadd.f32 %v2646_v0, %v2608_v36 }
 0x889   :  { %v2715_v42 = vpop.f32.mrf.mxu0 }
 0x88a   :  { %v2716_v21 = vadd.f32 %v2715_v42, %v2647_v20 }
 0x88c   :  { %v2753_v29 = vadd.f32 %v2752_v18, %v2716_v21  ;;  %v3142_v18 = vadd.f32 %v7010_v53, %v7959_v1  ;;  %v5399_v53 = vld [vmem:[%s7797_s1 + $0xc] sm:$0x3] }
 0x88d   :  { %vm3514_vm2 = vcmp.gt.f32.partialorder %v5399_v53, 0.0  ;;  %v8100_v53 = vld [vmem:[#allocation27_spill] sm:$0xff] }
 0x88e   :  { %5517 = vlog2.f32 %v2753_v29 }
 0x894   :  { %v5518_v43 = vpop.eup %5517 }
 0x895   :  { %v2757_v62 = vmul.f32 0.6931472, %v5518_v43 }
 0x896   :  { %v2839_v2 = vpop.f32.mrf.mxu2  ;;  %v2940_v12 = vpop.f32.mrf.mxu3 }
 0x897   :  { %v7223_v13 = vadd.f32 %v2757_v62, %v2755_v55  ;;  %v2941_v8 = vadd.f32 %v2940_v12, %v2839_v2  ;;  %v5398_v12 = vld [vmem:[%s7796_s0 + $0xc] sm:$0x3] }
 0x899   :  { %8091 = vst [vmem:[#allocation18_spill] sm:$0xff] %v7223_v13  ;;  %v8110_v13 = vld [vmem:[#allocation33_spill] sm:$0xff] }
 0x89b   :  { %v3033_v49 = vpop.f32.mrf.mxu1 }
 0x8a3   :  { %v3102_v0 = vpop.f32.mrf.mxu2 }
 0x8a5   :  { %v2994_v46 = vpop.f32.mrf.mxu0 }
 0x8a6   :  { %v2995_v39 = vadd.f32 %v2994_v46, %v2941_v8  ;;  %v3139_v42 = vpop.f32.mrf.mxu3  ;;  %v5565_v8 = vld [vmem:[%s7799_s3] ss:$0 sm:$0xff]  ;;  %v3515_v46 = vsel %vm3514_vm2, 1, %v8070_v23 }
 0x8a8   :  { %v3034_v57 = vadd.f32 %v3033_v49, %v2995_v39 }
 0x8aa   :  { %v3103_v36 = vadd.f32 %v3102_v0, %v3034_v57 }
 0x8ac   :  { %v3140_v20 = vadd.f32 %v3139_v42, %v3103_v36 }
 0x8ae   :  { %5519 = vlog2.f32 %v3140_v20 }
 0x8b4   :  { %v5520_v29 = vpop.eup %5519 }
 0x8b5   :  { %v3144_v43 = vmul.f32 0.6931472, %v5520_v29 }
 0x8b7   :  { %v3145_v55 = vadd.f32 %v3144_v43, %v3142_v18  ;;  %v8094_v43 = vld [vmem:[#allocation11_spill] sm:$0xff] }
 0x8b9   :  { %v7233_v2 = vsel %vm3152_vm1, %v3145_v55, %v5565_v8  ;;  %v8095_v55 = vld [vmem:[#allocation14_spill] sm:$0xff]  ;;  %v8097_v8 = vld [vmem:[#allocation13_spill] sm:$0xff] }
 0x8ba   :  { %8092 = vst [vmem:[#allocation37_spill] sm:$0xff] %v7233_v2  ;;  %v3161_v62 = vadd.f32 %v5398_v12, %v7233_v2  ;;  %v8096_v12 = vld [vmem:[#allocation16_spill] sm:$0xff] }
 0x8bc   :  { %v3162_v21 = vsel %vm217_vm0, %v3161_v62, -inf }
 0x8bd   :  { %3163 = vmax.xlane.f32.xlu1 %v3162_v21  ;;  %v8099_v21 = vld [vmem:[#allocation12_spill] sm:$0xff] }
 0x8d6   :  { %3517 = vperm.xlu1 %5420, %v3515_v46   ;;  %v8101_v46 = vld [vmem:[#allocation22_spill] sm:$0xff] }
 0x930   :  { %v7241_v39 = vpop.xlane.xlu1 %3163 }
 0x931   :  { %v3165_v49 = vsub.f32 %v3161_v62, %v7241_v39  ;;  %v8098_v62 = vld [vmem:[#allocation23_spill] sm:$0xff] }
 0x933   :  { %v3166_v57 = vmul.f32 1.442695, %v3165_v49  ;;  %v8102_v49 = vld [vmem:[#allocation30_spill] sm:$0xff] }
 0x935   :  { %5521 = vpow2.f32 %v3166_v57  ;;  %v8103_v57 = vld [vmem:[#allocation31_spill] sm:$0xff] }
 0x93b   :  { %v5522_v0 = vpop.eup %5521 }
 0x93c   :  { %v3200_v36 = vand.u32 4294901760, %v5522_v0 }
 0x93e   :  { %3306 = vmatmul.f32.vlgmr.msra.gmra.mxu1 %v3200_v36  ;;  %v3201_v42 = vsub.f32 %v5522_v0, %v3200_v36  ;;  %v8104_v0 = vld [vmem:[#allocation15_spill] sm:$0xff] }
 0x93f   :  { %3732 = vmatpush.msra.mxu1 %v6719_v19 }
 0x940   :  { %3360 = vmatmul.f32.vlgmr.msra.gmra.mxu2 %v3201_v42  ;;  %v3202_v20 = vand.u32 4294901760, %v3201_v42 }
 0x941   :  { %3734 = vmatpush.msra.mxu1 %v6726_v25  ;;  %3773 = vmatpush.msra.mxu2 %v6754_v44 }
 0x942   :  { %3399 = vmatmul.f32.vlgmr.msra.gmra.mxu3 %v3202_v20  ;;  %v3203_v29 = vsub.f32 %v3201_v42, %v3202_v20  ;;  %v8106_v42 = vld [vmem:[#allocation21_spill] sm:$0xff] }
 0x943   :  { %3736 = vmatpush.msra.mxu1 %v6736_v52  ;;  %3777 = vmatpush.msra.mxu2 %v6767_v51  ;;  %v8107_v20 = vld [vmem:[#allocation25_spill] sm:$0xff] }
 0x944   :  { %3840 = vmatpush.msra.mxu3 %v6719_v19  ;;  %v3204_v18 = vand.u32 4294901760, %v3203_v29  ;;  %v8108_v29 = vld [vmem:[#allocation29_spill] sm:$0xff] }
 0x945   :  { %3738 = vmatpush.msra.mxu1 %v6746_v9  ;;  %3781 = vmatpush.msra.mxu2 %v6784_v24 }
 0x946   :  { %3842 = vmatpush.msra.mxu3 %v6726_v25  ;;  %3205 = vmatmul.f32.vlgmr.msra.gmra.mxu0 %v3204_v18  ;;  %v8109_v18 = vld [vmem:[#allocation32_spill] sm:$0xff] }
 0x947   :  { %3505 = vmatmul.f32.vlgmr.msrb.gmra.mxu1 %v3200_v36  ;;  %3679 = vmatpush.msra.mxu0 %v6734_v32 }
 0x948   :  { %3740 = vmatpush.msra.mxu1 %v6759_v63  ;;  %3785 = vmatpush.msra.mxu2 %v6797_v16 }
 0x949   :  { %3844 = vmatpush.msra.mxu3 %v6736_v52  ;;  %3682 = vmatpush.msra.mxu0 %v6744_v37 }
 0x94a   :  { %3742 = vmatpush.msra.mxu1 %v6772_v27  ;;  %3789 = vmatpush.msra.mxu2 %v6816_v47 }
 0x94b   :  { %3846 = vmatpush.msra.mxu3 %v6746_v9  ;;  %3685 = vmatpush.msra.mxu0 %v6757_v30 }
 0x94c   :  { %3744 = vmatpush.msra.mxu1 %v6776_v50  ;;  %3793 = vmatpush.msra.mxu2 %v6831_v54 }
 0x94d   :  { %3848 = vmatpush.msra.mxu3 %v6759_v63  ;;  %3688 = vmatpush.msra.mxu0 %v6770_v4 }
 0x94e   :  { %3746 = vmatpush.msra.mxu1 %v6802_v7  ;;  %3797 = vmatpush.msra.mxu2 %v6839_v59 }
 0x94f   :  { %3850 = vmatpush.msra.mxu3 %v6772_v27  ;;  %3468 = vmatmul.f32.vlgmr.msrb.gmra.mxu0 %v3200_v36  ;;  %v8105_v36 = vld [vmem:[#allocation17_spill] sm:$0xff] }
 0x950   :  { %3691 = vmatpush.msra.mxu0 %v6787_v48  ;;  %3748 = vmatpush.msra.mxu1 %v6818_v15 }
 0x951   :  { %3801 = vmatpush.msra.mxu2 %v6863_v40  ;;  %3852 = vmatpush.msra.mxu3 %v6776_v50 }
 0x952   :  { %3694 = vmatpush.msra.mxu0 %v6800_v6  ;;  %3750 = vmatpush.msra.mxu1 %v6822_v26 }
 0x953   :  { %3805 = vmatpush.msra.mxu2 %v6874_v41  ;;  %3854 = vmatpush.msra.mxu3 %v6802_v7 }
 0x954   :  { %3697 = vmatpush.msra.mxu0 %v6807_v61  ;;  %3752 = vmatpush.msra.mxu1 %v6850_v60 }
 0x955   :  { %3809 = vmatpush.msra.mxu2 %v6883_v56  ;;  %3856 = vmatpush.msra.mxu3 %v6818_v15 }
 0x956   :  { %3700 = vmatpush.msra.mxu0 %v6834_v31  ;;  %3754 = vmatpush.msra.mxu1 %v6865_v35 }
 0x957   :  { %3813 = vmatpush.msra.mxu2 %v6902_v10  ;;  %3858 = vmatpush.msra.mxu3 %v6822_v26 }
 0x958   :  { %3703 = vmatpush.msra.mxu0 %v8093_v38  ;;  %3756 = vmatpush.msra.mxu1 %v6879_v33 }
 0x959   :  { %3817 = vmatpush.msra.mxu2 %v6916_v28  ;;  %3860 = vmatpush.msra.mxu3 %v6850_v60 }
 0x95a   :  { %3706 = vmatpush.msra.mxu0 %v8094_v43  ;;  %3758 = vmatpush.msra.mxu1 %v6893_v45 }
 0x95b   :  { %3821 = vmatpush.msra.mxu2 %v6930_v11  ;;  %3862 = vmatpush.msra.mxu3 %v6865_v35 }
 0x95c   :  { %3709 = vmatpush.msra.mxu0 %v8095_v55  ;;  %3760 = vmatpush.msra.mxu1 %v6907_v5 }
 0x95d   :  { %3825 = vmatpush.msra.mxu2 %v6942_v17  ;;  %3864 = vmatpush.msra.mxu3 %v6879_v33 }
 0x95e   :  { %3712 = vmatpush.msra.mxu0 %v8096_v12  ;;  %3762 = vmatpush.msra.mxu1 %v6921_v3 }
 0x95f   :  { %3829 = vmatpush.msra.mxu2 %v6954_v34  ;;  %3866 = vmatpush.msra.mxu3 %v6893_v45 }
 0x960   :  { %3948 = vmatpush.msrb.mxu1 %v6811_v22  ;;  %3715 = vmatpush.msra.mxu0 %v6905_v14 }
 0x961   :  { %3833 = vmatpush.msra.mxu2 %v8072_v58  ;;  %3868 = vmatpush.msra.mxu3 %v6907_v5 }
 0x962   :  { %3954 = vmatpush.msrb.mxu1 %v8097_v8  ;;  %3718 = vmatpush.msra.mxu0 %v8098_v62  ;;  %v3509_v62 = vadd.f32 %v7241_v39, %v7959_v1  ;;  %v3518_v8 = vpop.permute.xlu1 %3517  ;;  %v5405_v39 = vld [vmem:[%s7797_s1 + $0x6] sm:$0x3] }
 0x963   :  { %3870 = vmatpush.msra.mxu3 %v6921_v3  ;;  %vm3519_vm3 = vcmp.eq.s32.totalorder %v3518_v8, 1  ;;  %vm4615_vm4 = vcmp.gt.f32.partialorder %v5405_v39, 0.0  ;;  %v8121_v39 = vld [vmem:[#allocation27_spill] sm:$0xff] }
 0x964   :  { %3960 = vmatpush.msrb.mxu1 %v8099_v21  ;;  %3721 = vmatpush.msra.mxu0 %v8100_v53 }
 0x966   :  { %3966 = vmatpush.msrb.mxu1 %v8101_v46  ;;  %3724 = vmatpush.msra.mxu0 %v8102_v49 }
 0x968   :  { %3903 = vmatpush.msrb.mxu0 %v6719_v19  ;;  %3972 = vmatpush.msrb.mxu1 %v8103_v57 }
 0x96a   :  { %3905 = vmatpush.msrb.mxu0 %v6726_v25  ;;  %3978 = vmatpush.msrb.mxu1 %v8104_v0 }
 0x96c   :  { %3907 = vmatpush.msrb.mxu0 %v6736_v52  ;;  %3984 = vmatpush.msrb.mxu1 %v8105_v36  ;;  %v8111_v36 = vld [vmem:[#allocation35_spill] sm:$0xff] }
 0x96e   :  { %3909 = vmatpush.msrb.mxu0 %v6746_v9  ;;  %3990 = vmatpush.msrb.mxu1 %v8106_v42  ;;  %v8112_v42 = vld [vmem:[#allocation24_spill] sm:$0xff] }
 0x970   :  { %3911 = vmatpush.msrb.mxu0 %v6759_v63  ;;  %3996 = vmatpush.msrb.mxu1 %v8107_v20  ;;  %v8113_v20 = vld [vmem:[#allocation26_spill] sm:$0xff] }
 0x972   :  { %3913 = vmatpush.msrb.mxu0 %v6772_v27  ;;  %4002 = vmatpush.msrb.mxu1 %v8108_v29  ;;  %v8114_v29 = vld [vmem:[#allocation28_spill] sm:$0xff] }
 0x974   :  { %3915 = vmatpush.msrb.mxu0 %v6776_v50  ;;  %4008 = vmatpush.msrb.mxu1 %v8109_v18 }
 0x976   :  { %3917 = vmatpush.msrb.mxu0 %v6802_v7  ;;  %4014 = vmatpush.msrb.mxu1 %v8110_v13 }
 0x978   :  { %3919 = vmatpush.msrb.mxu0 %v6818_v15  ;;  %4020 = vmatpush.msrb.mxu1 %v8111_v36 }
 0x97a   :  { %3921 = vmatpush.msrb.mxu0 %v6822_v26  ;;  %4026 = vmatpush.msrb.mxu1 %v8112_v42 }
 0x97c   :  { %3923 = vmatpush.msrb.mxu0 %v6850_v60  ;;  %4032 = vmatpush.msrb.mxu1 %v8113_v20 }
 0x97e   :  { %3925 = vmatpush.msrb.mxu0 %v6865_v35  ;;  %4038 = vmatpush.msrb.mxu1 %v8114_v29 }
 0x980   :  { %3927 = vmatpush.msrb.mxu0 %v6879_v33 }
 0x982   :  { %3929 = vmatpush.msrb.mxu0 %v6893_v45 }
 0x984   :  { %3931 = vmatpush.msrb.mxu0 %v6907_v5 }
 0x986   :  { %3933 = vmatpush.msrb.mxu0 %v6921_v3 }
 0x9bb   :  { %v3307_v36 = vpop.f32.mrf.mxu1 }
 0x9c3   :  { %v3206_v13 = vpop.f32.mrf.mxu0  ;;  %v3361_v42 = vpop.f32.mrf.mxu2 }
 0x9c4   :  { %v3308_v18 = vadd.f32 %v3307_v36, %v3206_v13  ;;  %v3506_v53 = vpop.f32.mrf.mxu1  ;;  %v5400_v13 = vld [vmem:[%s7796_s0 + $0xa] sm:$0x3] }
 0x9c5   :  { %v3400_v57 = vpop.f32.mrf.mxu3 }
 0x9c6   :  { %v3362_v0 = vadd.f32 %v3361_v42, %v3308_v18  ;;  %v8117_v18 = vld [vmem:[#allocation34_spill] sm:$0xff] }
 0x9c8   :  { %v3401_v49 = vadd.f32 %v3400_v57, %v3362_v0 }
 0x9cc   :  { %v3469_v20 = vpop.f32.mrf.mxu0 }
 0x9cd   :  { %v3470_v46 = vadd.f32 %v3469_v20, %v3401_v49 }
 0x9cf   :  { %v3507_v21 = vadd.f32 %v3506_v53, %v3470_v46 }
 0x9d1   :  { %5523 = vlog2.f32 %v3507_v21 }
 0x9d7   :  { %v5524_v29 = vpop.eup %5523 }
 0x9d8   :  { %v3511_v58 = vmul.f32 0.6931472, %v5524_v29  ;;  %v8116_v29 = vld [vmem:[#allocation19_spill] sm:$0xff] }
 0x9da   :  { %v3512_v14 = vadd.f32 %v3511_v58, %v3509_v62  ;;  %v4616_v58 = vsel %vm4615_vm4, 1, %v8070_v23 }
 0x9dc   :  { %v7346_v36 = vsel %vm3519_vm3, %v3512_v14, %v7233_v2  ;;  %v8131_v2 = vld [vmem:[#allocation33_spill] sm:$0xff] }
 0x9dd   :  { %8115 = vst [vmem:[#allocation20_spill] sm:$0xff] %v7346_v36  ;;  %v3528_v49 = vadd.f32 %v5400_v13, %v7346_v36  ;;  %v8118_v13 = vld [vmem:[#allocation13_spill] sm:$0xff] }
 0x9df   :  { %v3529_v53 = vsel %vm217_vm0, %v3528_v49, -inf }
 0x9e0   :  { %3530 = vmax.xlane.f32.xlu0 %v3529_v53  ;;  %v8120_v53 = vld [vmem:[#allocation12_spill] sm:$0xff] }
 0x9f4   :  { %4618 = vperm.xlu0 %5422, %v4616_v58   ;;  %v8122_v58 = vld [vmem:[#allocation22_spill] sm:$0xff] }
 0xa53   :  { %v7354_v62 = vpop.xlane.xlu0 %3530 }
 0xa54   :  { %v3532_v8 = vsub.f32 %v3528_v49, %v7354_v62  ;;  %v8119_v49 = vld [vmem:[#allocation23_spill] sm:$0xff] }
 0xa56   :  { %v3533_v21 = vmul.f32 1.442695, %v3532_v8  ;;  %v8123_v8 = vld [vmem:[#allocation30_spill] sm:$0xff] }
 0xa58   :  { %5525 = vpow2.f32 %v3533_v21  ;;  %v8124_v21 = vld [vmem:[#allocation31_spill] sm:$0xff] }
 0xa5e   :  { %v5526_v14 = vpop.eup %5525 }
 0xa5f   :  { %v3567_v46 = vand.u32 4294901760, %v5526_v14 }
 0xa61   :  { %3673 = vmatmul.f32.vlgmr.msrb.gmra.mxu3 %v3567_v46  ;;  %v3568_v57 = vsub.f32 %v5526_v14, %v3567_v46  ;;  %v8125_v14 = vld [vmem:[#allocation15_spill] sm:$0xff] }
 0xa62   :  { %4099 = vmatpush.msrb.mxu3 %v6719_v19 }
 0xa63   :  { %3727 = vmatmul.f32.vlgmr.msra.gmra.mxu0 %v3568_v57  ;;  %v3569_v0 = vand.u32 4294901760, %v3568_v57 }
 0xa64   :  { %4101 = vmatpush.msrb.mxu3 %v6726_v25  ;;  %4140 = vmatpush.msra.mxu0 %v6754_v44 }
 0xa65   :  { %3766 = vmatmul.f32.vlgmr.msra.gmra.mxu1 %v3569_v0  ;;  %v3570_v42 = vsub.f32 %v3568_v57, %v3569_v0  ;;  %v8127_v57 = vld [vmem:[#allocation21_spill] sm:$0xff] }
 0xa66   :  { %4103 = vmatpush.msrb.mxu3 %v6736_v52  ;;  %4144 = vmatpush.msra.mxu0 %v6767_v51  ;;  %v8128_v0 = vld [vmem:[#allocation25_spill] sm:$0xff] }
 0xa67   :  { %4207 = vmatpush.msra.mxu1 %v6719_v19  ;;  %v3571_v20 = vand.u32 4294901760, %v3570_v42  ;;  %v8129_v42 = vld [vmem:[#allocation29_spill] sm:$0xff] }
 0xa68   :  { %4105 = vmatpush.msrb.mxu3 %v6746_v9  ;;  %4148 = vmatpush.msra.mxu0 %v6784_v24 }
 0xa69   :  { %4209 = vmatpush.msra.mxu1 %v6726_v25  ;;  %3572 = vmatmul.f32.vlgmr.msrb.gmra.mxu2 %v3571_v20  ;;  %v8130_v20 = vld [vmem:[#allocation32_spill] sm:$0xff] }
 0xa6a   :  { %3872 = vmatmul.f32.vlgmr.msra.gmra.mxu3 %v3567_v46  ;;  %4046 = vmatpush.msrb.mxu2 %v6734_v32 }
 0xa6b   :  { %4107 = vmatpush.msrb.mxu3 %v6759_v63  ;;  %4152 = vmatpush.msra.mxu0 %v6797_v16 }
 0xa6c   :  { %4211 = vmatpush.msra.mxu1 %v6736_v52  ;;  %4049 = vmatpush.msrb.mxu2 %v6744_v37 }
 0xa6d   :  { %4109 = vmatpush.msrb.mxu3 %v6772_v27  ;;  %4156 = vmatpush.msra.mxu0 %v6816_v47 }
 0xa6e   :  { %4213 = vmatpush.msra.mxu1 %v6746_v9  ;;  %4052 = vmatpush.msrb.mxu2 %v6757_v30 }
 0xa6f   :  { %4111 = vmatpush.msrb.mxu3 %v6776_v50  ;;  %4160 = vmatpush.msra.mxu0 %v6831_v54 }
 0xa70   :  { %4215 = vmatpush.msra.mxu1 %v6759_v63  ;;  %4055 = vmatpush.msrb.mxu2 %v6770_v4 }
 0xa71   :  { %4113 = vmatpush.msrb.mxu3 %v6802_v7  ;;  %4164 = vmatpush.msra.mxu0 %v6839_v59 }
 0xa72   :  { %4217 = vmatpush.msra.mxu1 %v6772_v27  ;;  %3835 = vmatmul.f32.vlgmr.msra.gmra.mxu2 %v3567_v46  ;;  %v8126_v46 = vld [vmem:[#allocation17_spill] sm:$0xff] }
 0xa73   :  { %4058 = vmatpush.msrb.mxu2 %v6787_v48  ;;  %4115 = vmatpush.msrb.mxu3 %v6818_v15 }
 0xa74   :  { %4168 = vmatpush.msra.mxu0 %v6863_v40  ;;  %4219 = vmatpush.msra.mxu1 %v6776_v50 }
 0xa75   :  { %4061 = vmatpush.msrb.mxu2 %v6800_v6  ;;  %4117 = vmatpush.msrb.mxu3 %v6822_v26 }
 0xa76   :  { %4172 = vmatpush.msra.mxu0 %v6874_v41  ;;  %4221 = vmatpush.msra.mxu1 %v6802_v7 }
 0xa77   :  { %4064 = vmatpush.msrb.mxu2 %v6807_v61  ;;  %4119 = vmatpush.msrb.mxu3 %v6850_v60 }
 0xa78   :  { %4176 = vmatpush.msra.mxu0 %v6883_v56  ;;  %4223 = vmatpush.msra.mxu1 %v6818_v15 }
 0xa79   :  { %4067 = vmatpush.msrb.mxu2 %v6834_v31  ;;  %4121 = vmatpush.msrb.mxu3 %v6865_v35 }
 0xa7a   :  { %4180 = vmatpush.msra.mxu0 %v6902_v10  ;;  %4225 = vmatpush.msra.mxu1 %v6822_v26 }
 0xa7b   :  { %4070 = vmatpush.msrb.mxu2 %v8093_v38  ;;  %4123 = vmatpush.msrb.mxu3 %v6879_v33 }
 0xa7c   :  { %4184 = vmatpush.msra.mxu0 %v6916_v28  ;;  %4227 = vmatpush.msra.mxu1 %v6850_v60 }
 0xa7d   :  { %4073 = vmatpush.msrb.mxu2 %v8094_v43  ;;  %4125 = vmatpush.msrb.mxu3 %v6893_v45 }
 0xa7e   :  { %4188 = vmatpush.msra.mxu0 %v6930_v11  ;;  %4229 = vmatpush.msra.mxu1 %v6865_v35 }
 0xa7f   :  { %4076 = vmatpush.msrb.mxu2 %v8095_v55  ;;  %4127 = vmatpush.msrb.mxu3 %v6907_v5 }
 0xa80   :  { %4192 = vmatpush.msra.mxu0 %v6942_v17  ;;  %4231 = vmatpush.msra.mxu1 %v6879_v33 }
 0xa81   :  { %4079 = vmatpush.msrb.mxu2 %v8096_v12  ;;  %4129 = vmatpush.msrb.mxu3 %v6921_v3 }
 0xa82   :  { %4196 = vmatpush.msra.mxu0 %v6954_v34  ;;  %4233 = vmatpush.msra.mxu1 %v6893_v45 }
 0xa83   :  { %4315 = vmatpush.msra.mxu3 %v6811_v22  ;;  %4082 = vmatpush.msrb.mxu2 %v8116_v29 }
 0xa84   :  { %4200 = vmatpush.msra.mxu0 %v8117_v18  ;;  %4235 = vmatpush.msra.mxu1 %v6907_v5 }
 0xa85   :  { %4321 = vmatpush.msra.mxu3 %v8118_v13  ;;  %4085 = vmatpush.msrb.mxu2 %v8119_v49  ;;  %v3885_v49 = vpop.permute.xlu2 %3884  ;;  %v3876_v13 = vadd.f32 %v7354_v62, %v7959_v1 }
 0xa86   :  { %4237 = vmatpush.msra.mxu1 %v6921_v3  ;;  %vm3886_vm5 = vcmp.eq.s32.totalorder %v3885_v49, 1 }
 0xa87   :  { %4327 = vmatpush.msra.mxu3 %v8120_v53  ;;  %4088 = vmatpush.msrb.mxu2 %v8121_v39 }
 0xa89   :  { %4333 = vmatpush.msra.mxu3 %v8122_v58  ;;  %4091 = vmatpush.msrb.mxu2 %v8123_v8 }
 0xa8b   :  { %4270 = vmatpush.msra.mxu2 %v6719_v19  ;;  %4339 = vmatpush.msra.mxu3 %v8124_v21 }
 0xa8d   :  { %4272 = vmatpush.msra.mxu2 %v6726_v25  ;;  %4345 = vmatpush.msra.mxu3 %v8125_v14 }
 0xa8f   :  { %4274 = vmatpush.msra.mxu2 %v6736_v52  ;;  %4351 = vmatpush.msra.mxu3 %v8126_v46  ;;  %v8132_v46 = vld [vmem:[#allocation35_spill] sm:$0xff] }
 0xa91   :  { %4276 = vmatpush.msra.mxu2 %v6746_v9  ;;  %4357 = vmatpush.msra.mxu3 %v8127_v57  ;;  %v8133_v57 = vld [vmem:[#allocation24_spill] sm:$0xff] }
 0xa93   :  { %4278 = vmatpush.msra.mxu2 %v6759_v63  ;;  %4363 = vmatpush.msra.mxu3 %v8128_v0  ;;  %v8134_v0 = vld [vmem:[#allocation26_spill] sm:$0xff] }
 0xa95   :  { %4280 = vmatpush.msra.mxu2 %v6772_v27  ;;  %4369 = vmatpush.msra.mxu3 %v8129_v42  ;;  %v8135_v42 = vld [vmem:[#allocation28_spill] sm:$0xff] }
 0xa97   :  { %4282 = vmatpush.msra.mxu2 %v6776_v50  ;;  %4375 = vmatpush.msra.mxu3 %v8130_v20 }
 0xa99   :  { %4284 = vmatpush.msra.mxu2 %v6802_v7  ;;  %4381 = vmatpush.msra.mxu3 %v8131_v2 }
 0xa9b   :  { %4286 = vmatpush.msra.mxu2 %v6818_v15  ;;  %4387 = vmatpush.msra.mxu3 %v8132_v46 }
 0xa9d   :  { %4288 = vmatpush.msra.mxu2 %v6822_v26  ;;  %4393 = vmatpush.msra.mxu3 %v8133_v57 }
 0xa9f   :  { %4290 = vmatpush.msra.mxu2 %v6850_v60  ;;  %4399 = vmatpush.msra.mxu3 %v8134_v0 }
 0xaa1   :  { %4292 = vmatpush.msra.mxu2 %v6865_v35  ;;  %4405 = vmatpush.msra.mxu3 %v8135_v42 }
 0xaa3   :  { %4294 = vmatpush.msra.mxu2 %v6879_v33 }
 0xaa5   :  { %4296 = vmatpush.msra.mxu2 %v6893_v45 }
 0xaa7   :  { %4298 = vmatpush.msra.mxu2 %v6907_v5 }
 0xaa9   :  { %4300 = vmatpush.msra.mxu2 %v6921_v3 }
 0xae0   :  { %v3728_v57 = vpop.f32.mrf.mxu0 }
 0xae2   :  { %v3767_v21 = vpop.f32.mrf.mxu1 }
 0xae4   :  { %v3674_v46 = vpop.f32.mrf.mxu3 }
 0xaec   :  { %v3573_v2 = vpop.f32.mrf.mxu2 }
 0xaed   :  { %v3675_v20 = vadd.f32 %v3674_v46, %v3573_v2  ;;  %v3873_v39 = vpop.f32.mrf.mxu3  ;;  %v5402_v2 = vld [vmem:[%s7796_s0 + $0x8] sm:$0x3] }
 0xaef   :  { %v3729_v14 = vadd.f32 %v3728_v57, %v3675_v20  ;;  %v8138_v20 = vld [vmem:[#allocation34_spill] sm:$0xff] }
 0xaf1   :  { %v3768_v8 = vadd.f32 %v3767_v21, %v3729_v14 }
 0xaf5   :  { %v3836_v0 = vpop.f32.mrf.mxu2 }
 0xaf6   :  { %v3837_v58 = vadd.f32 %v3836_v0, %v3768_v8 }
 0xaf8   :  { %v3874_v53 = vadd.f32 %v3873_v39, %v3837_v58 }
 0xafa   :  { %5527 = vlog2.f32 %v3874_v53  ;;  %v5407_v53 = vld [vmem:[%s7797_s1 + $0x4] sm:$0x3] }
 0xafb   :  { %vm4982_vm6 = vcmp.gt.f32.partialorder %v5407_v53, 0.0  ;;  %v8142_v53 = vld [vmem:[#allocation27_spill] sm:$0xff] }
 0xafc   :  { %v4983_v62 = vsel %vm4982_vm6, 1, %v8070_v23  ;;  %v8153_v23 = vld [vmem:[#allocation35_spill] sm:$0xff] }
 0xb00   :  { %v5528_v42 = vpop.eup %5527 }
 0xb01   :  { %v3878_v18 = vmul.f32 0.6931472, %v5528_v42  ;;  %v8137_v42 = vld [vmem:[#allocation19_spill] sm:$0xff] }
 0xb03   :  { %v3879_v29 = vadd.f32 %v3878_v18, %v3876_v13 }
 0xb05   :  { %v7459_v46 = vsel %vm3886_vm5, %v3879_v29, %v7346_v36  ;;  %v8152_v36 = vld [vmem:[#allocation33_spill] sm:$0xff] }
 0xb06   :  { %8136 = vst [vmem:[#allocation11_spill] sm:$0xff] %v7459_v46  ;;  %v3895_v8 = vadd.f32 %v5402_v2, %v7459_v46  ;;  %v8139_v2 = vld [vmem:[#allocation13_spill] sm:$0xff] }
 0xb08   :  { %v3896_v39 = vsel %vm217_vm0, %v3895_v8, -inf }
 0xb09   :  { %3897 = vmax.xlane.f32.xlu1 %v3896_v39  ;;  %v8141_v39 = vld [vmem:[#allocation12_spill] sm:$0xff] }
 0xb22   :  { %4985 = vperm.xlu1 %5420, %v4983_v62   ;;  %v8143_v62 = vld [vmem:[#allocation22_spill] sm:$0xff] }
 0xb7c   :  { %v7467_v18 = vpop.xlane.xlu1 %3897 }
 0xb7d   :  { %v3899_v13 = vsub.f32 %v3895_v8, %v7467_v18  ;;  %v8140_v8 = vld [vmem:[#allocation23_spill] sm:$0xff] }
 0xb7f   :  { %v3900_v49 = vmul.f32 1.442695, %v3899_v13  ;;  %v8144_v13 = vld [vmem:[#allocation30_spill] sm:$0xff] }
 0xb81   :  { %5529 = vpow2.f32 %v3900_v49  ;;  %v8145_v49 = vld [vmem:[#allocation31_spill] sm:$0xff] }
 0xb87   :  { %v5530_v29 = vpop.eup %5529 }
 0xb88   :  { %v3934_v58 = vand.u32 4294901760, %v5530_v29 }
 0xb8a   :  { %4040 = vmatmul.f32.vlgmr.msrb.gmra.mxu1 %v3934_v58  ;;  %v3935_v21 = vsub.f32 %v5530_v29, %v3934_v58  ;;  %v8146_v29 = vld [vmem:[#allocation15_spill] sm:$0xff] }
 0xb8b   :  { %4466 = vmatpush.msrb.mxu1 %v6719_v19 }
 0xb8c   :  { %4094 = vmatmul.f32.vlgmr.msrb.gmra.mxu2 %v3935_v21  ;;  %v3936_v14 = vand.u32 4294901760, %v3935_v21 }
 0xb8d   :  { %4468 = vmatpush.msrb.mxu1 %v6726_v25  ;;  %4507 = vmatpush.msrb.mxu2 %v6754_v44 }
 0xb8e   :  { %4133 = vmatmul.f32.vlgmr.msrb.gmra.mxu3 %v3936_v14  ;;  %v3937_v57 = vsub.f32 %v3935_v21, %v3936_v14  ;;  %v8148_v21 = vld [vmem:[#allocation21_spill] sm:$0xff] }
 0xb8f   :  { %4470 = vmatpush.msrb.mxu1 %v6736_v52  ;;  %4511 = vmatpush.msrb.mxu2 %v6767_v51  ;;  %v8149_v14 = vld [vmem:[#allocation25_spill] sm:$0xff] }
 0xb90   :  { %4574 = vmatpush.msrb.mxu3 %v6719_v19  ;;  %v3938_v0 = vand.u32 4294901760, %v3937_v57  ;;  %v8150_v57 = vld [vmem:[#allocation29_spill] sm:$0xff] }
 0xb91   :  { %4472 = vmatpush.msrb.mxu1 %v6746_v9  ;;  %4515 = vmatpush.msrb.mxu2 %v6784_v24 }
 0xb92   :  { %4576 = vmatpush.msrb.mxu3 %v6726_v25  ;;  %3939 = vmatmul.f32.vlgmr.msrb.gmra.mxu0 %v3938_v0  ;;  %v8151_v0 = vld [vmem:[#allocation32_spill] sm:$0xff] }
 0xb93   :  { %4239 = vmatmul.f32.vlgmr.msra.gmra.mxu1 %v3934_v58  ;;  %4413 = vmatpush.msrb.mxu0 %v6734_v32 }
 0xb94   :  { %4474 = vmatpush.msrb.mxu1 %v6759_v63  ;;  %4519 = vmatpush.msrb.mxu2 %v6797_v16 }
 0xb95   :  { %4578 = vmatpush.msrb.mxu3 %v6736_v52  ;;  %4416 = vmatpush.msrb.mxu0 %v6744_v37 }
 0xb96   :  { %4476 = vmatpush.msrb.mxu1 %v6772_v27  ;;  %4523 = vmatpush.msrb.mxu2 %v6816_v47 }
 0xb97   :  { %4580 = vmatpush.msrb.mxu3 %v6746_v9  ;;  %4419 = vmatpush.msrb.mxu0 %v6757_v30 }
 0xb98   :  { %4478 = vmatpush.msrb.mxu1 %v6776_v50  ;;  %4527 = vmatpush.msrb.mxu2 %v6831_v54 }
 0xb99   :  { %4582 = vmatpush.msrb.mxu3 %v6759_v63  ;;  %4422 = vmatpush.msrb.mxu0 %v6770_v4 }
 0xb9a   :  { %4480 = vmatpush.msrb.mxu1 %v6802_v7  ;;  %4531 = vmatpush.msrb.mxu2 %v6839_v59 }
 0xb9b   :  { %4584 = vmatpush.msrb.mxu3 %v6772_v27  ;;  %4202 = vmatmul.f32.vlgmr.msra.gmra.mxu0 %v3934_v58  ;;  %v8147_v58 = vld [vmem:[#allocation17_spill] sm:$0xff] }
 0xb9c   :  { %4425 = vmatpush.msrb.mxu0 %v6787_v48  ;;  %4482 = vmatpush.msrb.mxu1 %v6818_v15 }
 0xb9d   :  { %4535 = vmatpush.msrb.mxu2 %v6863_v40  ;;  %4586 = vmatpush.msrb.mxu3 %v6776_v50 }
 0xb9e   :  { %4428 = vmatpush.msrb.mxu0 %v6800_v6  ;;  %4484 = vmatpush.msrb.mxu1 %v6822_v26 }
 0xb9f   :  { %4539 = vmatpush.msrb.mxu2 %v6874_v41  ;;  %4588 = vmatpush.msrb.mxu3 %v6802_v7 }
 0xba0   :  { %4431 = vmatpush.msrb.mxu0 %v6807_v61  ;;  %4486 = vmatpush.msrb.mxu1 %v6850_v60 }
 0xba1   :  { %4543 = vmatpush.msrb.mxu2 %v6883_v56  ;;  %4590 = vmatpush.msrb.mxu3 %v6818_v15 }
 0xba2   :  { %4434 = vmatpush.msrb.mxu0 %v6834_v31  ;;  %4488 = vmatpush.msrb.mxu1 %v6865_v35 }
 0xba3   :  { %4547 = vmatpush.msrb.mxu2 %v6902_v10  ;;  %4592 = vmatpush.msrb.mxu3 %v6822_v26 }
 0xba4   :  { %4437 = vmatpush.msrb.mxu0 %v8093_v38  ;;  %4490 = vmatpush.msrb.mxu1 %v6879_v33 }
 0xba5   :  { %4551 = vmatpush.msrb.mxu2 %v6916_v28  ;;  %4594 = vmatpush.msrb.mxu3 %v6850_v60 }
 0xba6   :  { %4440 = vmatpush.msrb.mxu0 %v8094_v43  ;;  %4492 = vmatpush.msrb.mxu1 %v6893_v45 }
 0xba7   :  { %4555 = vmatpush.msrb.mxu2 %v6930_v11  ;;  %4596 = vmatpush.msrb.mxu3 %v6865_v35 }
 0xba8   :  { %4443 = vmatpush.msrb.mxu0 %v8095_v55  ;;  %4494 = vmatpush.msrb.mxu1 %v6907_v5 }
 0xba9   :  { %4559 = vmatpush.msrb.mxu2 %v6942_v17  ;;  %4598 = vmatpush.msrb.mxu3 %v6879_v33 }
 0xbaa   :  { %4446 = vmatpush.msrb.mxu0 %v8096_v12  ;;  %4496 = vmatpush.msrb.mxu1 %v6921_v3 }
 0xbab   :  { %4563 = vmatpush.msrb.mxu2 %v6954_v34  ;;  %4600 = vmatpush.msrb.mxu3 %v6893_v45 }
 0xbac   :  { %4682 = vmatpush.msra.mxu1 %v6811_v22  ;;  %4449 = vmatpush.msrb.mxu0 %v8137_v42 }
 0xbad   :  { %4567 = vmatpush.msrb.mxu2 %v8138_v20  ;;  %4602 = vmatpush.msrb.mxu3 %v6907_v5 }
 0xbae   :  { %4688 = vmatpush.msra.mxu1 %v8139_v2  ;;  %4452 = vmatpush.msrb.mxu0 %v8140_v8  ;;  %v4243_v8 = vadd.f32 %v7467_v18, %v7959_v1 }
 0xbaf   :  { %4604 = vmatpush.msrb.mxu3 %v6921_v3 }
 0xbb0   :  { %4694 = vmatpush.msra.mxu1 %v8141_v39  ;;  %4455 = vmatpush.msrb.mxu0 %v8142_v53  ;;  %v4252_v39 = vpop.permute.xlu2 %4251 }
 0xbb1   :  { %vm4253_vm7 = vcmp.eq.s32.totalorder %v4252_v39, 1 }
 0xbb2   :  { %4700 = vmatpush.msra.mxu1 %v8143_v62  ;;  %4458 = vmatpush.msrb.mxu0 %v8144_v13 }
 0xbb4   :  { %4637 = vmatpush.msra.mxu0 %v6719_v19  ;;  %4706 = vmatpush.msra.mxu1 %v8145_v49 }
 0xbb6   :  { %4639 = vmatpush.msra.mxu0 %v6726_v25  ;;  %4712 = vmatpush.msra.mxu1 %v8146_v29 }
 0xbb8   :  { %4641 = vmatpush.msra.mxu0 %v6736_v52  ;;  %4718 = vmatpush.msra.mxu1 %v8147_v58 }
 0xbba   :  { %4643 = vmatpush.msra.mxu0 %v6746_v9  ;;  %4724 = vmatpush.msra.mxu1 %v8148_v21  ;;  %v8154_v21 = vld [vmem:[#allocation24_spill] sm:$0xff] }
 0xbbc   :  { %4645 = vmatpush.msra.mxu0 %v6759_v63  ;;  %4730 = vmatpush.msra.mxu1 %v8149_v14  ;;  %v8155_v14 = vld [vmem:[#allocation26_spill] sm:$0xff] }
 0xbbe   :  { %4647 = vmatpush.msra.mxu0 %v6772_v27  ;;  %4736 = vmatpush.msra.mxu1 %v8150_v57  ;;  %v8156_v57 = vld [vmem:[#allocation28_spill] sm:$0xff] }
 0xbc0   :  { %4649 = vmatpush.msra.mxu0 %v6776_v50  ;;  %4742 = vmatpush.msra.mxu1 %v8151_v0 }
 0xbc2   :  { %4651 = vmatpush.msra.mxu0 %v6802_v7  ;;  %4748 = vmatpush.msra.mxu1 %v8152_v36 }
 0xbc4   :  { %4653 = vmatpush.msra.mxu0 %v6818_v15  ;;  %4754 = vmatpush.msra.mxu1 %v8153_v23 }
 0xbc6   :  { %4655 = vmatpush.msra.mxu0 %v6822_v26  ;;  %4760 = vmatpush.msra.mxu1 %v8154_v21 }
 0xbc8   :  { %4657 = vmatpush.msra.mxu0 %v6850_v60  ;;  %4766 = vmatpush.msra.mxu1 %v8155_v14 }
 0xbca   :  { %4659 = vmatpush.msra.mxu0 %v6865_v35  ;;  %4772 = vmatpush.msra.mxu1 %v8156_v57 }
 0xbcc   :  { %4661 = vmatpush.msra.mxu0 %v6879_v33 }
 0xbce   :  { %4663 = vmatpush.msra.mxu0 %v6893_v45 }
 0xbd0   :  { %4665 = vmatpush.msra.mxu0 %v6907_v5 }
 0xbd2   :  { %4667 = vmatpush.msra.mxu0 %v6921_v3 }
 0xc07   :  { %v4041_v23 = vpop.f32.mrf.mxu1 }
 0xc0f   :  { %v3940_v36 = vpop.f32.mrf.mxu0  ;;  %v4095_v21 = vpop.f32.mrf.mxu2 }
 0xc10   :  { %v4042_v0 = vadd.f32 %v4041_v23, %v3940_v36  ;;  %v4240_v62 = vpop.f32.mrf.mxu1  ;;  %v5404_v23 = vld [vmem:[%s7796_s0 + $0x6] sm:$0x3] }
 0xc11   :  { %v4134_v29 = vpop.f32.mrf.mxu3 }
 0xc12   :  { %v4096_v58 = vadd.f32 %v4095_v21, %v4042_v0  ;;  %v8157_v21 = vld [vmem:[#allocation34_spill] sm:$0xff]  ;;  %v8160_v0 = vld [vmem:[#allocation12_spill] sm:$0xff] }
 0xc14   :  { %v4135_v49 = vadd.f32 %v4134_v29, %v4096_v58 }
 0xc18   :  { %v4203_v14 = vpop.f32.mrf.mxu0 }
 0xc19   :  { %v4204_v13 = vadd.f32 %v4203_v14, %v4135_v49  ;;  %v8158_v14 = vld [vmem:[#allocation13_spill] sm:$0xff] }
 0xc1b   :  { %v4241_v53 = vadd.f32 %v4240_v62, %v4204_v13 }
 0xc1d   :  { %5531 = vlog2.f32 %v4241_v53 }
 0xc23   :  { %v5532_v57 = vpop.eup %5531 }
 0xc24   :  { %v4245_v2 = vmul.f32 0.6931472, %v5532_v57  ;;  %v8159_v57 = vld [vmem:[#allocation23_spill] sm:$0xff] }
 0xc26   :  { %v4246_v20 = vadd.f32 %v4245_v2, %v4243_v8 }
 0xc28   :  { %v7572_v36 = vsel %vm4253_vm7, %v4246_v20, %v7459_v46  ;;  %v4619_v46 = vpop.permute.xlu0 %4618 }
 0xc29   :  { %v4262_v49 = vadd.f32 %v5404_v23, %v7572_v36  ;;  %v8161_v23 = vld [vmem:[#allocation27_spill] sm:$0xff]  ;;  %vm4620_vm8 = vcmp.eq.s32.totalorder %v4619_v46, 1 }
 0xc2b   :  { %v4263_v62 = vsel %vm217_vm0, %v4262_v49, -inf }
 0xc2c   :  { %4264 = vmax.xlane.f32.xlu2 %v4263_v62  ;;  %v8163_v62 = vld [vmem:[#allocation30_spill] sm:$0xff] }
 0xc9f   :  { %v7576_v53 = vpop.xlane.xlu2 %4264 }
 0xca0   :  { %v4266_v13 = vsub.f32 %v4262_v49, %v7576_v53  ;;  %v8162_v49 = vld [vmem:[#allocation22_spill] sm:$0xff] }
 0xca2   :  { %v4267_v18 = vmul.f32 1.442695, %v4266_v13  ;;  %v8165_v13 = vld [vmem:[#allocation15_spill] sm:$0xff] }
 0xca4   :  { %5533 = vpow2.f32 %v4267_v18  ;;  %v8166_v18 = vld [vmem:[#allocation17_spill] sm:$0xff] }
 0xcaa   :  { %v5534_v2 = vpop.eup %5533 }
 0xcab   :  { %v4301_v8 = vand.u32 4294901760, %v5534_v2 }
 0xcad   :  { %4407 = vmatmul.f32.vlgmr.msra.gmra.mxu3 %v4301_v8  ;;  %v4302_v29 = vsub.f32 %v5534_v2, %v4301_v8  ;;  %v8167_v2 = vld [vmem:[#allocation21_spill] sm:$0xff] }
 0xcae   :  { %4833 = vmatpush.msra.mxu3 %v6719_v19 }
 0xcaf   :  { %4461 = vmatmul.f32.vlgmr.msrb.gmra.mxu0 %v4302_v29  ;;  %v4303_v20 = vand.u32 4294901760, %v4302_v29 }
 0xcb0   :  { %4835 = vmatpush.msra.mxu3 %v6726_v25  ;;  %4874 = vmatpush.msrb.mxu0 %v6754_v44 }
 0xcb1   :  { %4500 = vmatmul.f32.vlgmr.msrb.gmra.mxu1 %v4303_v20  ;;  %v4304_v39 = vsub.f32 %v4302_v29, %v4303_v20  ;;  %v8169_v29 = vld [vmem:[#allocation29_spill] sm:$0xff]  ;;  %v8170_v20 = vld [vmem:[#allocation32_spill] sm:$0xff] }
 0xcb2   :  { %4837 = vmatpush.msra.mxu3 %v6736_v52  ;;  %4878 = vmatpush.msrb.mxu0 %v6767_v51 }
 0xcb3   :  { %4941 = vmatpush.msrb.mxu1 %v6719_v19  ;;  %v4305_v58 = vand.u32 4294901760, %v4304_v39  ;;  %v8171_v39 = vld [vmem:[#allocation33_spill] sm:$0xff] }
 0xcb4   :  { %4839 = vmatpush.msra.mxu3 %v6746_v9  ;;  %4882 = vmatpush.msrb.mxu0 %v6784_v24 }
 0xcb5   :  { %4943 = vmatpush.msrb.mxu1 %v6726_v25  ;;  %4306 = vmatmul.f32.vlgmr.msra.gmra.mxu2 %v4305_v58  ;;  %v8172_v58 = vld [vmem:[#allocation35_spill] sm:$0xff] }
 0xcb6   :  { %4606 = vmatmul.f32.vlgmr.msrb.gmra.mxu3 %v4301_v8  ;;  %4780 = vmatpush.msra.mxu2 %v6734_v32 }
 0xcb7   :  { %4841 = vmatpush.msra.mxu3 %v6759_v63  ;;  %4886 = vmatpush.msrb.mxu0 %v6797_v16 }
 0xcb8   :  { %4945 = vmatpush.msrb.mxu1 %v6736_v52  ;;  %4783 = vmatpush.msra.mxu2 %v6744_v37 }
 0xcb9   :  { %4843 = vmatpush.msra.mxu3 %v6772_v27  ;;  %4890 = vmatpush.msrb.mxu0 %v6816_v47 }
 0xcba   :  { %4947 = vmatpush.msrb.mxu1 %v6746_v9  ;;  %4786 = vmatpush.msra.mxu2 %v6757_v30 }
 0xcbb   :  { %4845 = vmatpush.msra.mxu3 %v6776_v50  ;;  %4894 = vmatpush.msrb.mxu0 %v6831_v54 }
 0xcbc   :  { %4949 = vmatpush.msrb.mxu1 %v6759_v63  ;;  %4789 = vmatpush.msra.mxu2 %v6770_v4 }
 0xcbd   :  { %4847 = vmatpush.msra.mxu3 %v6802_v7  ;;  %4898 = vmatpush.msrb.mxu0 %v6839_v59 }
 0xcbe   :  { %4951 = vmatpush.msrb.mxu1 %v6772_v27  ;;  %4569 = vmatmul.f32.vlgmr.msrb.gmra.mxu2 %v4301_v8  ;;  %v8168_v8 = vld [vmem:[#allocation25_spill] sm:$0xff] }
 0xcbf   :  { %4792 = vmatpush.msra.mxu2 %v6787_v48  ;;  %4849 = vmatpush.msra.mxu3 %v6818_v15 }
 0xcc0   :  { %4902 = vmatpush.msrb.mxu0 %v6863_v40  ;;  %4953 = vmatpush.msrb.mxu1 %v6776_v50 }
 0xcc1   :  { %4795 = vmatpush.msra.mxu2 %v6800_v6  ;;  %4851 = vmatpush.msra.mxu3 %v6822_v26 }
 0xcc2   :  { %4906 = vmatpush.msrb.mxu0 %v6874_v41  ;;  %4955 = vmatpush.msrb.mxu1 %v6802_v7 }
 0xcc3   :  { %4798 = vmatpush.msra.mxu2 %v6807_v61  ;;  %4853 = vmatpush.msra.mxu3 %v6850_v60 }
 0xcc4   :  { %4910 = vmatpush.msrb.mxu0 %v6883_v56  ;;  %4957 = vmatpush.msrb.mxu1 %v6818_v15 }
 0xcc5   :  { %4801 = vmatpush.msra.mxu2 %v6834_v31  ;;  %4855 = vmatpush.msra.mxu3 %v6865_v35 }
 0xcc6   :  { %4914 = vmatpush.msrb.mxu0 %v6902_v10  ;;  %4959 = vmatpush.msrb.mxu1 %v6822_v26 }
 0xcc7   :  { %4804 = vmatpush.msra.mxu2 %v8093_v38  ;;  %4857 = vmatpush.msra.mxu3 %v6879_v33 }
 0xcc8   :  { %4918 = vmatpush.msrb.mxu0 %v6916_v28  ;;  %4961 = vmatpush.msrb.mxu1 %v6850_v60 }
 0xcc9   :  { %4807 = vmatpush.msra.mxu2 %v8094_v43  ;;  %4859 = vmatpush.msra.mxu3 %v6893_v45 }
 0xcca   :  { %4922 = vmatpush.msrb.mxu0 %v6930_v11  ;;  %4963 = vmatpush.msrb.mxu1 %v6865_v35 }
 0xccb   :  { %4810 = vmatpush.msra.mxu2 %v8095_v55  ;;  %4861 = vmatpush.msra.mxu3 %v6907_v5 }
 0xccc   :  { %4926 = vmatpush.msrb.mxu0 %v6942_v17  ;;  %4965 = vmatpush.msrb.mxu1 %v6879_v33 }
 0xccd   :  { %4813 = vmatpush.msra.mxu2 %v8096_v12  ;;  %4863 = vmatpush.msra.mxu3 %v6921_v3 }
 0xcce   :  { %4930 = vmatpush.msrb.mxu0 %v6954_v34  ;;  %4967 = vmatpush.msrb.mxu1 %v6893_v45 }
 0xccf   :  { %5049 = vmatpush.msrb.mxu3 %v6811_v22  ;;  %4816 = vmatpush.msra.mxu2 %v8137_v42  ;;  %v8164_v22 = vld [vmem:[#allocation31_spill] sm:$0xff] }
 0xcd0   :  { %4934 = vmatpush.msrb.mxu0 %v8157_v21  ;;  %4969 = vmatpush.msrb.mxu1 %v6907_v5 }
 0xcd1   :  { %5055 = vmatpush.msrb.mxu3 %v8158_v14  ;;  %4819 = vmatpush.msra.mxu2 %v8159_v57  ;;  %v8173_v14 = vld [vmem:[#allocation24_spill] sm:$0xff] }
 0xcd2   :  { %4971 = vmatpush.msrb.mxu1 %v6921_v3 }
 0xcd3   :  { %5061 = vmatpush.msrb.mxu3 %v8160_v0  ;;  %4822 = vmatpush.msra.mxu2 %v8161_v23  ;;  %v8174_v0 = vld [vmem:[#allocation26_spill] sm:$0xff] }
 0xcd5   :  { %5067 = vmatpush.msrb.mxu3 %v8162_v49  ;;  %4825 = vmatpush.msra.mxu2 %v8163_v62  ;;  %v8175_v49 = vld [vmem:[#allocation28_spill] sm:$0xff]  ;;  %v4610_v62 = vadd.f32 %v7576_v53, %v7959_v1 }
 0xcd7   :  { %5004 = vmatpush.msrb.mxu2 %v6719_v19  ;;  %5073 = vmatpush.msrb.mxu3 %v8164_v22 }
 0xcd9   :  { %5006 = vmatpush.msrb.mxu2 %v6726_v25  ;;  %5079 = vmatpush.msrb.mxu3 %v8165_v13 }
 0xcdb   :  { %5008 = vmatpush.msrb.mxu2 %v6736_v52  ;;  %5085 = vmatpush.msrb.mxu3 %v8166_v18 }
 0xcdd   :  { %5010 = vmatpush.msrb.mxu2 %v6746_v9  ;;  %5091 = vmatpush.msrb.mxu3 %v8167_v2 }
 0xcdf   :  { %5012 = vmatpush.msrb.mxu2 %v6759_v63  ;;  %5097 = vmatpush.msrb.mxu3 %v8168_v8 }
 0xce1   :  { %5014 = vmatpush.msrb.mxu2 %v6772_v27  ;;  %5103 = vmatpush.msrb.mxu3 %v8169_v29 }
 0xce3   :  { %5016 = vmatpush.msrb.mxu2 %v6776_v50  ;;  %5109 = vmatpush.msrb.mxu3 %v8170_v20 }
 0xce5   :  { %5018 = vmatpush.msrb.mxu2 %v6802_v7  ;;  %5115 = vmatpush.msrb.mxu3 %v8171_v39 }
 0xce7   :  { %5020 = vmatpush.msrb.mxu2 %v6818_v15  ;;  %5121 = vmatpush.msrb.mxu3 %v8172_v58 }
 0xce9   :  { %5022 = vmatpush.msrb.mxu2 %v6822_v26  ;;  %5127 = vmatpush.msrb.mxu3 %v8173_v14 }
 0xceb   :  { %5024 = vmatpush.msrb.mxu2 %v6850_v60  ;;  %5133 = vmatpush.msrb.mxu3 %v8174_v0 }
 0xced   :  { %5026 = vmatpush.msrb.mxu2 %v6865_v35  ;;  %5139 = vmatpush.msrb.mxu3 %v8175_v49 }
 0xcef   :  { %5028 = vmatpush.msrb.mxu2 %v6879_v33 }
 0xcf1   :  { %5030 = vmatpush.msrb.mxu2 %v6893_v45 }
 0xcf3   :  { %5032 = vmatpush.msrb.mxu2 %v6907_v5 }
 0xcf5   :  { %5034 = vmatpush.msrb.mxu2 %v6921_v3 }
 0xd2c   :  { %v4462_v2 = vpop.f32.mrf.mxu0 }
 0xd2e   :  { %v4501_v29 = vpop.f32.mrf.mxu1 }
 0xd30   :  { %v4408_v22 = vpop.f32.mrf.mxu3 }
 0xd38   :  { %v4307_v13 = vpop.f32.mrf.mxu2 }
 0xd39   :  { %v4409_v18 = vadd.f32 %v4408_v22, %v4307_v13  ;;  %v4607_v14 = vpop.f32.mrf.mxu3  ;;  %v5406_v22 = vld [vmem:[%s7796_s0 + $0x4] sm:$0x3] }
 0xd3b   :  { %v4463_v8 = vadd.f32 %v4462_v2, %v4409_v18 }
 0xd3d   :  { %v4502_v20 = vadd.f32 %v4501_v29, %v4463_v8 }
 0xd41   :  { %v4570_v39 = vpop.f32.mrf.mxu2 }
 0xd42   :  { %v4571_v58 = vadd.f32 %v4570_v39, %v4502_v20 }
 0xd44   :  { %v4608_v0 = vadd.f32 %v4607_v14, %v4571_v58 }
 0xd46   :  { %5535 = vlog2.f32 %v4608_v0 }
 0xd4c   :  { %v5536_v49 = vpop.eup %5535 }
 0xd4d   :  { %v4612_v23 = vmul.f32 0.6931472, %v5536_v49 }
 0xd4f   :  { %v4613_v57 = vadd.f32 %v4612_v23, %v4610_v62 }
 0xd51   :  { %v7681_v13 = vsel %vm4620_vm8, %v4613_v57, %v7572_v36 }
 0xd52   :  { %v4629_v18 = vadd.f32 %v5406_v22, %v7681_v13 }
 0xd54   :  { %v4630_v2 = vsel %vm217_vm0, %v4629_v18, -inf }
 0xd55   :  { %4631 = vmax.xlane.f32.xlu0 %v4630_v2 }
 0xdc8   :  { %v7685_v8 = vpop.xlane.xlu0 %4631 }
 0xdc9   :  { %v4633_v29 = vsub.f32 %v4629_v18, %v7685_v8 }
 0xdcb   :  { %v4634_v53 = vmul.f32 1.442695, %v4633_v29 }
 0xdcd   :  { %5537 = vpow2.f32 %v4634_v53 }
 0xdd3   :  { %v5538_v23 = vpop.eup %5537 }
 0xdd4   :  { %v4668_v62 = vand.u32 4294901760, %v5538_v23 }
 0xdd6   :  { %4774 = vmatmul.f32.vlgmr.msra.gmra.mxu1 %v4668_v62  ;;  %v4669_v20 = vsub.f32 %v5538_v23, %v4668_v62 }
 0xdd7   :  { %5200 = vmatpush.msra.mxu1 %v6719_v19 }
 0xdd8   :  { %4828 = vmatmul.f32.vlgmr.msra.gmra.mxu2 %v4669_v20  ;;  %v4670_v46 = vand.u32 4294901760, %v4669_v20 }
 0xdd9   :  { %5202 = vmatpush.msra.mxu1 %v6726_v25  ;;  %5241 = vmatpush.msra.mxu2 %v6754_v44 }
 0xdda   :  { %4867 = vmatmul.f32.vlgmr.msra.gmra.mxu3 %v4670_v46  ;;  %v4671_v57 = vsub.f32 %v4669_v20, %v4670_v46 }
 0xddb   :  { %5204 = vmatpush.msra.mxu1 %v6736_v52  ;;  %5245 = vmatpush.msra.mxu2 %v6767_v51 }
 0xddc   :  { %5308 = vmatpush.msra.mxu3 %v6719_v19  ;;  %v4672_v39 = vand.u32 4294901760, %v4671_v57  ;;  %v8176_v19 = vld [vmem:[#allocation23_spill] sm:$0xff] }
 0xddd   :  { %5206 = vmatpush.msra.mxu1 %v6746_v9  ;;  %5249 = vmatpush.msra.mxu2 %v6784_v24 }
 0xdde   :  { %5310 = vmatpush.msra.mxu3 %v6726_v25  ;;  %4673 = vmatmul.f32.vlgmr.msra.gmra.mxu0 %v4672_v39  ;;  %v8177_v25 = vld [vmem:[#allocation27_spill] sm:$0xff] }
 0xddf   :  { %4973 = vmatmul.f32.vlgmr.msrb.gmra.mxu1 %v4668_v62  ;;  %5147 = vmatpush.msra.mxu0 %v6734_v32  ;;  %v8178_v32 = vld [vmem:[#allocation30_spill] sm:$0xff] }
 0xde0   :  { %5208 = vmatpush.msra.mxu1 %v6759_v63  ;;  %5253 = vmatpush.msra.mxu2 %v6797_v16  ;;  %v4986_v16 = vpop.permute.xlu1 %4985 }
 0xde1   :  { %5312 = vmatpush.msra.mxu3 %v6736_v52  ;;  %5150 = vmatpush.msra.mxu0 %v6744_v37  ;;  %vm4987_vm9 = vcmp.eq.s32.totalorder %v4986_v16, 1  ;;  %v8183_v16 = vld [vmem:[#allocation20_spill] sm:$0xff] }
 0xde2   :  { %5210 = vmatpush.msra.mxu1 %v6772_v27  ;;  %5257 = vmatpush.msra.mxu2 %v6816_v47  ;;  %v5408_v47 = vld [vmem:[%s7796_s0 + $0x2] sm:$0x3] }
 0xde3   :  { %5314 = vmatpush.msra.mxu3 %v6746_v9  ;;  %5153 = vmatpush.msra.mxu0 %v6757_v30 }
 0xde4   :  { %5212 = vmatpush.msra.mxu1 %v6776_v50  ;;  %5261 = vmatpush.msra.mxu2 %v6831_v54 }
 0xde5   :  { %5316 = vmatpush.msra.mxu3 %v6759_v63  ;;  %5156 = vmatpush.msra.mxu0 %v6770_v4 }
 0xde6   :  { %5214 = vmatpush.msra.mxu1 %v6802_v7  ;;  %5265 = vmatpush.msra.mxu2 %v6839_v59  ;;  %v8179_v59 = vmov 0  }
 0xde7   :  { %5318 = vmatpush.msra.mxu3 %v6772_v27  ;;  %4936 = vmatmul.f32.vlgmr.msrb.gmra.mxu0 %v4668_v62 }
 0xde8   :  { %5159 = vmatpush.msra.mxu0 %v6787_v48  ;;  %5216 = vmatpush.msra.mxu1 %v6818_v15 }
 0xde9   :  { %5269 = vmatpush.msra.mxu2 %v6863_v40  ;;  %5320 = vmatpush.msra.mxu3 %v6776_v50  ;;  %v5409_v40 = vld [vmem:[%s7797_s1 + $0x2] sm:$0x3] }
 0xdea   :  { %5162 = vmatpush.msra.mxu0 %v6800_v6  ;;  %5218 = vmatpush.msra.mxu1 %v6822_v26  ;;  %v4977_v6 = vadd.f32 %v7685_v8, %v7959_v1  ;;  %vm5349_vm11 = vcmp.gt.f32.partialorder %v5409_v40, 0.0 }
 0xdeb   :  { %5273 = vmatpush.msra.mxu2 %v6874_v41  ;;  %5322 = vmatpush.msra.mxu3 %v6802_v7 }
 0xdec   :  { %5165 = vmatpush.msra.mxu0 %v6807_v61  ;;  %5220 = vmatpush.msra.mxu1 %v6850_v60 }
 0xded   :  { %5277 = vmatpush.msra.mxu2 %v6883_v56  ;;  %5324 = vmatpush.msra.mxu3 %v6818_v15 }
 0xdee   :  { %5168 = vmatpush.msra.mxu0 %v6834_v31  ;;  %5222 = vmatpush.msra.mxu1 %v6865_v35  ;;  %v5395_v31 = vld [vmem:[%s7797_s1 + $0xe] sm:$0x3] }
 0xdef   :  { %5281 = vmatpush.msra.mxu2 %v6902_v10  ;;  %5326 = vmatpush.msra.mxu3 %v6822_v26  ;;  %vm2764_vm10 = vcmp.gt.f32.partialorder %v5395_v31, 0.0  ;;  %v8180_v10 = vld [vmem:[#allocation18_spill] sm:$0xff] }
 0xdf0   :  { %5171 = vmatpush.msra.mxu0 %v8093_v38  ;;  %5224 = vmatpush.msra.mxu1 %v6879_v33 }
 0xdf1   :  { %5285 = vmatpush.msra.mxu2 %v6916_v28  ;;  %5328 = vmatpush.msra.mxu3 %v6850_v60  ;;  %v2765_v60 = vsel %vm2764_vm10, 1, %v8179_v59 }
 0xdf2   :  { %5174 = vmatpush.msra.mxu0 %v8094_v43  ;;  %5226 = vmatpush.msra.mxu1 %v6893_v45 }
 0xdf3   :  { %5289 = vmatpush.msra.mxu2 %v6930_v11  ;;  %5330 = vmatpush.msra.mxu3 %v6865_v35  ;;  %v5350_v35 = vsel %vm5349_vm11, 1, %v8179_v59 }
 0xdf4   :  { %5177 = vmatpush.msra.mxu0 %v8095_v55  ;;  %5228 = vmatpush.msra.mxu1 %v6907_v5 }
 0xdf5   :  { %5293 = vmatpush.msra.mxu2 %v6942_v17  ;;  %5332 = vmatpush.msra.mxu3 %v6879_v33 }
 0xdf6   :  { %5180 = vmatpush.msra.mxu0 %v8096_v12  ;;  %5230 = vmatpush.msra.mxu1 %v6921_v3 }
 0xdf7   :  { %5297 = vmatpush.msra.mxu2 %v6954_v34  ;;  %5334 = vmatpush.msra.mxu3 %v6893_v45  ;;  %v5394_v45 = vld [vmem:[%s7796_s0 + $0xe] sm:$0x3]  ;;  %v5566_v34 = vld [vmem:[%s7799_s3] ss:$0 sm:$0xff]  ;;  %s5650_s0 = smov [#allocation7]  }
 0xdf8   :  { %5183 = vmatpush.msra.mxu0 %v8137_v42  ;;  %s5366_s3 = sshll.u32 %s5650_s0, 4  ;;  %s5367_s3 = int_to_ptr.vmem [resolvable:$true] %s5366_s3 }
 0xdf9   :  { %5301 = vmatpush.msra.mxu2 %v8157_v21  ;;  %5336 = vmatpush.msra.mxu3 %v6907_v5  ;;  %v2761_v5 = vadd.f32 %v5394_v45, %v8180_v10 }
 0xdfa   :  { %5186 = vmatpush.msra.mxu0 %v8176_v19 }
 0xdfb   :  { %5338 = vmatpush.msra.mxu3 %v6921_v3  ;;  %v8181_v3 = vld [vmem:[#allocation36_spill] sm:$0xff] }
 0xdfc   :  { %5189 = vmatpush.msra.mxu0 %v8177_v25 }
 0xdfe   :  { %5192 = vmatpush.msra.mxu0 %v8178_v32 }
 0xe53   :  { %v4775_v52 = vpop.f32.mrf.mxu1 }
 0xe5b   :  { %v4674_v37 = vpop.f32.mrf.mxu0  ;;  %v4829_v44 = vpop.f32.mrf.mxu2 }
 0xe5c   :  { %v4776_v9 = vadd.f32 %v4775_v52, %v4674_v37  ;;  %v4974_v50 = vpop.f32.mrf.mxu1 }
 0xe5d   :  { %v4868_v63 = vpop.f32.mrf.mxu3 }
 0xe5e   :  { %v4830_v30 = vadd.f32 %v4829_v44, %v4776_v9 }
 0xe60   :  { %v4869_v51 = vadd.f32 %v4868_v63, %v4830_v30  ;;  %v3154_v63 = vld [vmem:[#allocation7 + $0xc] sm:$0x3] }
 0xe64   :  { %v4937_v4 = vpop.f32.mrf.mxu0 }
 0xe65   :  { %v4938_v27 = vadd.f32 %v4937_v4, %v4869_v51  ;;  %v4989_v51 = vld [vmem:[#allocation7 + $0x2] sm:$0x3] }
 0xe67   :  { %v4975_v24 = vadd.f32 %v4974_v50, %v4938_v27  ;;  %v8182_v27 = vld [vmem:[#allocation37_spill] sm:$0xff] }
 0xe68   :  { %v3155_v50 = vadd.f32 %v3154_v63, %v8182_v27 }
 0xe69   :  { %5539 = vlog2.f32 %v4975_v24  ;;  %v3521_v24 = vld [vmem:[#allocation7 + $0xa] sm:$0x3] }
 0xe6f   :  { %v5540_v48 = vpop.eup %5539 }
 0xe70   :  { %v4979_v7 = vmul.f32 0.6931472, %v5540_v48  ;;  %v3888_v48 = vld [vmem:[#allocation7 + $0x8] sm:$0x3] }
 0xe72   :  { %v4980_v61 = vadd.f32 %v4979_v7, %v4977_v6  ;;  %v3522_v6 = vadd.f32 %v3521_v24, %v8183_v16  ;;  %v8184_v7 = vld [vmem:[#allocation11_spill] sm:$0xff] }
 0xe74   :  { %v7758_v15 = vsel %vm4987_vm9, %v4980_v61, %v7681_v13  ;;  %v3889_v61 = vadd.f32 %v3888_v48, %v8184_v7 }
 0xe75   :  { %v4996_v26 = vadd.f32 %v5408_v47, %v7758_v15  ;;  %v4255_v47 = vld [vmem:[#allocation7 + $0x6] sm:$0x3]  ;;  %v4990_v40 = vadd.f32 %v4989_v51, %v7758_v15 }
 0xe76   :  { %v4256_v59 = vadd.f32 %v4255_v47, %v7572_v36 }
 0xe77   :  { %v4997_v54 = vsel %vm217_vm0, %v4996_v26, -inf }
 0xe78   :  { %4998 = vmax.xlane.f32.xlu2 %v4997_v54 }
 0xe90   :  { %2767 = vperm.xlu2 %5421, %v2765_v60  }
 0xe98   :  { %5352 = vperm.xlu2 %5421, %v5350_v35  }
 0xeeb   :  { %v4999_v41 = vpop.xlane.xlu2 %4998 }
 0xeec   :  { %v5000_v33 = vsub.f32 %v4996_v26, %v4999_v41  ;;  %v5344_v37 = vadd.f32 %v4999_v41, %v7959_v1  ;;  %v4622_v26 = vld [vmem:[#allocation7 + $0x4] sm:$0x3]  ;;  %v5356_v1 = vld [vmem:[#allocation7] sm:$0x3] }
 0xeed   :  { %v4623_v60 = vadd.f32 %v4622_v26, %v7681_v13 }
 0xeee   :  { %v5001_v56 = vmul.f32 1.442695, %v5000_v33 }
 0xef0   :  { %5541 = vpow2.f32 %v5001_v56 }
 0xef3   :  { %v2768_v28 = vpop.permute.xlu2 %2767 }
 0xef4   :  { %vm2769_vm12 = vcmp.eq.s32.totalorder %v2768_v28, 1 }
 0xef5   :  { %v2770_v11 = vsel %vm2769_vm12, %v2761_v5, %v8181_v3 }
 0xef6   :  { %v5542_v17 = vpop.eup %5541  ;;  %2772 = vst [vmem:[#allocation7 + $0xe] sm:$0x3] %v2770_v11  ;;  %v7778_v38 = vadd.f32 %v5566_v34, %v2770_v11 }
 0xef7   :  { %v5035_v43 = vand.u32 4294901760, %v5542_v17 }
 0xef8   :  { %v2777_v55 = vsel %vm217_vm0, %v7778_v38, -inf }
 0xef9   :  { %5141 = vmatmul.f32.vlgmr.msrb.gmra.mxu3 %v5035_v43  ;;  %2778 = vmax.xlane.f32.xlu1 %v2777_v55  ;;  %v5036_v12 = vsub.f32 %v5542_v17, %v5035_v43 }
 0xefb   :  { %5195 = vmatmul.f32.vlgmr.msra.gmra.mxu0 %v5036_v12  ;;  %v5037_v42 = vand.u32 4294901760, %v5036_v12  ;;  %v5353_v9 = vpop.permute.xlu2 %5352 }
 0xefd   :  { %5234 = vmatmul.f32.vlgmr.msra.gmra.mxu1 %v5037_v42  ;;  %v5038_v21 = vsub.f32 %v5036_v12, %v5037_v42 }
 0xeff   :  { %v5039_v58 = vand.u32 4294901760, %v5038_v21 }
 0xf01   :  { %5040 = vmatmul.f32.vlgmr.msrb.gmra.mxu2 %v5039_v58  ;;  %5340 = vmatmul.f32.vlgmr.msra.gmra.mxu3 %v5035_v43 }
 0xf09   :  { %5303 = vmatmul.f32.vlgmr.msra.gmra.mxu2 %v5035_v43 }
 0xf6c   :  { %v2779_v14 = vpop.xlane.xlu1 %2778 }
 0xf6d   :  { %v2780_v0 = vsub.f32 %v7778_v38, %v2779_v14 }
 0xf6f   :  { %v2781_v49 = vmul.f32 1.442695, %v2780_v0 }
 0xf71   :  { %5543 = vpow2.f32 %v2781_v49 }
 0xf77   :  { %v5544_v22 = vpop.eup %5543 }
 0xf78   :  { %v2783_v18 = vsel %vm217_vm0, %v5544_v22, 0.0  ;;  %v5196_v53 = vpop.f32.mrf.mxu0  ;;  %vm5354_vm0 = vcmp.eq.s32.totalorder %v5353_v9, 1 }
 0xf79   :  { %2784 = vadd.xlane.f32.xlu0 %v2783_v18 }
 0xf7a   :  { %v5235_v62 = vpop.f32.mrf.mxu1 }
 0xf7c   :  { %v5142_v8 = vpop.f32.mrf.mxu3 }
 0xf84   :  { %v5041_v2 = vpop.f32.mrf.mxu2  ;;  %v5341_v39 = vpop.f32.mrf.mxu3 }
 0xf85   :  { %v5143_v29 = vadd.f32 %v5142_v8, %v5041_v2 }
 0xf87   :  { %v5197_v23 = vadd.f32 %v5196_v53, %v5143_v29 }
 0xf89   :  { %v5236_v46 = vadd.f32 %v5235_v62, %v5197_v23 }
 0xf8c   :  { %v5304_v20 = vpop.f32.mrf.mxu2 }
 0xf8d   :  { %v5305_v57 = vadd.f32 %v5304_v20, %v5236_v46 }
 0xf8f   :  { %v5342_v19 = vadd.f32 %v5341_v39, %v5305_v57 }
 0xf91   :  { %5545 = vlog2.f32 %v5342_v19 }
 0xf97   :  { %v5546_v25 = vpop.eup %5545 }
 0xf98   :  { %v5346_v52 = vmul.f32 0.6931472, %v5546_v25 }
 0xf9a   :  { %v5347_v44 = vadd.f32 %v5346_v52, %v5344_v37 }
 0xf9c   :  { %v5355_v54 = vsel %vm5354_vm0, %v5347_v44, %v7758_v15 }
 0xf9d   :  { %v5357_v45 = vadd.f32 %v5356_v1, %v5355_v54 }
 0xfec   :  { %v2785_v32 = vpop.xlane.xlu0 %2784 }
 0xfed   :  { %5547 = vlog2.f32 %v2785_v32 }
 0xff3   :  { %v5548_v30 = vpop.eup %5547 }
 0xff4   :  { %v2787_v4 = vmul.f32 0.6931472, %v5548_v30 }
 0xff6   :  { %v2788_v31 = vadd.f32 %v2787_v4, %v2779_v14 }
 0xff8   :  { %v2789_v35 = vsub.f32 %v7778_v38, %v2788_v31  ;;  %v3156_v41 = vsub.f32 %v3155_v50, %v2788_v31  ;;  %v3523_v33 = vsub.f32 %v3522_v6, %v2788_v31  ;;  %v3890_v56 = vsub.f32 %v3889_v61, %v2788_v31 }
 0xff9   :  { %v4257_v10 = vsub.f32 %v4256_v59, %v2788_v31  ;;  %v4624_v5 = vsub.f32 %v4623_v60, %v2788_v31  ;;  %v4991_v17 = vsub.f32 %v4990_v40, %v2788_v31  ;;  %v5358_v43 = vsub.f32 %v5357_v45, %v2788_v31 }
 0xffa   :  { %v2790_v28 = vmul.f32 1.442695, %v2789_v35  ;;  %v3157_v3 = vmul.f32 1.442695, %v3156_v41  ;;  %v3524_v11 = vmul.f32 1.442695, %v3523_v33 }
 0xffb   :  { %v3891_v34 = vmul.f32 1.442695, %v3890_v56  ;;  %v4258_v36 = vmul.f32 1.442695, %v4257_v10  ;;  %v4625_v13 = vmul.f32 1.442695, %v4624_v5 }
 0xffc   :  { %5549 = vpow2.f32 %v2790_v28  ;;  %v4992_v15 = vmul.f32 1.442695, %v4991_v17  ;;  %v5359_v38 = vmul.f32 1.442695, %v5358_v43 }
 0xffd   :  { %5551 = vpow2.f32 %v3157_v3 }
 0xffe   :  { %5553 = vpow2.f32 %v3524_v11 }
 0xfff   :  { %5555 = vpow2.f32 %v3891_v34 }
0x1000   :  { %5557 = vpow2.f32 %v4258_v36 }
0x1001   :  { %5559 = vpow2.f32 %v4625_v13 }
0x1002   :  { %v5550_v55 = vpop.eup %5549  ;;  %5561 = vpow2.f32 %v4992_v15 }
0x1003   :  { %v5552_v12 = vpop.eup %5551  ;;  %5563 = vpow2.f32 %v5359_v38  ;;  %2792 = vst [vmem:[#allocation7 + $0xe] sm:$0x3] %v5550_v55 }
0x1004   :  { %v5554_v42 = vpop.eup %5553  ;;  %3159 = vst [vmem:[#allocation7 + $0xc] sm:$0x3] %v5552_v12 }
0x1005   :  { %v5556_v21 = vpop.eup %5555  ;;  %3526 = vst [vmem:[#allocation7 + $0xa] sm:$0x3] %v5554_v42 }
0x1006   :  { %v5558_v58 = vpop.eup %5557  ;;  %3893 = vst [vmem:[#allocation7 + $0x8] sm:$0x3] %v5556_v21 }
0x1007   :  { %v5560_v14 = vpop.eup %5559  ;;  %4260 = vst [vmem:[#allocation7 + $0x6] sm:$0x3] %v5558_v58 }
0x1008   :  { %v5562_v0 = vpop.eup %5561  ;;  %4627 = vst [vmem:[#allocation7 + $0x4] sm:$0x3] %v5560_v14 }
0x1009   :  { %v5564_v49 = vpop.eup %5563  ;;  %4994 = vst [vmem:[#allocation7 + $0x2] sm:$0x3] %v5562_v0 }
0x100a   :  { %5361 = vst [vmem:[#allocation7] sm:$0x3] %v5564_v49 }
0x100b   :  { %5374 = dma.vmem_to_hbm [thread:$0]  %s5367_s3, 256, %s5369_s20, [#allocation4], %s5651_s21, %s5651_s21, %s5652_s22  }
0x100c   :  { %5643 = dma.done.wait [#allocation4], 256  }
0x100d   :  { %5644 = vsyncadd [#allocation4], 4294967040 }
0x100e   :  { %5379 = vsyncpa [#allocation3], 1 }
0x100f   :  { %5380 = vsyncpa [#allocation6], 1 }
0x1010   :  { %5381 = vsyncpa [#allocation4], 1 }

</bundles_post_ra>
